<compile_context>
chip_gen: v5e
topology: v5e:2x2
jax: 0.10.0
libtpu: 0.0.40
codegen_flags: <defaults>
</compile_context>

<pallas_src>
import functools

import jax
import jax.numpy as jnp
from jax.experimental import pallas as pl
from jax.experimental.pallas import tpu as pltpu

LANE = 128


def _rup(n: int, m: int = LANE) -> int:
    return ((n + m - 1) // m) * m


def _vmem_limit_bytes() -> int:
    # v5e/v6e have 128 MiB of VMEM per TensorCore, v7x only 64 MiB.  Query when
    # possible, otherwise assume the most constrained generation.
    cap = 64 * 1024 * 1024
    try:
        cap = int(getattr(pltpu.get_tpu_info(), "vmem_capacity_bytes", cap))
    except Exception:
        pass
    return max(16 * 1024 * 1024, min((cap * 3) // 4, 96 * 1024 * 1024))


_VMEM_LIMIT = _vmem_limit_bytes()


# ---------------------------------------------------------------------------
# Pallas kernels
# ---------------------------------------------------------------------------
def _matmul_kernel(x_ref, w_ref, b_ref, o_ref, *, relu):
    # out = [relu]( x @ w + bias )   (BN scale already folded into w columns)
    acc = jnp.dot(x_ref[...], w_ref[...], preferred_element_type=jnp.float32)
    acc = acc + b_ref[...]
    if relu:
        acc = jnp.maximum(acc, 0.0)
    o_ref[...] = acc.astype(o_ref.dtype)


def _matmul_res_kernel(x_ref, w_ref, b_ref, r_ref, o_ref, *, relu):
    # out = [relu]( x @ w + bias + residual )
    acc = jnp.dot(x_ref[...], w_ref[...], preferred_element_type=jnp.float32)
    acc = acc + b_ref[...] + r_ref[...].astype(jnp.float32)
    if relu:
        acc = jnp.maximum(acc, 0.0)
    o_ref[...] = acc.astype(o_ref.dtype)


def _conv3x3_kernel(x_ref, w_ref, b_ref, o_ref, *, taps):
    # 3x3 conv = 9 accumulating MXU matmuls over contiguous tap slices of the
    # phase-decomposed activation; bias + ReLU epilogue on the accumulator.
    #  x_ref: (1, s*s, Hq*Wq, C) bf16   w_ref: (9, C, tn) bf16
    #  b_ref: (1, tn) f32               o_ref: (1, Ho*Wq, tn) bf16
    mo, tn = o_ref.shape[1], o_ref.shape[2]
    acc = jnp.zeros((mo, tn), jnp.float32)
    for t, (phase, off) in enumerate(taps):
        patch = x_ref[0, phase, off:off + mo, :]          # contiguous (mo, C)
        acc = acc + jnp.dot(patch, w_ref[t], preferred_element_type=jnp.float32)
    acc = jnp.maximum(acc + b_ref[...], 0.0)
    o_ref[0, :, :] = acc.astype(o_ref.dtype)


# ---------------------------------------------------------------------------
# Tile selection (VMEM aware)
# ---------------------------------------------------------------------------
def _pick_tn(n):
    for tn in (512, 256, 128):
        if n % tn == 0:
            return tn
    return n


def _pick_tm(m, k, tn, has_res):
    budget = _VMEM_LIMIT // 2
    divisors = [tm for tm in (1024, 512, 256, 128, 64, 32, 16, 8) if m % tm == 0]
    if not divisors:
        return m                                 # full-dim block (always legal)
    for tm in divisors:                          # descending: biggest that fits
        need = 2 * 2 * (tm * k + k * tn + tm * tn * (2 if has_res else 1)) + 4 * tn
        if need <= budget:
            return tm
    return divisors[-1]


# ---------------------------------------------------------------------------
# Fused 1x1 conv (+BN bias, +residual, +ReLU) as a tiled GEMM
# ---------------------------------------------------------------------------
def fused_matmul(x, w, bias, residual=None, relu=True):
    """x:(M,K) bf16 @ w:(K,N) bf16 + bias:(1,N) f32 [+ residual:(M,N)] [ReLU]."""
    M, K = x.shape
    K2, N = w.shape
    assert K == K2
    tn = _pick_tn(N)
    tm = _pick_tm(M, K, tn, residual is not None)
    grid = (M // tm, N // tn)

    in_specs = [
        pl.BlockSpec((tm, K), lambda i, j: (i, 0)),
        pl.BlockSpec((K, tn), lambda i, j: (0, j)),
        pl.BlockSpec((1, tn), lambda i, j: (0, j)),
    ]
    args = [x, w, bias]
    if residual is not None:
        in_specs.append(pl.BlockSpec((tm, tn), lambda i, j: (i, j)))
        args.append(residual)
        kernel = functools.partial(_matmul_res_kernel, relu=relu)
    else:
        kernel = functools.partial(_matmul_kernel, relu=relu)

    return pl.pallas_call(
        kernel,
        out_shape=jax.ShapeDtypeStruct((M, N), x.dtype),
        grid=grid,
        in_specs=in_specs,
        out_specs=pl.BlockSpec((tm, tn), lambda i, j: (i, j)),
        compiler_params=pltpu.CompilerParams(
            dimension_semantics=("parallel", "parallel"),
            vmem_limit_bytes=_VMEM_LIMIT),
    )(*args)


# ---------------------------------------------------------------------------
# Fused 3x3 conv (pad=1, stride s) + BN bias + ReLU, taps accumulated in-kernel
# ---------------------------------------------------------------------------
def conv3x3_bn_relu(h, w9, bias, stride):
    """h:(N,H,W,C) bf16, w9:(9,C,Cout) bf16 (tap order dh,dw), bias:(1,Cout) f32.

    Returns (N*Ho*Wo, Cout) bf16 and (Ho, Wo)."""
    N, H, W, C = h.shape
    Cout = w9.shape[2]
    s = int(stride)
    Ho = (H - 1) // s + 1
    Wo = (W - 1) // s + 1
    q_max = 2 // s                                # largest tap offset per phase
    Wq = max(Wo + q_max, (W + 2 + s - 1) // s)
    Hq = max(Ho + q_max + (1 if q_max else 0), (H + 2 + s - 1) // s)

    # Single padded, phase-decomposed copy of the activation (1x HBM copy;
    # replaces the 9x im2col buffer).  Phase (ph,pw) holds xpad[ph::s, pw::s].
    pad_b = s * Hq - (H + 1)
    pad_r = s * Wq - (W + 1)
    xp = jnp.pad(h, ((0, 0), (1, pad_b), (1, pad_r), (0, 0)))
    xp = xp.reshape(N, Hq, s, Wq, s, C).transpose(0, 2, 4, 1, 3, 5)
    xp = xp.reshape(N, s * s, Hq * Wq, C)

    Mq = Hq * Wq
    Mo = Ho * Wq                 # "wide" rows: Wq cols/row, first Wo are valid
    taps = []
    for dh in range(3):
        for dw in range(3):
            taps.append(((dh % s) * s + (dw % s), (dh // s) * Wq + (dw // s)))

    tn = _pick_tn(Cout)
    grid = (N, Cout // tn)
    kernel = functools.partial(_conv3x3_kernel, taps=tuple(taps))
    out = pl.pallas_call(
        kernel,
        out_shape=jax.ShapeDtypeStruct((N, Mo, Cout), h.dtype),
        grid=grid,
        in_specs=[
            pl.BlockSpec((1, s * s, Mq, C), lambda n, j: (n, 0, 0, 0)),
            pl.BlockSpec((9, C, tn), lambda n, j: (0, 0, j)),
            pl.BlockSpec((1, tn), lambda n, j: (0, j)),
        ],
        out_specs=pl.BlockSpec((1, Mo, tn), lambda n, j: (n, 0, j)),
        compiler_params=pltpu.CompilerParams(
            dimension_semantics=("parallel", "parallel"),
            vmem_limit_bytes=_VMEM_LIMIT),
    )(xp, w9, bias)

    # Drop the (Wq - Wo) garbage columns of each output row.
    out = out.reshape(N, Ho, Wq, Cout)[:, :, :Wo, :]
    return out.reshape(N * Ho * Wo, Cout), (Ho, Wo)


# ---------------------------------------------------------------------------
# Parameters (deterministic synthetic weights, inference-mode BN folded)
# ---------------------------------------------------------------------------
def _init_conv_bn(key, fan_in, w_shape, cout, eps=1e-5):
    kw, kg, kb, km, kv = jax.random.split(key, 5)
    w = jax.random.normal(kw, w_shape, jnp.float32) / jnp.sqrt(float(fan_in))
    gamma = 1.0 + 0.1 * jax.random.normal(kg, (cout,), jnp.float32)
    beta = 0.1 * jax.random.normal(kb, (cout,), jnp.float32)
    mean = 0.1 * jax.random.normal(km, (cout,), jnp.float32)
    var = jax.random.uniform(kv, (cout,), jnp.float32, minval=0.5, maxval=1.5)
    scale = gamma / jnp.sqrt(var + eps)
    bias = beta - mean * scale
    w_folded = w * scale.reshape((1,) * (w.ndim - 1) + (cout,))
    return w_folded.astype(jnp.bfloat16), bias.astype(jnp.float32)


def _pad2d(w, kp, np_):
    k, n = w.shape
    return jnp.pad(w, ((0, kp - k), (0, np_ - n)))


def _pad_bias(b, np_):
    return jnp.pad(b, (0, np_ - b.shape[0])).reshape(1, np_).astype(jnp.float32)


def _pad_w2(w, kp, np_):
    _, _, k, n = w.shape
    w = jnp.pad(w, ((0, 0), (0, 0), (0, kp - k), (0, np_ - n)))
    return w.reshape(9, kp, np_)                  # tap order (dh, dw)


def init_res_block(key, in_ch, out_ch, expansion, down):
    k1, k2, k3, kd = jax.random.split(key, 4)
    co = out_ch * expansion
    w1, b1 = _init_conv_bn(k1, in_ch, (in_ch, out_ch), out_ch)
    w2, b2 = _init_conv_bn(k2, 9 * out_ch, (3, 3, out_ch, out_ch), out_ch)
    w3, b3 = _init_conv_bn(k3, out_ch, (out_ch, co), co)
    ref = {"w1": w1, "b1": b1, "w2": w2, "b2": b2, "w3": w3, "b3": b3}
    ip, mp_, op = _rup(in_ch), _rup(out_ch), _rup(co)
    dev = {
        "w1": _pad2d(w1, ip, mp_), "b1": _pad_bias(b1, mp_),
        "w2": _pad_w2(w2, mp_, mp_), "b2": _pad_bias(b2, mp_),
        "w3": _pad2d(w3, mp_, op), "b3": _pad_bias(b3, op),
    }
    if down:
        wd, bd = _init_conv_bn(kd, in_ch, (in_ch, co), co)
        ref["wd"], ref["bd"] = wd, bd
        dev["wd"], dev["bd"] = _pad2d(wd, ip, op), _pad_bias(bd, op)
    return {"ref": ref, "dev": dev}


def init_conv25_params(key, in_ch, out_ch, stride, layer, expansion=4):
    blocks = []
    c_in = in_ch
    for i in range(layer):
        key, sub = jax.random.split(key)
        s = stride if i == 0 else 1
        down = (i == 0)
        blk = init_res_block(sub, c_in, out_ch, expansion, down)
        blk["meta"] = (s, down)
        blocks.append(blk)
        c_in = out_ch * expansion
    return blocks


# ---------------------------------------------------------------------------
# Pallas forward
# ---------------------------------------------------------------------------
def _pad_last(x, target):
    c = x.shape[-1]
    if c == target:
        return x
    pad = [(0, 0)] * (x.ndim - 1) + [(0, target - c)]
    return jnp.pad(x, pad)


def res_block_fwd(x, p, stride, down):
    # x: (N, H, W, Kp) bf16, channel dim lane-padded.
    N, H, W, Kp = x.shape
    mid_p = p["w1"].shape[1]
    out_p = p["w3"].shape[1]

    # 1x1 conv + folded BN + ReLU
    h = fused_matmul(x.reshape(N * H * W, Kp), p["w1"], p["b1"], relu=True)
    h = h.reshape(N, H, W, mid_p)

    # 3x3 conv (pad=1, stride) + folded BN + ReLU  (taps accumulated in-kernel)
    h2, (Ho, Wo) = conv3x3_bn_relu(h, p["w2"], p["b2"], stride)

    # identity / downsample path
    if down:
        xs = x[:, ::stride, ::stride, :]
        ident = fused_matmul(xs.reshape(N * Ho * Wo, Kp), p["wd"], p["bd"],
                             relu=False)
    else:
        ident = x.reshape(N * H * W, Kp)

    # 1x1 expansion conv + folded BN + residual add + ReLU (single fused kernel)
    out = fused_matmul(h2, p["w3"], p["b3"], residual=ident, relu=True)
    return out.reshape(N, Ho, Wo, out_p)


@functools.partial(jax.jit, static_argnums=(2, 3))
def conv25_forward(x_nchw, dev_params, meta, out_channels):
    """x_nchw: (N, C, H, W) f32 -> (N, out_channels, Ho, Wo) f32."""
    x = jnp.transpose(x_nchw, (0, 2, 3, 1)).astype(jnp.float32)
    x = _pad_last(x, _rup(x.shape[-1])).astype(jnp.bfloat16)
    for p, (stride, down) in zip(dev_params, meta):
        x = res_block_fwd(x, p, stride, down)
    x = x[..., :out_channels].astype(jnp.float32)
    return jnp.transpose(x, (0, 3, 1, 2))


# ---------------------------------------------------------------------------
# Pure-JAX reference (mirrors the kernel's bf16 dataflow) for validation
# ---------------------------------------------------------------------------
def _bf16_round(x):
    return x.astype(jnp.bfloat16).astype(jnp.float32)


def _ref_conv1x1(x, w, b, relu):
    y = jnp.einsum("nhwc,cd->nhwd", x, w,
                   precision=jax.lax.Precision.HIGHEST) + b
    return jnp.maximum(y, 0.0) if relu else y


def _ref_conv3x3(x, w, b, stride):
    y = jax.lax.conv_general_dilated(
        x, w, window_strides=(stride, stride), padding=((1, 1), (1, 1)),
        dimension_numbers=("NHWC", "HWIO", "NHWC"),
        precision=jax.lax.Precision.HIGHEST)
    return jnp.maximum(y + b, 0.0)


def _ref_block(x, rp, stride, down):
    f32 = jnp.float32
    h = _bf16_round(_ref_conv1x1(x, rp["w1"].astype(f32), rp["b1"], relu=True))
    h2 = _bf16_round(_ref_conv3x3(h, rp["w2"].astype(f32), rp["b2"], stride))
    if down:
        xs = x[:, ::stride, ::stride, :]
        ident = _bf16_round(
            _ref_conv1x1(xs, rp["wd"].astype(f32), rp["bd"], relu=False))
    else:
        ident = x
    y = _ref_conv1x1(h2, rp["w3"].astype(f32), rp["b3"], relu=False)
    return _bf16_round(jnp.maximum(y + ident, 0.0))


def conv25_reference(x_nchw, ref_params, meta):
    x = _bf16_round(jnp.transpose(x_nchw, (0, 2, 3, 1)).astype(jnp.float32))
    for rp, (stride, down) in zip(ref_params, meta):
        x = _ref_block(x, rp, stride, down)
    return jnp.transpose(x, (0, 3, 1, 2))


# ---------------------------------------------------------------------------
# Demo
# ---------------------------------------------------------------------------
if __name__ == "__main__":
    in_ch, out_ch, stride, layer, expansion = 4, 4, 2, 2, 4
    N, H, W = 2, 16, 16

    key = jax.random.PRNGKey(0)
    key, xkey = jax.random.split(key)
    x = jax.random.normal(xkey, (N, in_ch, H, W), jnp.float32)   # NCHW input

    blocks = init_conv25_params(key, in_ch, out_ch, stride, layer, expansion)
    dev_params = tuple(b["dev"] for b in blocks)
    ref_params = tuple(b["ref"] for b in blocks)
    meta = tuple(b["meta"] for b in blocks)
    cout = out_ch * expansion

    out = conv25_forward(x, dev_params, meta, cout)
    out = jax.block_until_ready(out)

    Ho = (H - 1) // stride + 1
    Wo = (W - 1) // stride + 1
    assert out.shape == (N, cout, Ho, Wo), (out.shape, (N, cout, Ho, Wo))
    assert bool(jnp.all(out >= 0.0))          # final ReLU

    ref = conv25_reference(x, ref_params, meta)
    err = float(jnp.max(jnp.abs(out - ref)))
    ref_mag = float(jnp.max(jnp.abs(ref)))
    assert err <= 3e-2 * ref_mag + 3e-2, ("mismatch", err, ref_mag)

    print("KERNEL_OK")
</pallas_src>

<mosaic_0001>
module attributes {stable_mosaic.version = 11 : i64} {
  func.func @_matmul_kernel(%arg0: i32, %arg1: i32, %arg2: memref<512x128xbf16, #tpu.memory_space<vmem>>, %arg3: memref<128x128xbf16, #tpu.memory_space<vmem>>, %arg4: memref<1x128xf32, #tpu.memory_space<vmem>>, %arg5: memref<512x128xbf16, #tpu.memory_space<vmem>>) attributes {dimension_semantics = [#tpu.dimension_semantics<parallel>, #tpu.dimension_semantics<parallel>], iteration_bounds = array<i64: 1, 1>, scalar_prefetch = 0 : i64, scratch_operands = 0 : i64, tpu.core_type = #tpu.core_type<tc>, window_params = [{transform_indices = @transform_0, window_bounds = array<i64: 512, 128>}, {transform_indices = @transform_1, window_bounds = array<i64: 128, 128>}, {transform_indices = @transform_2, window_bounds = array<i64: 1, 128>}, {transform_indices = @transform_3, window_bounds = array<i64: 512, 128>}]} {
    %c0 = arith.constant 0 : index
    %c0_0 = arith.constant 0 : index
    %0 = vector.load %arg2[%c0, %c0_0] : memref<512x128xbf16, #tpu.memory_space<vmem>>, vector<512x128xbf16>
    %c0_1 = arith.constant 0 : index
    %c0_2 = arith.constant 0 : index
    %1 = vector.load %arg3[%c0_1, %c0_2] : memref<128x128xbf16, #tpu.memory_space<vmem>>, vector<128x128xbf16>
    %cst = arith.constant dense<0.000000e+00> : vector<512x128xf32>
    %2 = tpu.matmul %0, %1, %cst {dimension_numbers = #tpu.dot_dimension_numbers<[1], [0], [0], [1], [0, 0, 1, 1], [], []>} : vector<512x128xbf16>, vector<128x128xbf16>, vector<512x128xf32> -> vector<512x128xf32>
    %c0_3 = arith.constant 0 : index
    %c0_4 = arith.constant 0 : index
    %3 = vector.load %arg4[%c0_3, %c0_4] : memref<1x128xf32, #tpu.memory_space<vmem>>, vector<1x128xf32>
    %4 = vector.broadcast %3 : vector<1x128xf32> to vector<512x128xf32>
    %5 = arith.addf %2, %4 : vector<512x128xf32>
    %cst_5 = arith.constant 0.000000e+00 : f32
    %6 = vector.broadcast %cst_5 : f32 to vector<512x128xf32>
    %7 = arith.maximumf %5, %6 : vector<512x128xf32>
    %8 = arith.truncf %7 : vector<512x128xf32> to vector<512x128xbf16>
    %c0_6 = arith.constant 0 : index
    %c0_7 = arith.constant 0 : index
    %9 = vector.load %arg5[%c0_6, %c0_7] : memref<512x128xbf16, #tpu.memory_space<vmem>>, vector<512x128xbf16>
    tpu.vector_store %arg5[%c0_6, %c0_7], %8 {strides = array<i32>} : memref<512x128xbf16, #tpu.memory_space<vmem>>, vector<512x128xbf16>,
    return
  }
  func.func @transform_0(%arg0: i32, %arg1: i32) -> (i32, i32) {
    %c0_i32 = arith.constant 0 : i32
    %c0_i32_0 = arith.constant 0 : i32
    return %arg0, %c0_i32 : i32, i32
  }
  func.func @transform_1(%arg0: i32, %arg1: i32) -> (i32, i32) {
    %c0_i32 = arith.constant 0 : i32
    %c0_i32_0 = arith.constant 0 : i32
    return %c0_i32, %arg1 : i32, i32
  }
  func.func @transform_2(%arg0: i32, %arg1: i32) -> (i32, i32) {
    %c0_i32 = arith.constant 0 : i32
    %c0_i32_0 = arith.constant 0 : i32
    return %c0_i32, %arg1 : i32, i32
  }
  func.func @transform_3(%arg0: i32, %arg1: i32) -> (i32, i32) {
    %c0_i32 = arith.constant 0 : i32
    return %arg0, %arg1 : i32, i32
  }
}

module attributes {stable_mosaic.version = 11 : i64} {
  func.func @_conv3x3_kernel(%arg0: i32, %arg1: i32, %arg2: memref<1x4x90x128xbf16, #tpu.memory_space<vmem>>, %arg3: memref<9x128x128xbf16, #tpu.memory_space<vmem>>, %arg4: memref<1x128xf32, #tpu.memory_space<vmem>>, %arg5: memref<1x72x128xbf16, #tpu.memory_space<vmem>>) attributes {dimension_semantics = [#tpu.dimension_semantics<parallel>, #tpu.dimension_semantics<parallel>], iteration_bounds = array<i64: 2, 1>, scalar_prefetch = 0 : i64, scratch_operands = 0 : i64, tpu.core_type = #tpu.core_type<tc>, window_params = [{transform_indices = @transform_0, window_bounds = array<i64: 1, 4, 90, 128>}, {transform_indices = @transform_1, window_bounds = array<i64: 9, 128, 128>}, {transform_indices = @transform_2, window_bounds = array<i64: 1, 128>}, {transform_indices = @transform_3, window_bounds = array<i64: 1, 72, 128>}]} {
    %cst = arith.constant 0.000000e+00 : f32
    %0 = vector.broadcast %cst : f32 to vector<72x128xf32>
    %c0 = arith.constant 0 : index
    %c0_0 = arith.constant 0 : index
    %c0_1 = arith.constant 0 : index
    %c0_2 = arith.constant 0 : index
    %1 = vector.load %arg2[%c0, %c0_0, %c0_1, %c0_2] : memref<1x4x90x128xbf16, #tpu.memory_space<vmem>>, vector<1x1x72x128xbf16>
    %2 = vector.shape_cast %1 : vector<1x1x72x128xbf16> to vector<72x128xbf16>
    %c0_3 = arith.constant 0 : index
    %c0_4 = arith.constant 0 : index
    %c0_5 = arith.constant 0 : index
    %3 = vector.load %arg3[%c0_3, %c0_4, %c0_5] : memref<9x128x128xbf16, #tpu.memory_space<vmem>>, vector<1x128x128xbf16>
    %4 = vector.shape_cast %3 : vector<1x128x128xbf16> to vector<128x128xbf16>
    %cst_6 = arith.constant dense<0.000000e+00> : vector<72x128xf32>
    %5 = tpu.matmul %2, %4, %cst_6 {dimension_numbers = #tpu.dot_dimension_numbers<[1], [0], [0], [1], [0, 0, 1, 1], [], []>} : vector<72x128xbf16>, vector<128x128xbf16>, vector<72x128xf32> -> vector<72x128xf32>
    %6 = arith.addf %0, %5 : vector<72x128xf32>
    %c0_7 = arith.constant 0 : index
    %c1 = arith.constant 1 : index
    %c0_8 = arith.constant 0 : index
    %c0_9 = arith.constant 0 : index
    %7 = vector.load %arg2[%c0_7, %c1, %c0_8, %c0_9] : memref<1x4x90x128xbf16, #tpu.memory_space<vmem>>, vector<1x1x72x128xbf16>
    %8 = vector.shape_cast %7 : vector<1x1x72x128xbf16> to vector<72x128xbf16>
    %c1_10 = arith.constant 1 : index
    %c0_11 = arith.constant 0 : index
    %c0_12 = arith.constant 0 : index
    %9 = vector.load %arg3[%c1_10, %c0_11, %c0_12] : memref<9x128x128xbf16, #tpu.memory_space<vmem>>, vector<1x128x128xbf16>
    %10 = vector.shape_cast %9 : vector<1x128x128xbf16> to vector<128x128xbf16>
    %cst_13 = arith.constant dense<0.000000e+00> : vector<72x128xf32>
    %11 = tpu.matmul %8, %10, %cst_13 {dimension_numbers = #tpu.dot_dimension_numbers<[1], [0], [0], [1], [0, 0, 1, 1], [], []>} : vector<72x128xbf16>, vector<128x128xbf16>, vector<72x128xf32> -> vector<72x128xf32>
    %12 = arith.addf %6, %11 : vector<72x128xf32>
    %c0_14 = arith.constant 0 : index
    %c0_15 = arith.constant 0 : index
    %c1_16 = arith.constant 1 : index
    %c0_17 = arith.constant 0 : index
    %13 = vector.load %arg2[%c0_14, %c0_15, %c1_16, %c0_17] : memref<1x4x90x128xbf16, #tpu.memory_space<vmem>>, vector<1x1x72x128xbf16>
    %14 = vector.shape_cast %13 : vector<1x1x72x128xbf16> to vector<72x128xbf16>
    %c2 = arith.constant 2 : index
    %c0_18 = arith.constant 0 : index
    %c0_19 = arith.constant 0 : index
    %15 = vector.load %arg3[%c2, %c0_18, %c0_19] : memref<9x128x128xbf16, #tpu.memory_space<vmem>>, vector<1x128x128xbf16>
    %16 = vector.shape_cast %15 : vector<1x128x128xbf16> to vector<128x128xbf16>
    %cst_20 = arith.constant dense<0.000000e+00> : vector<72x128xf32>
    %17 = tpu.matmul %14, %16, %cst_20 {dimension_numbers = #tpu.dot_dimension_numbers<[1], [0], [0], [1], [0, 0, 1, 1], [], []>} : vector<72x128xbf16>, vector<128x128xbf16>, vector<72x128xf32> -> vector<72x128xf32>
    %18 = arith.addf %12, %17 : vector<72x128xf32>
    %c0_21 = arith.constant 0 : index
    %c2_22 = arith.constant 2 : index
    %c0_23 = arith.constant 0 : index
    %c0_24 = arith.constant 0 : index
    %19 = vector.load %arg2[%c0_21, %c2_22, %c0_23, %c0_24] : memref<1x4x90x128xbf16, #tpu.memory_space<vmem>>, vector<1x1x72x128xbf16>
    %20 = vector.shape_cast %19 : vector<1x1x72x128xbf16> to vector<72x128xbf16>
    %c3 = arith.constant 3 : index
    %c0_25 = arith.constant 0 : index
    %c0_26 = arith.constant 0 : index
    %21 = vector.load %arg3[%c3, %c0_25, %c0_26] : memref<9x128x128xbf16, #tpu.memory_space<vmem>>, vector<1x128x128xbf16>
    %22 = vector.shape_cast %21 : vector<1x128x128xbf16> to vector<128x128xbf16>
    %cst_27 = arith.constant dense<0.000000e+00> : vector<72x128xf32>
    %23 = tpu.matmul %20, %22, %cst_27 {dimension_numbers = #tpu.dot_dimension_numbers<[1], [0], [0], [1], [0, 0, 1, 1], [], []>} : vector<72x128xbf16>, vector<128x128xbf16>, vector<72x128xf32> -> vector<72x128xf32>
    %24 = arith.addf %18, %23 : vector<72x128xf32>
    %c0_28 = arith.constant 0 : index
    %c3_29 = arith.constant 3 : index
    %c0_30 = arith.constant 0 : index
    %c0_31 = arith.constant 0 : index
    %25 = vector.load %arg2[%c0_28, %c3_29, %c0_30, %c0_31] : memref<1x4x90x128xbf16, #tpu.memory_space<vmem>>, vector<1x1x72x128xbf16>
    %26 = vector.shape_cast %25 : vector<1x1x72x128xbf16> to vector<72x128xbf16>
    %c4 = arith.constant 4 : index
    %c0_32 = arith.constant 0 : index
    %c0_33 = arith.constant 0 : index
    %27 = vector.load %arg3[%c4, %c0_32, %c0_33] : memref<9x128x128xbf16, #tpu.memory_space<vmem>>, vector<1x128x128xbf16>
    %28 = vector.shape_cast %27 : vector<1x128x128xbf16> to vector<128x128xbf16>
    %cst_34 = arith.constant dense<0.000000e+00> : vector<72x128xf32>
    %29 = tpu.matmul %26, %28, %cst_34 {dimension_numbers = #tpu.dot_dimension_numbers<[1], [0], [0], [1], [0, 0, 1, 1], [], []>} : vector<72x128xbf16>, vector<128x128xbf16>, vector<72x128xf32> -> vector<72x128xf32>
    %30 = arith.addf %24, %29 : vector<72x128xf32>
    %c0_35 = arith.constant 0 : index
    %c2_36 = arith.constant 2 : index
    %c1_37 = arith.constant 1 : index
    %c0_38 = arith.constant 0 : index
    %31 = vector.load %arg2[%c0_35, %c2_36, %c1_37, %c0_38] : memref<1x4x90x128xbf16, #tpu.memory_space<vmem>>, vector<1x1x72x128xbf16>
    %32 = vector.shape_cast %31 : vector<1x1x72x128xbf16> to vector<72x128xbf16>
    %c5 = arith.constant 5 : index
    %c0_39 = arith.constant 0 : index
    %c0_40 = arith.constant 0 : index
    %33 = vector.load %arg3[%c5, %c0_39, %c0_40] : memref<9x128x128xbf16, #tpu.memory_space<vmem>>, vector<1x128x128xbf16>
    %34 = vector.shape_cast %33 : vector<1x128x128xbf16> to vector<128x128xbf16>
    %cst_41 = arith.constant dense<0.000000e+00> : vector<72x128xf32>
    %35 = tpu.matmul %32, %34, %cst_41 {dimension_numbers = #tpu.dot_dimension_numbers<[1], [0], [0], [1], [0, 0, 1, 1], [], []>} : vector<72x128xbf16>, vector<128x128xbf16>, vector<72x128xf32> -> vector<72x128xf32>
    %36 = arith.addf %30, %35 : vector<72x128xf32>
    %c0_42 = arith.constant 0 : index
    %c0_43 = arith.constant 0 : index
    %c9 = arith.constant 9 : index
    %c0_44 = arith.constant 0 : index
    %37 = vector.load %arg2[%c0_42, %c0_43, %c9, %c0_44] : memref<1x4x90x128xbf16, #tpu.memory_space<vmem>>, vector<1x1x72x128xbf16>
    %38 = vector.shape_cast %37 : vector<1x1x72x128xbf16> to vector<72x128xbf16>
    %c6 = arith.constant 6 : index
    %c0_45 = arith.constant 0 : index
    %c0_46 = arith.constant 0 : index
    %39 = vector.load %arg3[%c6, %c0_45, %c0_46] : memref<9x128x128xbf16, #tpu.memory_space<vmem>>, vector<1x128x128xbf16>
    %40 = vector.shape_cast %39 : vector<1x128x128xbf16> to vector<128x128xbf16>
    %cst_47 = arith.constant dense<0.000000e+00> : vector<72x128xf32>
    %41 = tpu.matmul %38, %40, %cst_47 {dimension_numbers = #tpu.dot_dimension_numbers<[1], [0], [0], [1], [0, 0, 1, 1], [], []>} : vector<72x128xbf16>, vector<128x128xbf16>, vector<72x128xf32> -> vector<72x128xf32>
    %42 = arith.addf %36, %41 : vector<72x128xf32>
    %c0_48 = arith.constant 0 : index
    %c1_49 = arith.constant 1 : index
    %c9_50 = arith.constant 9 : index
    %c0_51 = arith.constant 0 : index
    %43 = vector.load %arg2[%c0_48, %c1_49, %c9_50, %c0_51] : memref<1x4x90x128xbf16, #tpu.memory_space<vmem>>, vector<1x1x72x128xbf16>
    %44 = vector.shape_cast %43 : vector<1x1x72x128xbf16> to vector<72x128xbf16>
    %c7 = arith.constant 7 : index
    %c0_52 = arith.constant 0 : index
    %c0_53 = arith.constant 0 : index
    %45 = vector.load %arg3[%c7, %c0_52, %c0_53] : memref<9x128x128xbf16, #tpu.memory_space<vmem>>, vector<1x128x128xbf16>
    %46 = vector.shape_cast %45 : vector<1x128x128xbf16> to vector<128x128xbf16>
    %cst_54 = arith.constant dense<0.000000e+00> : vector<72x128xf32>
    %47 = tpu.matmul %44, %46, %cst_54 {dimension_numbers = #tpu.dot_dimension_numbers<[1], [0], [0], [1], [0, 0, 1, 1], [], []>} : vector<72x128xbf16>, vector<128x128xbf16>, vector<72x128xf32> -> vector<72x128xf32>
    %48 = arith.addf %42, %47 : vector<72x128xf32>
    %c0_55 = arith.constant 0 : index
    %c0_56 = arith.constant 0 : index
    %c10 = arith.constant 10 : index
    %c0_57 = arith.constant 0 : index
    %49 = vector.load %arg2[%c0_55, %c0_56, %c10, %c0_57] : memref<1x4x90x128xbf16, #tpu.memory_space<vmem>>, vector<1x1x72x128xbf16>
    %50 = vector.shape_cast %49 : vector<1x1x72x128xbf16> to vector<72x128xbf16>
    %c8 = arith.constant 8 : index
    %c0_58 = arith.constant 0 : index
    %c0_59 = arith.constant 0 : index
    %51 = vector.load %arg3[%c8, %c0_58, %c0_59] : memref<9x128x128xbf16, #tpu.memory_space<vmem>>, vector<1x128x128xbf16>
    %52 = vector.shape_cast %51 : vector<1x128x128xbf16> to vector<128x128xbf16>
    %cst_60 = arith.constant dense<0.000000e+00> : vector<72x128xf32>
    %53 = tpu.matmul %50, %52, %cst_60 {dimension_numbers = #tpu.dot_dimension_numbers<[1], [0], [0], [1], [0, 0, 1, 1], [], []>} : vector<72x128xbf16>, vector<128x128xbf16>, vector<72x128xf32> -> vector<72x128xf32>
    %54 = arith.addf %48, %53 : vector<72x128xf32>
    %c0_61 = arith.constant 0 : index
    %c0_62 = arith.constant 0 : index
    %55 = vector.load %arg4[%c0_61, %c0_62] : memref<1x128xf32, #tpu.memory_space<vmem>>, vector<1x128xf32>
    %56 = vector.broadcast %55 : vector<1x128xf32> to vector<72x128xf32>
    %57 = arith.addf %54, %56 : vector<72x128xf32>
    %cst_63 = arith.constant 0.000000e+00 : f32
    %58 = vector.broadcast %cst_63 : f32 to vector<72x128xf32>
    %59 = arith.maximumf %57, %58 : vector<72x128xf32>
    %60 = arith.truncf %59 : vector<72x128xf32> to vector<72x128xbf16>
    %c0_64 = arith.constant 0 : index
    %c0_65 = arith.constant 0 : index
    %c0_66 = arith.constant 0 : index
    %61 = vector.load %arg5[%c0_64, %c0_65, %c0_66] : memref<1x72x128xbf16, #tpu.memory_space<vmem>>, vector<1x72x128xbf16>
    %62 = vector.shape_cast %61 : vector<1x72x128xbf16> to vector<72x128xbf16>
    %63 = vector.shape_cast %60 : vector<72x128xbf16> to vector<1x72x128xbf16>
    tpu.vector_store %arg5[%c0_64, %c0_65, %c0_66], %63 {strides = array<i32>} : memref<1x72x128xbf16, #tpu.memory_space<vmem>>, vector<1x72x128xbf16>,
    return
  }
  func.func @transform_0(%arg0: i32, %arg1: i32) -> (i32, i32, i32, i32) {
    %c0_i32 = arith.constant 0 : i32
    %c0_i32_0 = arith.constant 0 : i32
    %c0_i32_1 = arith.constant 0 : i32
    %c0_i32_2 = arith.constant 0 : i32
    return %arg0, %c0_i32, %c0_i32_0, %c0_i32_1 : i32, i32, i32, i32
  }
  func.func @transform_1(%arg0: i32, %arg1: i32) -> (i32, i32, i32) {
    %c0_i32 = arith.constant 0 : i32
    %c0_i32_0 = arith.constant 0 : i32
    %c0_i32_1 = arith.constant 0 : i32
    return %c0_i32, %c0_i32_0, %arg1 : i32, i32, i32
  }
  func.func @transform_2(%arg0: i32, %arg1: i32) -> (i32, i32) {
    %c0_i32 = arith.constant 0 : i32
    %c0_i32_0 = arith.constant 0 : i32
    return %c0_i32, %arg1 : i32, i32
  }
  func.func @transform_3(%arg0: i32, %arg1: i32) -> (i32, i32, i32) {
    %c0_i32 = arith.constant 0 : i32
    %c0_i32_0 = arith.constant 0 : i32
    return %arg0, %c0_i32, %arg1 : i32, i32, i32
  }
}

module attributes {stable_mosaic.version = 11 : i64} {
  func.func @_matmul_kernel(%arg0: i32, %arg1: i32, %arg2: memref<128x128xbf16, #tpu.memory_space<vmem>>, %arg3: memref<128x128xbf16, #tpu.memory_space<vmem>>, %arg4: memref<1x128xf32, #tpu.memory_space<vmem>>, %arg5: memref<128x128xbf16, #tpu.memory_space<vmem>>) attributes {dimension_semantics = [#tpu.dimension_semantics<parallel>, #tpu.dimension_semantics<parallel>], iteration_bounds = array<i64: 1, 1>, scalar_prefetch = 0 : i64, scratch_operands = 0 : i64, tpu.core_type = #tpu.core_type<tc>, window_params = [{transform_indices = @transform_0, window_bounds = array<i64: 128, 128>}, {transform_indices = @transform_1, window_bounds = array<i64: 128, 128>}, {transform_indices = @transform_2, window_bounds = array<i64: 1, 128>}, {transform_indices = @transform_3, window_bounds = array<i64: 128, 128>}]} {
    %c0 = arith.constant 0 : index
    %c0_0 = arith.constant 0 : index
    %0 = vector.load %arg2[%c0, %c0_0] : memref<128x128xbf16, #tpu.memory_space<vmem>>, vector<128x128xbf16>
    %c0_1 = arith.constant 0 : index
    %c0_2 = arith.constant 0 : index
    %1 = vector.load %arg3[%c0_1, %c0_2] : memref<128x128xbf16, #tpu.memory_space<vmem>>, vector<128x128xbf16>
    %cst = arith.constant dense<0.000000e+00> : vector<128x128xf32>
    %2 = tpu.matmul %0, %1, %cst {dimension_numbers = #tpu.dot_dimension_numbers<[1], [0], [0], [1], [0, 0, 1, 1], [], []>} : vector<128x128xbf16>, vector<128x128xbf16>, vector<128x128xf32> -> vector<128x128xf32>
    %c0_3 = arith.constant 0 : index
    %c0_4 = arith.constant 0 : index
    %3 = vector.load %arg4[%c0_3, %c0_4] : memref<1x128xf32, #tpu.memory_space<vmem>>, vector<1x128xf32>
    %4 = vector.broadcast %3 : vector<1x128xf32> to vector<128x128xf32>
    %5 = arith.addf %2, %4 : vector<128x128xf32>
    %6 = arith.truncf %5 : vector<128x128xf32> to vector<128x128xbf16>
    %c0_5 = arith.constant 0 : index
    %c0_6 = arith.constant 0 : index
    %7 = vector.load %arg5[%c0_5, %c0_6] : memref<128x128xbf16, #tpu.memory_space<vmem>>, vector<128x128xbf16>
    tpu.vector_store %arg5[%c0_5, %c0_6], %6 {strides = array<i32>} : memref<128x128xbf16, #tpu.memory_space<vmem>>, vector<128x128xbf16>,
    return
  }
  func.func @transform_0(%arg0: i32, %arg1: i32) -> (i32, i32) {
    %c0_i32 = arith.constant 0 : i32
    %c0_i32_0 = arith.constant 0 : i32
    return %arg0, %c0_i32 : i32, i32
  }
  func.func @transform_1(%arg0: i32, %arg1: i32) -> (i32, i32) {
    %c0_i32 = arith.constant 0 : i32
    %c0_i32_0 = arith.constant 0 : i32
    return %c0_i32, %arg1 : i32, i32
  }
  func.func @transform_2(%arg0: i32, %arg1: i32) -> (i32, i32) {
    %c0_i32 = arith.constant 0 : i32
    %c0_i32_0 = arith.constant 0 : i32
    return %c0_i32, %arg1 : i32, i32
  }
  func.func @transform_3(%arg0: i32, %arg1: i32) -> (i32, i32) {
    %c0_i32 = arith.constant 0 : i32
    return %arg0, %arg1 : i32, i32
  }
}

module attributes {stable_mosaic.version = 11 : i64} {
  func.func @_matmul_res_kernel(%arg0: i32, %arg1: i32, %arg2: memref<128x128xbf16, #tpu.memory_space<vmem>>, %arg3: memref<128x128xbf16, #tpu.memory_space<vmem>>, %arg4: memref<1x128xf32, #tpu.memory_space<vmem>>, %arg5: memref<128x128xbf16, #tpu.memory_space<vmem>>, %arg6: memref<128x128xbf16, #tpu.memory_space<vmem>>) attributes {dimension_semantics = [#tpu.dimension_semantics<parallel>, #tpu.dimension_semantics<parallel>], iteration_bounds = array<i64: 1, 1>, scalar_prefetch = 0 : i64, scratch_operands = 0 : i64, tpu.core_type = #tpu.core_type<tc>, window_params = [{transform_indices = @transform_0, window_bounds = array<i64: 128, 128>}, {transform_indices = @transform_1, window_bounds = array<i64: 128, 128>}, {transform_indices = @transform_2, window_bounds = array<i64: 1, 128>}, {transform_indices = @transform_3, window_bounds = array<i64: 128, 128>}, {transform_indices = @transform_4, window_bounds = array<i64: 128, 128>}]} {
    %c0 = arith.constant 0 : index
    %c0_0 = arith.constant 0 : index
    %0 = vector.load %arg2[%c0, %c0_0] : memref<128x128xbf16, #tpu.memory_space<vmem>>, vector<128x128xbf16>
    %c0_1 = arith.constant 0 : index
    %c0_2 = arith.constant 0 : index
    %1 = vector.load %arg3[%c0_1, %c0_2] : memref<128x128xbf16, #tpu.memory_space<vmem>>, vector<128x128xbf16>
    %cst = arith.constant dense<0.000000e+00> : vector<128x128xf32>
    %2 = tpu.matmul %0, %1, %cst {dimension_numbers = #tpu.dot_dimension_numbers<[1], [0], [0], [1], [0, 0, 1, 1], [], []>} : vector<128x128xbf16>, vector<128x128xbf16>, vector<128x128xf32> -> vector<128x128xf32>
    %c0_3 = arith.constant 0 : index
    %c0_4 = arith.constant 0 : index
    %3 = vector.load %arg4[%c0_3, %c0_4] : memref<1x128xf32, #tpu.memory_space<vmem>>, vector<1x128xf32>
    %4 = vector.broadcast %3 : vector<1x128xf32> to vector<128x128xf32>
    %5 = arith.addf %2, %4 : vector<128x128xf32>
    %c0_5 = arith.constant 0 : index
    %c0_6 = arith.constant 0 : index
    %6 = vector.load %arg5[%c0_5, %c0_6] : memref<128x128xbf16, #tpu.memory_space<vmem>>, vector<128x128xbf16>
    %7 = arith.extf %6 : vector<128x128xbf16> to vector<128x128xf32>
    %8 = arith.addf %5, %7 : vector<128x128xf32>
    %cst_7 = arith.constant 0.000000e+00 : f32
    %9 = vector.broadcast %cst_7 : f32 to vector<128x128xf32>
    %10 = arith.maximumf %8, %9 : vector<128x128xf32>
    %11 = arith.truncf %10 : vector<128x128xf32> to vector<128x128xbf16>
    %c0_8 = arith.constant 0 : index
    %c0_9 = arith.constant 0 : index
    %12 = vector.load %arg6[%c0_8, %c0_9] : memref<128x128xbf16, #tpu.memory_space<vmem>>, vector<128x128xbf16>
    tpu.vector_store %arg6[%c0_8, %c0_9], %11 {strides = array<i32>} : memref<128x128xbf16, #tpu.memory_space<vmem>>, vector<128x128xbf16>,
    return
  }
  func.func @transform_0(%arg0: i32, %arg1: i32) -> (i32, i32) {
    %c0_i32 = arith.constant 0 : i32
    %c0_i32_0 = arith.constant 0 : i32
    return %arg0, %c0_i32 : i32, i32
  }
  func.func @transform_1(%arg0: i32, %arg1: i32) -> (i32, i32) {
    %c0_i32 = arith.constant 0 : i32
    %c0_i32_0 = arith.constant 0 : i32
    return %c0_i32, %arg1 : i32, i32
  }
  func.func @transform_2(%arg0: i32, %arg1: i32) -> (i32, i32) {
    %c0_i32 = arith.constant 0 : i32
    %c0_i32_0 = arith.constant 0 : i32
    return %c0_i32, %arg1 : i32, i32
  }
  func.func @transform_3(%arg0: i32, %arg1: i32) -> (i32, i32) {
    %c0_i32 = arith.constant 0 : i32
    return %arg0, %arg1 : i32, i32
  }
  func.func @transform_4(%arg0: i32, %arg1: i32) -> (i32, i32) {
    %c0_i32 = arith.constant 0 : i32
    return %arg0, %arg1 : i32, i32
  }
}

module attributes {stable_mosaic.version = 11 : i64} {
  func.func @_matmul_kernel(%arg0: i32, %arg1: i32, %arg2: memref<128x128xbf16, #tpu.memory_space<vmem>>, %arg3: memref<128x128xbf16, #tpu.memory_space<vmem>>, %arg4: memref<1x128xf32, #tpu.memory_space<vmem>>, %arg5: memref<128x128xbf16, #tpu.memory_space<vmem>>) attributes {dimension_semantics = [#tpu.dimension_semantics<parallel>, #tpu.dimension_semantics<parallel>], iteration_bounds = array<i64: 1, 1>, scalar_prefetch = 0 : i64, scratch_operands = 0 : i64, tpu.core_type = #tpu.core_type<tc>, window_params = [{transform_indices = @transform_0, window_bounds = array<i64: 128, 128>}, {transform_indices = @transform_1, window_bounds = array<i64: 128, 128>}, {transform_indices = @transform_2, window_bounds = array<i64: 1, 128>}, {transform_indices = @transform_3, window_bounds = array<i64: 128, 128>}]} {
    %c0 = arith.constant 0 : index
    %c0_0 = arith.constant 0 : index
    %0 = vector.load %arg2[%c0, %c0_0] : memref<128x128xbf16, #tpu.memory_space<vmem>>, vector<128x128xbf16>
    %c0_1 = arith.constant 0 : index
    %c0_2 = arith.constant 0 : index
    %1 = vector.load %arg3[%c0_1, %c0_2] : memref<128x128xbf16, #tpu.memory_space<vmem>>, vector<128x128xbf16>
    %cst = arith.constant dense<0.000000e+00> : vector<128x128xf32>
    %2 = tpu.matmul %0, %1, %cst {dimension_numbers = #tpu.dot_dimension_numbers<[1], [0], [0], [1], [0, 0, 1, 1], [], []>} : vector<128x128xbf16>, vector<128x128xbf16>, vector<128x128xf32> -> vector<128x128xf32>
    %c0_3 = arith.constant 0 : index
    %c0_4 = arith.constant 0 : index
    %3 = vector.load %arg4[%c0_3, %c0_4] : memref<1x128xf32, #tpu.memory_space<vmem>>, vector<1x128xf32>
    %4 = vector.broadcast %3 : vector<1x128xf32> to vector<128x128xf32>
    %5 = arith.addf %2, %4 : vector<128x128xf32>
    %cst_5 = arith.constant 0.000000e+00 : f32
    %6 = vector.broadcast %cst_5 : f32 to vector<128x128xf32>
    %7 = arith.maximumf %5, %6 : vector<128x128xf32>
    %8 = arith.truncf %7 : vector<128x128xf32> to vector<128x128xbf16>
    %c0_6 = arith.constant 0 : index
    %c0_7 = arith.constant 0 : index
    %9 = vector.load %arg5[%c0_6, %c0_7] : memref<128x128xbf16, #tpu.memory_space<vmem>>, vector<128x128xbf16>
    tpu.vector_store %arg5[%c0_6, %c0_7], %8 {strides = array<i32>} : memref<128x128xbf16, #tpu.memory_space<vmem>>, vector<128x128xbf16>,
    return
  }
  func.func @transform_0(%arg0: i32, %arg1: i32) -> (i32, i32) {
    %c0_i32 = arith.constant 0 : i32
    %c0_i32_0 = arith.constant 0 : i32
    return %arg0, %c0_i32 : i32, i32
  }
  func.func @transform_1(%arg0: i32, %arg1: i32) -> (i32, i32) {
    %c0_i32 = arith.constant 0 : i32
    %c0_i32_0 = arith.constant 0 : i32
    return %c0_i32, %arg1 : i32, i32
  }
  func.func @transform_2(%arg0: i32, %arg1: i32) -> (i32, i32) {
    %c0_i32 = arith.constant 0 : i32
    %c0_i32_0 = arith.constant 0 : i32
    return %c0_i32, %arg1 : i32, i32
  }
  func.func @transform_3(%arg0: i32, %arg1: i32) -> (i32, i32) {
    %c0_i32 = arith.constant 0 : i32
    return %arg0, %arg1 : i32, i32
  }
}

module attributes {stable_mosaic.version = 11 : i64} {
  func.func @_conv3x3_kernel(%arg0: i32, %arg1: i32, %arg2: memref<1x1x110x128xbf16, #tpu.memory_space<vmem>>, %arg3: memref<9x128x128xbf16, #tpu.memory_space<vmem>>, %arg4: memref<1x128xf32, #tpu.memory_space<vmem>>, %arg5: memref<1x80x128xbf16, #tpu.memory_space<vmem>>) attributes {dimension_semantics = [#tpu.dimension_semantics<parallel>, #tpu.dimension_semantics<parallel>], iteration_bounds = array<i64: 2, 1>, scalar_prefetch = 0 : i64, scratch_operands = 0 : i64, tpu.core_type = #tpu.core_type<tc>, window_params = [{transform_indices = @transform_0, window_bounds = array<i64: 1, 1, 110, 128>}, {transform_indices = @transform_1, window_bounds = array<i64: 9, 128, 128>}, {transform_indices = @transform_2, window_bounds = array<i64: 1, 128>}, {transform_indices = @transform_3, window_bounds = array<i64: 1, 80, 128>}]} {
    %cst = arith.constant 0.000000e+00 : f32
    %0 = vector.broadcast %cst : f32 to vector<80x128xf32>
    %c0 = arith.constant 0 : index
    %c0_0 = arith.constant 0 : index
    %c0_1 = arith.constant 0 : index
    %c0_2 = arith.constant 0 : index
    %1 = vector.load %arg2[%c0, %c0_0, %c0_1, %c0_2] : memref<1x1x110x128xbf16, #tpu.memory_space<vmem>>, vector<1x1x80x128xbf16>
    %2 = vector.shape_cast %1 : vector<1x1x80x128xbf16> to vector<80x128xbf16>
    %c0_3 = arith.constant 0 : index
    %c0_4 = arith.constant 0 : index
    %c0_5 = arith.constant 0 : index
    %3 = vector.load %arg3[%c0_3, %c0_4, %c0_5] : memref<9x128x128xbf16, #tpu.memory_space<vmem>>, vector<1x128x128xbf16>
    %4 = vector.shape_cast %3 : vector<1x128x128xbf16> to vector<128x128xbf16>
    %cst_6 = arith.constant dense<0.000000e+00> : vector<80x128xf32>
    %5 = tpu.matmul %2, %4, %cst_6 {dimension_numbers = #tpu.dot_dimension_numbers<[1], [0], [0], [1], [0, 0, 1, 1], [], []>} : vector<80x128xbf16>, vector<128x128xbf16>, vector<80x128xf32> -> vector<80x128xf32>
    %6 = arith.addf %0, %5 : vector<80x128xf32>
    %c0_7 = arith.constant 0 : index
    %c0_8 = arith.constant 0 : index
    %c1 = arith.constant 1 : index
    %c0_9 = arith.constant 0 : index
    %7 = vector.load %arg2[%c0_7, %c0_8, %c1, %c0_9] : memref<1x1x110x128xbf16, #tpu.memory_space<vmem>>, vector<1x1x80x128xbf16>
    %8 = vector.shape_cast %7 : vector<1x1x80x128xbf16> to vector<80x128xbf16>
    %c1_10 = arith.constant 1 : index
    %c0_11 = arith.constant 0 : index
    %c0_12 = arith.constant 0 : index
    %9 = vector.load %arg3[%c1_10, %c0_11, %c0_12] : memref<9x128x128xbf16, #tpu.memory_space<vmem>>, vector<1x128x128xbf16>
    %10 = vector.shape_cast %9 : vector<1x128x128xbf16> to vector<128x128xbf16>
    %cst_13 = arith.constant dense<0.000000e+00> : vector<80x128xf32>
    %11 = tpu.matmul %8, %10, %cst_13 {dimension_numbers = #tpu.dot_dimension_numbers<[1], [0], [0], [1], [0, 0, 1, 1], [], []>} : vector<80x128xbf16>, vector<128x128xbf16>, vector<80x128xf32> -> vector<80x128xf32>
    %12 = arith.addf %6, %11 : vector<80x128xf32>
    %c0_14 = arith.constant 0 : index
    %c0_15 = arith.constant 0 : index
    %c2 = arith.constant 2 : index
    %c0_16 = arith.constant 0 : index
    %13 = vector.load %arg2[%c0_14, %c0_15, %c2, %c0_16] : memref<1x1x110x128xbf16, #tpu.memory_space<vmem>>, vector<1x1x80x128xbf16>
    %14 = vector.shape_cast %13 : vector<1x1x80x128xbf16> to vector<80x128xbf16>
    %c2_17 = arith.constant 2 : index
    %c0_18 = arith.constant 0 : index
    %c0_19 = arith.constant 0 : index
    %15 = vector.load %arg3[%c2_17, %c0_18, %c0_19] : memref<9x128x128xbf16, #tpu.memory_space<vmem>>, vector<1x128x128xbf16>
    %16 = vector.shape_cast %15 : vector<1x128x128xbf16> to vector<128x128xbf16>
    %cst_20 = arith.constant dense<0.000000e+00> : vector<80x128xf32>
    %17 = tpu.matmul %14, %16, %cst_20 {dimension_numbers = #tpu.dot_dimension_numbers<[1], [0], [0], [1], [0, 0, 1, 1], [], []>} : vector<80x128xbf16>, vector<128x128xbf16>, vector<80x128xf32> -> vector<80x128xf32>
    %18 = arith.addf %12, %17 : vector<80x128xf32>
    %c0_21 = arith.constant 0 : index
    %c0_22 = arith.constant 0 : index
    %c10 = arith.constant 10 : index
    %c0_23 = arith.constant 0 : index
    %19 = vector.load %arg2[%c0_21, %c0_22, %c10, %c0_23] : memref<1x1x110x128xbf16, #tpu.memory_space<vmem>>, vector<1x1x80x128xbf16>
    %20 = vector.shape_cast %19 : vector<1x1x80x128xbf16> to vector<80x128xbf16>
    %c3 = arith.constant 3 : index
    %c0_24 = arith.constant 0 : index
    %c0_25 = arith.constant 0 : index
    %21 = vector.load %arg3[%c3, %c0_24, %c0_25] : memref<9x128x128xbf16, #tpu.memory_space<vmem>>, vector<1x128x128xbf16>
    %22 = vector.shape_cast %21 : vector<1x128x128xbf16> to vector<128x128xbf16>
    %cst_26 = arith.constant dense<0.000000e+00> : vector<80x128xf32>
    %23 = tpu.matmul %20, %22, %cst_26 {dimension_numbers = #tpu.dot_dimension_numbers<[1], [0], [0], [1], [0, 0, 1, 1], [], []>} : vector<80x128xbf16>, vector<128x128xbf16>, vector<80x128xf32> -> vector<80x128xf32>
    %24 = arith.addf %18, %23 : vector<80x128xf32>
    %c0_27 = arith.constant 0 : index
    %c0_28 = arith.constant 0 : index
    %c11 = arith.constant 11 : index
    %c0_29 = arith.constant 0 : index
    %25 = vector.load %arg2[%c0_27, %c0_28, %c11, %c0_29] : memref<1x1x110x128xbf16, #tpu.memory_space<vmem>>, vector<1x1x80x128xbf16>
    %26 = vector.shape_cast %25 : vector<1x1x80x128xbf16> to vector<80x128xbf16>
    %c4 = arith.constant 4 : index
    %c0_30 = arith.constant 0 : index
    %c0_31 = arith.constant 0 : index
    %27 = vector.load %arg3[%c4, %c0_30, %c0_31] : memref<9x128x128xbf16, #tpu.memory_space<vmem>>, vector<1x128x128xbf16>
    %28 = vector.shape_cast %27 : vector<1x128x128xbf16> to vector<128x128xbf16>
    %cst_32 = arith.constant dense<0.000000e+00> : vector<80x128xf32>
    %29 = tpu.matmul %26, %28, %cst_32 {dimension_numbers = #tpu.dot_dimension_numbers<[1], [0], [0], [1], [0, 0, 1, 1], [], []>} : vector<80x128xbf16>, vector<128x128xbf16>, vector<80x128xf32> -> vector<80x128xf32>
    %30 = arith.addf %24, %29 : vector<80x128xf32>
    %c0_33 = arith.constant 0 : index
    %c0_34 = arith.constant 0 : index
    %c12 = arith.constant 12 : index
    %c0_35 = arith.constant 0 : index
    %31 = vector.load %arg2[%c0_33, %c0_34, %c12, %c0_35] : memref<1x1x110x128xbf16, #tpu.memory_space<vmem>>, vector<1x1x80x128xbf16>
    %32 = vector.shape_cast %31 : vector<1x1x80x128xbf16> to vector<80x128xbf16>
    %c5 = arith.constant 5 : index
    %c0_36 = arith.constant 0 : index
    %c0_37 = arith.constant 0 : index
    %33 = vector.load %arg3[%c5, %c0_36, %c0_37] : memref<9x128x128xbf16, #tpu.memory_space<vmem>>, vector<1x128x128xbf16>
    %34 = vector.shape_cast %33 : vector<1x128x128xbf16> to vector<128x128xbf16>
    %cst_38 = arith.constant dense<0.000000e+00> : vector<80x128xf32>
    %35 = tpu.matmul %32, %34, %cst_38 {dimension_numbers = #tpu.dot_dimension_numbers<[1], [0], [0], [1], [0, 0, 1, 1], [], []>} : vector<80x128xbf16>, vector<128x128xbf16>, vector<80x128xf32> -> vector<80x128xf32>
    %36 = arith.addf %30, %35 : vector<80x128xf32>
    %c0_39 = arith.constant 0 : index
    %c0_40 = arith.constant 0 : index
    %c20 = arith.constant 20 : index
    %c0_41 = arith.constant 0 : index
    %37 = vector.load %arg2[%c0_39, %c0_40, %c20, %c0_41] : memref<1x1x110x128xbf16, #tpu.memory_space<vmem>>, vector<1x1x80x128xbf16>
    %38 = vector.shape_cast %37 : vector<1x1x80x128xbf16> to vector<80x128xbf16>
    %c6 = arith.constant 6 : index
    %c0_42 = arith.constant 0 : index
    %c0_43 = arith.constant 0 : index
    %39 = vector.load %arg3[%c6, %c0_42, %c0_43] : memref<9x128x128xbf16, #tpu.memory_space<vmem>>, vector<1x128x128xbf16>
    %40 = vector.shape_cast %39 : vector<1x128x128xbf16> to vector<128x128xbf16>
    %cst_44 = arith.constant dense<0.000000e+00> : vector<80x128xf32>
    %41 = tpu.matmul %38, %40, %cst_44 {dimension_numbers = #tpu.dot_dimension_numbers<[1], [0], [0], [1], [0, 0, 1, 1], [], []>} : vector<80x128xbf16>, vector<128x128xbf16>, vector<80x128xf32> -> vector<80x128xf32>
    %42 = arith.addf %36, %41 : vector<80x128xf32>
    %c0_45 = arith.constant 0 : index
    %c0_46 = arith.constant 0 : index
    %c21 = arith.constant 21 : index
    %c0_47 = arith.constant 0 : index
    %43 = vector.load %arg2[%c0_45, %c0_46, %c21, %c0_47] : memref<1x1x110x128xbf16, #tpu.memory_space<vmem>>, vector<1x1x80x128xbf16>
    %44 = vector.shape_cast %43 : vector<1x1x80x128xbf16> to vector<80x128xbf16>
    %c7 = arith.constant 7 : index
    %c0_48 = arith.constant 0 : index
    %c0_49 = arith.constant 0 : index
    %45 = vector.load %arg3[%c7, %c0_48, %c0_49] : memref<9x128x128xbf16, #tpu.memory_space<vmem>>, vector<1x128x128xbf16>
    %46 = vector.shape_cast %45 : vector<1x128x128xbf16> to vector<128x128xbf16>
    %cst_50 = arith.constant dense<0.000000e+00> : vector<80x128xf32>
    %47 = tpu.matmul %44, %46, %cst_50 {dimension_numbers = #tpu.dot_dimension_numbers<[1], [0], [0], [1], [0, 0, 1, 1], [], []>} : vector<80x128xbf16>, vector<128x128xbf16>, vector<80x128xf32> -> vector<80x128xf32>
    %48 = arith.addf %42, %47 : vector<80x128xf32>
    %c0_51 = arith.constant 0 : index
    %c0_52 = arith.constant 0 : index
    %c22 = arith.constant 22 : index
    %c0_53 = arith.constant 0 : index
    %49 = vector.load %arg2[%c0_51, %c0_52, %c22, %c0_53] : memref<1x1x110x128xbf16, #tpu.memory_space<vmem>>, vector<1x1x80x128xbf16>
    %50 = vector.shape_cast %49 : vector<1x1x80x128xbf16> to vector<80x128xbf16>
    %c8 = arith.constant 8 : index
    %c0_54 = arith.constant 0 : index
    %c0_55 = arith.constant 0 : index
    %51 = vector.load %arg3[%c8, %c0_54, %c0_55] : memref<9x128x128xbf16, #tpu.memory_space<vmem>>, vector<1x128x128xbf16>
    %52 = vector.shape_cast %51 : vector<1x128x128xbf16> to vector<128x128xbf16>
    %cst_56 = arith.constant dense<0.000000e+00> : vector<80x128xf32>
    %53 = tpu.matmul %50, %52, %cst_56 {dimension_numbers = #tpu.dot_dimension_numbers<[1], [0], [0], [1], [0, 0, 1, 1], [], []>} : vector<80x128xbf16>, vector<128x128xbf16>, vector<80x128xf32> -> vector<80x128xf32>
    %54 = arith.addf %48, %53 : vector<80x128xf32>
    %c0_57 = arith.constant 0 : index
    %c0_58 = arith.constant 0 : index
    %55 = vector.load %arg4[%c0_57, %c0_58] : memref<1x128xf32, #tpu.memory_space<vmem>>, vector<1x128xf32>
    %56 = vector.broadcast %55 : vector<1x128xf32> to vector<80x128xf32>
    %57 = arith.addf %54, %56 : vector<80x128xf32>
    %cst_59 = arith.constant 0.000000e+00 : f32
    %58 = vector.broadcast %cst_59 : f32 to vector<80x128xf32>
    %59 = arith.maximumf %57, %58 : vector<80x128xf32>
    %60 = arith.truncf %59 : vector<80x128xf32> to vector<80x128xbf16>
    %c0_60 = arith.constant 0 : index
    %c0_61 = arith.constant 0 : index
    %c0_62 = arith.constant 0 : index
    %61 = vector.load %arg5[%c0_60, %c0_61, %c0_62] : memref<1x80x128xbf16, #tpu.memory_space<vmem>>, vector<1x80x128xbf16>
    %62 = vector.shape_cast %61 : vector<1x80x128xbf16> to vector<80x128xbf16>
    %63 = vector.shape_cast %60 : vector<80x128xbf16> to vector<1x80x128xbf16>
    tpu.vector_store %arg5[%c0_60, %c0_61, %c0_62], %63 {strides = array<i32>} : memref<1x80x128xbf16, #tpu.memory_space<vmem>>, vector<1x80x128xbf16>,
    return
  }
  func.func @transform_0(%arg0: i32, %arg1: i32) -> (i32, i32, i32, i32) {
    %c0_i32 = arith.constant 0 : i32
    %c0_i32_0 = arith.constant 0 : i32
    %c0_i32_1 = arith.constant 0 : i32
    %c0_i32_2 = arith.constant 0 : i32
    return %arg0, %c0_i32, %c0_i32_0, %c0_i32_1 : i32, i32, i32, i32
  }
  func.func @transform_1(%arg0: i32, %arg1: i32) -> (i32, i32, i32) {
    %c0_i32 = arith.constant 0 : i32
    %c0_i32_0 = arith.constant 0 : i32
    %c0_i32_1 = arith.constant 0 : i32
    return %c0_i32, %c0_i32_0, %arg1 : i32, i32, i32
  }
  func.func @transform_2(%arg0: i32, %arg1: i32) -> (i32, i32) {
    %c0_i32 = arith.constant 0 : i32
    %c0_i32_0 = arith.constant 0 : i32
    return %c0_i32, %arg1 : i32, i32
  }
  func.func @transform_3(%arg0: i32, %arg1: i32) -> (i32, i32, i32) {
    %c0_i32 = arith.constant 0 : i32
    %c0_i32_0 = arith.constant 0 : i32
    return %arg0, %c0_i32, %arg1 : i32, i32, i32
  }
}

</mosaic_0001>

<bundles_post_ra>
// kernel: conv25_forward.7
= control target key start
LH: loop header
LB: loop body
LE: loop exit
PB: predicated region body
PF: predicated region fallthrough
CT: control target
= control target key end

     0   :  { %s1424_s1 = inlined_call_operand.vmem [shape: bf16[128,128], index: 1, kind: input, shape index: {}]   ;;  %s1425_s2 = inlined_call_operand.vmem [shape: f32[1,128], index: 2, kind: input, shape index: {}]   ;;  %s1426_s0 = inlined_call_operand.vmem [shape: bf16[512,128], index: 0, kind: input, shape index: {}]   ;;  %s1427_s3 = inlined_call_operand.vmem [shape: bf16[512,128], index: 3, kind: output, shape index: {}]  }
   0x1   :  { %v902_v0 = vld [vmem:[%s1424_s1 + $0x38] sm:$0xff]  ;;  %v901_v1 = vld [vmem:[%s1424_s1 + $0x30] sm:$0xff]  ;;  %v900_v2 = vld [vmem:[%s1424_s1 + $0x28] sm:$0xff] }
   0x2   :  { %338 = vmatpush.bf16.msra.mxu0 %v902_v0  ;;  %1094 = vmatpush.bf16.msra.mxu1 %v902_v0  ;;  %v899_v3 = vld [vmem:[%s1424_s1 + $0x20] sm:$0xff]  ;;  %v898_v4 = vld [vmem:[%s1424_s1 + $0x18] sm:$0xff]  ;;  %v897_v5 = vld [vmem:[%s1424_s1 + $0x10] sm:$0xff] }
   0x3   :  { %1095 = vmatpush.bf16.msra.mxu2 %v902_v0  ;;  %1096 = vmatpush.bf16.msra.mxu3 %v902_v0  ;;  %v896_v6 = vld [vmem:[%s1424_s1 + $0x8] sm:$0xff]  ;;  %v895_v7 = vld [vmem:[%s1424_s1] sm:$0xff]  ;;  %v865_v16 = vld [vmem:[%s1426_s0 + $0x10] sm:$0xff] }
   0x4   :  { %v863_v8 = vld [vmem:[%s1426_s0] sm:$0xff]  ;;  %v864_v12 = vld [vmem:[%s1426_s0 + $0x8] sm:$0xff]  ;;  %v873_v17 = vld [vmem:[%s1426_s0 + $0x50] sm:$0xff] }
   0x5   :  { %v871_v9 = vld [vmem:[%s1426_s0 + $0x40] sm:$0xff]  ;;  %v872_v13 = vld [vmem:[%s1426_s0 + $0x48] sm:$0xff]  ;;  %v881_v18 = vld [vmem:[%s1426_s0 + $0x90] sm:$0xff] }
   0x6   :  { %339 = vmatpush.bf16.msra.mxu0 %v901_v1  ;;  %1097 = vmatpush.bf16.msra.mxu1 %v901_v1  ;;  %v879_v10 = vld [vmem:[%s1426_s0 + $0x80] sm:$0xff]  ;;  %v880_v14 = vld [vmem:[%s1426_s0 + $0x88] sm:$0xff]  ;;  %v889_v19 = vld [vmem:[%s1426_s0 + $0xd0] sm:$0xff] }
   0x7   :  { %1098 = vmatpush.bf16.msra.mxu2 %v901_v1  ;;  %1099 = vmatpush.bf16.msra.mxu3 %v901_v1  ;;  %v887_v11 = vld [vmem:[%s1426_s0 + $0xc0] sm:$0xff]  ;;  %v888_v15 = vld [vmem:[%s1426_s0 + $0xc8] sm:$0xff]  ;;  %v866_v20 = vld [vmem:[%s1426_s0 + $0x18] sm:$0xff] }
   0x8   :  { %v874_v21 = vld [vmem:[%s1426_s0 + $0x58] sm:$0xff]  ;;  %v867_v24 = vld [vmem:[%s1426_s0 + $0x20] sm:$0xff]  ;;  %v868_v28 = vld [vmem:[%s1426_s0 + $0x28] sm:$0xff] }
   0x9   :  { %v882_v22 = vld [vmem:[%s1426_s0 + $0x98] sm:$0xff]  ;;  %v875_v25 = vld [vmem:[%s1426_s0 + $0x60] sm:$0xff]  ;;  %v876_v29 = vld [vmem:[%s1426_s0 + $0x68] sm:$0xff] }
   0xa   :  { %340 = vmatpush.bf16.msra.mxu0 %v900_v2  ;;  %1100 = vmatpush.bf16.msra.mxu1 %v900_v2  ;;  %v890_v23 = vld [vmem:[%s1426_s0 + $0xd8] sm:$0xff]  ;;  %v883_v26 = vld [vmem:[%s1426_s0 + $0xa0] sm:$0xff]  ;;  %v884_v30 = vld [vmem:[%s1426_s0 + $0xa8] sm:$0xff] }
   0xb   :  { %1101 = vmatpush.bf16.msra.mxu2 %v900_v2  ;;  %1102 = vmatpush.bf16.msra.mxu3 %v900_v2  ;;  %v891_v27 = vld [vmem:[%s1426_s0 + $0xe0] sm:$0xff]  ;;  %v892_v31 = vld [vmem:[%s1426_s0 + $0xe8] sm:$0xff]  ;;  %v869_v32 = vld [vmem:[%s1426_s0 + $0x30] sm:$0xff] }
   0xc   :  { %v877_v33 = vld [vmem:[%s1426_s0 + $0x70] sm:$0xff]  ;;  %v870_v36 = vld [vmem:[%s1426_s0 + $0x38] sm:$0xff]  ;;  %v1262_v42 = vld [vmem:[%s1425_s2] ss:$0 sm:$0xff] }
   0xd   :  { %v885_v34 = vld [vmem:[%s1426_s0 + $0xb0] sm:$0xff]  ;;  %v878_v37 = vld [vmem:[%s1426_s0 + $0x78] sm:$0xff] }
   0xe   :  { %341 = vmatpush.bf16.msra.mxu0 %v899_v3  ;;  %1103 = vmatpush.bf16.msra.mxu1 %v899_v3  ;;  %v893_v35 = vld [vmem:[%s1426_s0 + $0xf0] sm:$0xff]  ;;  %v886_v38 = vld [vmem:[%s1426_s0 + $0xb8] sm:$0xff] }
   0xf   :  { %1104 = vmatpush.bf16.msra.mxu2 %v899_v3  ;;  %1105 = vmatpush.bf16.msra.mxu3 %v899_v3  ;;  %v894_v39 = vld [vmem:[%s1426_s0 + $0xf8] sm:$0xff] }
  0x12   :  { %342 = vmatpush.bf16.msra.mxu0 %v898_v4  ;;  %1106 = vmatpush.bf16.msra.mxu1 %v898_v4 }
  0x13   :  { %1107 = vmatpush.bf16.msra.mxu2 %v898_v4  ;;  %1108 = vmatpush.bf16.msra.mxu3 %v898_v4 }
  0x16   :  { %343 = vmatpush.bf16.msra.mxu0 %v897_v5  ;;  %1109 = vmatpush.bf16.msra.mxu1 %v897_v5 }
  0x17   :  { %1110 = vmatpush.bf16.msra.mxu2 %v897_v5  ;;  %1111 = vmatpush.bf16.msra.mxu3 %v897_v5 }
  0x1a   :  { %344 = vmatpush.bf16.msra.mxu0 %v896_v6  ;;  %1112 = vmatpush.bf16.msra.mxu1 %v896_v6 }
  0x1b   :  { %1113 = vmatpush.bf16.msra.mxu2 %v896_v6  ;;  %1114 = vmatpush.bf16.msra.mxu3 %v896_v6 }
  0x1e   :  { %345 = vmatpush.bf16.msra.mxu0 %v895_v7  ;;  %1115 = vmatpush.bf16.msra.mxu1 %v895_v7 }
  0x1f   :  { %1116 = vmatpush.bf16.msra.mxu2 %v895_v7  ;;  %1117 = vmatpush.bf16.msra.mxu3 %v895_v7 }
  0x21   :  { %346 = vmatmul.bf16.vlgmr.msra.gmra.mxu0 %v863_v8  ;;  %386 = vmatmul.bf16.vlgmr.msra.gmra.mxu1 %v871_v9 }
  0x22   :  { %426 = vmatmul.bf16.vlgmr.msra.gmra.mxu2 %v879_v10  ;;  %466 = vmatmul.bf16.vlgmr.msra.gmra.mxu3 %v887_v11 }
  0x31   :  { %351 = vmatmul.bf16.gmra.mxu0 %v864_v12  ;;  %391 = vmatmul.bf16.gmra.mxu1 %v872_v13 }
  0x32   :  { %431 = vmatmul.bf16.gmra.mxu2 %v880_v14  ;;  %471 = vmatmul.bf16.gmra.mxu3 %v888_v15 }
  0x41   :  { %356 = vmatmul.bf16.gmra.mxu0 %v865_v16  ;;  %396 = vmatmul.bf16.gmra.mxu1 %v873_v17 }
  0x42   :  { %436 = vmatmul.bf16.gmra.mxu2 %v881_v18  ;;  %476 = vmatmul.bf16.gmra.mxu3 %v889_v19 }
  0x51   :  { %361 = vmatmul.bf16.gmra.mxu0 %v866_v20  ;;  %401 = vmatmul.bf16.gmra.mxu1 %v874_v21 }
  0x52   :  { %441 = vmatmul.bf16.gmra.mxu2 %v882_v22  ;;  %481 = vmatmul.bf16.gmra.mxu3 %v890_v23 }
  0x61   :  { %366 = vmatmul.bf16.gmra.mxu0 %v867_v24  ;;  %406 = vmatmul.bf16.gmra.mxu1 %v875_v25 }
  0x62   :  { %446 = vmatmul.bf16.gmra.mxu2 %v883_v26  ;;  %486 = vmatmul.bf16.gmra.mxu3 %v891_v27 }
  0x71   :  { %371 = vmatmul.bf16.gmra.mxu0 %v868_v28  ;;  %411 = vmatmul.bf16.gmra.mxu1 %v876_v29 }
  0x72   :  { %451 = vmatmul.bf16.gmra.mxu2 %v884_v30  ;;  %491 = vmatmul.bf16.gmra.mxu3 %v892_v31 }
  0x81   :  { %376 = vmatmul.bf16.gmra.mxu0 %v869_v32  ;;  %416 = vmatmul.bf16.gmra.mxu1 %v877_v33 }
  0x82   :  { %456 = vmatmul.bf16.gmra.mxu2 %v885_v34  ;;  %496 = vmatmul.bf16.gmra.mxu3 %v893_v35 }
  0x91   :  { %381 = vmatmul.bf16.gmra.mxu0 %v870_v36  ;;  %421 = vmatmul.bf16.gmra.mxu1 %v878_v37 }
  0x92   :  { %461 = vmatmul.bf16.gmra.mxu2 %v886_v38  ;;  %501 = vmatmul.bf16.gmra.mxu3 %v894_v39 }
  0x9e   :  { %v347_v40 = vpop.f32.mrf.mxu0  ;;  %v387_v41 = vpop.f32.mrf.mxu1 }
  0x9f   :  { %v348_v43 = vadd.f32 %v1262_v42, %v347_v40  ;;  %v388_v44 = vadd.f32 %v1262_v42, %v387_v41 }
  0xa1   :  { %v507_v51 = vmax.f32 %v348_v43, 0.0  ;;  %v523_v52 = vmax.f32 %v388_v44, 0.0 }
  0xa5   :  { %v427_v45 = vpop.f32.mrf.mxu2  ;;  %v467_v46 = vpop.f32.mrf.mxu3 }
  0xa6   :  { %v349_v47 = vpop.f32.mrf.mxu0  ;;  %v389_v48 = vpop.f32.mrf.mxu1  ;;  %v428_v57 = vadd.f32 %v1262_v42, %v427_v45  ;;  %v468_v58 = vadd.f32 %v1262_v42, %v467_v46 }
  0xa7   :  { %v350_v49 = vadd.f32 %v1262_v42, %v349_v47  ;;  %v390_v50 = vadd.f32 %v1262_v42, %v389_v48 }
  0xa8   :  { %v539_v1 = vmax.f32 %v428_v57, 0.0  ;;  %v555_v2 = vmax.f32 %v468_v58, 0.0 }
  0xa9   :  { %v508_v53 = vmax.f32 %v350_v49, 0.0  ;;  %v524_v54 = vmax.f32 %v390_v50, 0.0 }
  0xab   :  { %v906_v55 = vpack.c.bf16 %v508_v53, %v507_v51  ;;  %v946_v56 = vpack.c.bf16 %v524_v54, %v523_v52 }
  0xad   :  { %907 = vst [vmem:[%s1427_s3] sm:$0xff] %v906_v55   ;;  %v429_v59 = vpop.f32.mrf.mxu2  ;;  %v469_v60 = vpop.f32.mrf.mxu3 }
  0xae   :  { %1070 = vst [vmem:[%s1427_s3 + $0x40] sm:$0xff] %v946_v56   ;;  %v430_v61 = vadd.f32 %v1262_v42, %v429_v59  ;;  %v470_v62 = vadd.f32 %v1262_v42, %v469_v60  ;;  %v352_v63 = vpop.f32.mrf.mxu0  ;;  %v392_v0 = vpop.f32.mrf.mxu1 }
  0xaf   :  { %v353_v7 = vadd.f32 %v1262_v42, %v352_v63  ;;  %v393_v8 = vadd.f32 %v1262_v42, %v392_v0 }
  0xb0   :  { %v540_v3 = vmax.f32 %v430_v61, 0.0  ;;  %v556_v4 = vmax.f32 %v470_v62, 0.0 }
  0xb1   :  { %v509_v15 = vmax.f32 %v353_v7, 0.0  ;;  %v525_v16 = vmax.f32 %v393_v8, 0.0 }
  0xb2   :  { %v986_v5 = vpack.c.bf16 %v540_v3, %v539_v1  ;;  %v1026_v6 = vpack.c.bf16 %v556_v4, %v555_v2 }
  0xb4   :  { %1078 = vst [vmem:[%s1427_s3 + $0x80] sm:$0xff] %v986_v5  }
  0xb5   :  { %1086 = vst [vmem:[%s1427_s3 + $0xc0] sm:$0xff] %v1026_v6   ;;  %v432_v9 = vpop.f32.mrf.mxu2  ;;  %v472_v10 = vpop.f32.mrf.mxu3 }
  0xb6   :  { %v354_v11 = vpop.f32.mrf.mxu0  ;;  %v394_v12 = vpop.f32.mrf.mxu1  ;;  %v433_v21 = vadd.f32 %v1262_v42, %v432_v9  ;;  %v473_v22 = vadd.f32 %v1262_v42, %v472_v10 }
  0xb7   :  { %v355_v13 = vadd.f32 %v1262_v42, %v354_v11  ;;  %v395_v14 = vadd.f32 %v1262_v42, %v394_v12 }
  0xb8   :  { %v541_v29 = vmax.f32 %v433_v21, 0.0  ;;  %v557_v30 = vmax.f32 %v473_v22, 0.0 }
  0xb9   :  { %v510_v17 = vmax.f32 %v355_v13, 0.0  ;;  %v526_v18 = vmax.f32 %v395_v14, 0.0 }
  0xbb   :  { %v911_v19 = vpack.c.bf16 %v510_v17, %v509_v15  ;;  %v951_v20 = vpack.c.bf16 %v526_v18, %v525_v16 }
  0xbd   :  { %1063 = vst [vmem:[%s1427_s3 + $0x8] sm:$0xff] %v911_v19   ;;  %v434_v23 = vpop.f32.mrf.mxu2  ;;  %v474_v24 = vpop.f32.mrf.mxu3 }
  0xbe   :  { %1071 = vst [vmem:[%s1427_s3 + $0x48] sm:$0xff] %v951_v20   ;;  %v435_v25 = vadd.f32 %v1262_v42, %v434_v23  ;;  %v475_v26 = vadd.f32 %v1262_v42, %v474_v24  ;;  %v357_v27 = vpop.f32.mrf.mxu0  ;;  %v397_v28 = vpop.f32.mrf.mxu1 }
  0xbf   :  { %v358_v35 = vadd.f32 %v1262_v42, %v357_v27  ;;  %v398_v36 = vadd.f32 %v1262_v42, %v397_v28 }
  0xc0   :  { %v542_v31 = vmax.f32 %v435_v25, 0.0  ;;  %v558_v32 = vmax.f32 %v475_v26, 0.0 }
  0xc1   :  { %v511_v44 = vmax.f32 %v358_v35, 0.0  ;;  %v527_v45 = vmax.f32 %v398_v36, 0.0 }
  0xc2   :  { %v991_v33 = vpack.c.bf16 %v542_v31, %v541_v29  ;;  %v1031_v34 = vpack.c.bf16 %v558_v32, %v557_v30 }
  0xc4   :  { %1079 = vst [vmem:[%s1427_s3 + $0x88] sm:$0xff] %v991_v33  }
  0xc5   :  { %1087 = vst [vmem:[%s1427_s3 + $0xc8] sm:$0xff] %v1031_v34   ;;  %v437_v37 = vpop.f32.mrf.mxu2  ;;  %v477_v38 = vpop.f32.mrf.mxu3 }
  0xc6   :  { %v359_v39 = vpop.f32.mrf.mxu0  ;;  %v399_v40 = vpop.f32.mrf.mxu1  ;;  %v438_v50 = vadd.f32 %v1262_v42, %v437_v37  ;;  %v478_v51 = vadd.f32 %v1262_v42, %v477_v38 }
  0xc7   :  { %v360_v41 = vadd.f32 %v1262_v42, %v359_v39  ;;  %v400_v43 = vadd.f32 %v1262_v42, %v399_v40 }
  0xc8   :  { %v543_v58 = vmax.f32 %v438_v50, 0.0  ;;  %v559_v59 = vmax.f32 %v478_v51, 0.0 }
  0xc9   :  { %v512_v46 = vmax.f32 %v360_v41, 0.0  ;;  %v528_v47 = vmax.f32 %v400_v43, 0.0 }
  0xcb   :  { %v916_v48 = vpack.c.bf16 %v512_v46, %v511_v44  ;;  %v956_v49 = vpack.c.bf16 %v528_v47, %v527_v45 }
  0xcd   :  { %1064 = vst [vmem:[%s1427_s3 + $0x10] sm:$0xff] %v916_v48   ;;  %v439_v52 = vpop.f32.mrf.mxu2  ;;  %v479_v53 = vpop.f32.mrf.mxu3 }
  0xce   :  { %1072 = vst [vmem:[%s1427_s3 + $0x50] sm:$0xff] %v956_v49   ;;  %v440_v54 = vadd.f32 %v1262_v42, %v439_v52  ;;  %v480_v55 = vadd.f32 %v1262_v42, %v479_v53  ;;  %v362_v56 = vpop.f32.mrf.mxu0  ;;  %v402_v57 = vpop.f32.mrf.mxu1 }
  0xcf   :  { %v363_v0 = vadd.f32 %v1262_v42, %v362_v56  ;;  %v403_v1 = vadd.f32 %v1262_v42, %v402_v57 }
  0xd0   :  { %v544_v60 = vmax.f32 %v440_v54, 0.0  ;;  %v560_v61 = vmax.f32 %v480_v55, 0.0 }
  0xd1   :  { %v513_v8 = vmax.f32 %v363_v0, 0.0  ;;  %v529_v9 = vmax.f32 %v403_v1, 0.0 }
  0xd2   :  { %v996_v62 = vpack.c.bf16 %v544_v60, %v543_v58  ;;  %v1036_v63 = vpack.c.bf16 %v560_v61, %v559_v59 }
  0xd4   :  { %1080 = vst [vmem:[%s1427_s3 + $0x90] sm:$0xff] %v996_v62  }
  0xd5   :  { %1088 = vst [vmem:[%s1427_s3 + $0xd0] sm:$0xff] %v1036_v63   ;;  %v442_v2 = vpop.f32.mrf.mxu2  ;;  %v482_v3 = vpop.f32.mrf.mxu3 }
  0xd6   :  { %v364_v4 = vpop.f32.mrf.mxu0  ;;  %v404_v5 = vpop.f32.mrf.mxu1  ;;  %v443_v14 = vadd.f32 %v1262_v42, %v442_v2  ;;  %v483_v15 = vadd.f32 %v1262_v42, %v482_v3 }
  0xd7   :  { %v365_v6 = vadd.f32 %v1262_v42, %v364_v4  ;;  %v405_v7 = vadd.f32 %v1262_v42, %v404_v5 }
  0xd8   :  { %v545_v22 = vmax.f32 %v443_v14, 0.0  ;;  %v561_v23 = vmax.f32 %v483_v15, 0.0 }
  0xd9   :  { %v514_v10 = vmax.f32 %v365_v6, 0.0  ;;  %v530_v11 = vmax.f32 %v405_v7, 0.0 }
  0xdb   :  { %v921_v12 = vpack.c.bf16 %v514_v10, %v513_v8  ;;  %v961_v13 = vpack.c.bf16 %v530_v11, %v529_v9 }
  0xdd   :  { %1065 = vst [vmem:[%s1427_s3 + $0x18] sm:$0xff] %v921_v12   ;;  %v444_v16 = vpop.f32.mrf.mxu2  ;;  %v484_v17 = vpop.f32.mrf.mxu3 }
  0xde   :  { %1073 = vst [vmem:[%s1427_s3 + $0x58] sm:$0xff] %v961_v13   ;;  %v445_v18 = vadd.f32 %v1262_v42, %v444_v16  ;;  %v485_v19 = vadd.f32 %v1262_v42, %v484_v17  ;;  %v367_v20 = vpop.f32.mrf.mxu0  ;;  %v407_v21 = vpop.f32.mrf.mxu1 }
  0xdf   :  { %v368_v28 = vadd.f32 %v1262_v42, %v367_v20  ;;  %v408_v29 = vadd.f32 %v1262_v42, %v407_v21 }
  0xe0   :  { %v546_v24 = vmax.f32 %v445_v18, 0.0  ;;  %v562_v25 = vmax.f32 %v485_v19, 0.0 }
  0xe1   :  { %v515_v36 = vmax.f32 %v368_v28, 0.0  ;;  %v531_v37 = vmax.f32 %v408_v29, 0.0 }
  0xe2   :  { %v1001_v26 = vpack.c.bf16 %v546_v24, %v545_v22  ;;  %v1041_v27 = vpack.c.bf16 %v562_v25, %v561_v23 }
  0xe4   :  { %1081 = vst [vmem:[%s1427_s3 + $0x98] sm:$0xff] %v1001_v26  }
  0xe5   :  { %1089 = vst [vmem:[%s1427_s3 + $0xd8] sm:$0xff] %v1041_v27   ;;  %v447_v30 = vpop.f32.mrf.mxu2  ;;  %v487_v31 = vpop.f32.mrf.mxu3 }
  0xe6   :  { %v369_v32 = vpop.f32.mrf.mxu0  ;;  %v409_v33 = vpop.f32.mrf.mxu1  ;;  %v448_v43 = vadd.f32 %v1262_v42, %v447_v30  ;;  %v488_v44 = vadd.f32 %v1262_v42, %v487_v31 }
  0xe7   :  { %v370_v34 = vadd.f32 %v1262_v42, %v369_v32  ;;  %v410_v35 = vadd.f32 %v1262_v42, %v409_v33 }
  0xe8   :  { %v547_v51 = vmax.f32 %v448_v43, 0.0  ;;  %v563_v52 = vmax.f32 %v488_v44, 0.0 }
  0xe9   :  { %v516_v38 = vmax.f32 %v370_v34, 0.0  ;;  %v532_v39 = vmax.f32 %v410_v35, 0.0 }
  0xeb   :  { %v926_v40 = vpack.c.bf16 %v516_v38, %v515_v36  ;;  %v966_v41 = vpack.c.bf16 %v532_v39, %v531_v37 }
  0xed   :  { %1066 = vst [vmem:[%s1427_s3 + $0x20] sm:$0xff] %v926_v40   ;;  %v449_v45 = vpop.f32.mrf.mxu2  ;;  %v489_v46 = vpop.f32.mrf.mxu3 }
  0xee   :  { %1074 = vst [vmem:[%s1427_s3 + $0x60] sm:$0xff] %v966_v41   ;;  %v450_v47 = vadd.f32 %v1262_v42, %v449_v45  ;;  %v490_v48 = vadd.f32 %v1262_v42, %v489_v46  ;;  %v372_v49 = vpop.f32.mrf.mxu0  ;;  %v412_v50 = vpop.f32.mrf.mxu1 }
  0xef   :  { %v373_v57 = vadd.f32 %v1262_v42, %v372_v49  ;;  %v413_v58 = vadd.f32 %v1262_v42, %v412_v50 }
  0xf0   :  { %v548_v53 = vmax.f32 %v450_v47, 0.0  ;;  %v564_v54 = vmax.f32 %v490_v48, 0.0 }
  0xf1   :  { %v517_v1 = vmax.f32 %v373_v57, 0.0  ;;  %v533_v2 = vmax.f32 %v413_v58, 0.0 }
  0xf2   :  { %v1006_v55 = vpack.c.bf16 %v548_v53, %v547_v51  ;;  %v1046_v56 = vpack.c.bf16 %v564_v54, %v563_v52 }
  0xf4   :  { %1082 = vst [vmem:[%s1427_s3 + $0xa0] sm:$0xff] %v1006_v55  }
  0xf5   :  { %1090 = vst [vmem:[%s1427_s3 + $0xe0] sm:$0xff] %v1046_v56   ;;  %v452_v59 = vpop.f32.mrf.mxu2  ;;  %v492_v60 = vpop.f32.mrf.mxu3 }
  0xf6   :  { %v374_v61 = vpop.f32.mrf.mxu0  ;;  %v414_v62 = vpop.f32.mrf.mxu1  ;;  %v453_v7 = vadd.f32 %v1262_v42, %v452_v59  ;;  %v493_v8 = vadd.f32 %v1262_v42, %v492_v60 }
  0xf7   :  { %v375_v63 = vadd.f32 %v1262_v42, %v374_v61  ;;  %v415_v0 = vadd.f32 %v1262_v42, %v414_v62 }
  0xf8   :  { %v549_v15 = vmax.f32 %v453_v7, 0.0  ;;  %v565_v16 = vmax.f32 %v493_v8, 0.0 }
  0xf9   :  { %v518_v3 = vmax.f32 %v375_v63, 0.0  ;;  %v534_v4 = vmax.f32 %v415_v0, 0.0 }
  0xfb   :  { %v931_v5 = vpack.c.bf16 %v518_v3, %v517_v1  ;;  %v971_v6 = vpack.c.bf16 %v534_v4, %v533_v2 }
  0xfd   :  { %1067 = vst [vmem:[%s1427_s3 + $0x28] sm:$0xff] %v931_v5   ;;  %v454_v9 = vpop.f32.mrf.mxu2  ;;  %v494_v10 = vpop.f32.mrf.mxu3 }
  0xfe   :  { %1075 = vst [vmem:[%s1427_s3 + $0x68] sm:$0xff] %v971_v6   ;;  %v455_v11 = vadd.f32 %v1262_v42, %v454_v9  ;;  %v495_v12 = vadd.f32 %v1262_v42, %v494_v10  ;;  %v377_v13 = vpop.f32.mrf.mxu0  ;;  %v417_v14 = vpop.f32.mrf.mxu1 }
  0xff   :  { %v378_v21 = vadd.f32 %v1262_v42, %v377_v13  ;;  %v418_v22 = vadd.f32 %v1262_v42, %v417_v14 }
 0x100   :  { %v550_v17 = vmax.f32 %v455_v11, 0.0  ;;  %v566_v18 = vmax.f32 %v495_v12, 0.0 }
 0x101   :  { %v519_v29 = vmax.f32 %v378_v21, 0.0  ;;  %v535_v30 = vmax.f32 %v418_v22, 0.0 }
 0x102   :  { %v1011_v19 = vpack.c.bf16 %v550_v17, %v549_v15  ;;  %v1051_v20 = vpack.c.bf16 %v566_v18, %v565_v16 }
 0x104   :  { %1083 = vst [vmem:[%s1427_s3 + $0xa8] sm:$0xff] %v1011_v19  }
 0x105   :  { %1091 = vst [vmem:[%s1427_s3 + $0xe8] sm:$0xff] %v1051_v20   ;;  %v457_v23 = vpop.f32.mrf.mxu2  ;;  %v497_v24 = vpop.f32.mrf.mxu3 }
 0x106   :  { %v379_v25 = vpop.f32.mrf.mxu0  ;;  %v419_v26 = vpop.f32.mrf.mxu1  ;;  %v458_v35 = vadd.f32 %v1262_v42, %v457_v23  ;;  %v498_v36 = vadd.f32 %v1262_v42, %v497_v24 }
 0x107   :  { %v380_v27 = vadd.f32 %v1262_v42, %v379_v25  ;;  %v420_v28 = vadd.f32 %v1262_v42, %v419_v26 }
 0x108   :  { %v551_v44 = vmax.f32 %v458_v35, 0.0  ;;  %v567_v45 = vmax.f32 %v498_v36, 0.0 }
 0x109   :  { %v520_v31 = vmax.f32 %v380_v27, 0.0  ;;  %v536_v32 = vmax.f32 %v420_v28, 0.0 }
 0x10b   :  { %v936_v33 = vpack.c.bf16 %v520_v31, %v519_v29  ;;  %v976_v34 = vpack.c.bf16 %v536_v32, %v535_v30 }
 0x10d   :  { %1068 = vst [vmem:[%s1427_s3 + $0x30] sm:$0xff] %v936_v33   ;;  %v459_v37 = vpop.f32.mrf.mxu2  ;;  %v499_v38 = vpop.f32.mrf.mxu3 }
 0x10e   :  { %1076 = vst [vmem:[%s1427_s3 + $0x70] sm:$0xff] %v976_v34   ;;  %v460_v39 = vadd.f32 %v1262_v42, %v459_v37  ;;  %v500_v40 = vadd.f32 %v1262_v42, %v499_v38  ;;  %v382_v41 = vpop.f32.mrf.mxu0  ;;  %v422_v43 = vpop.f32.mrf.mxu1 }
 0x10f   :  { %v383_v50 = vadd.f32 %v1262_v42, %v382_v41  ;;  %v423_v51 = vadd.f32 %v1262_v42, %v422_v43 }
 0x110   :  { %v552_v46 = vmax.f32 %v460_v39, 0.0  ;;  %v568_v47 = vmax.f32 %v500_v40, 0.0 }
 0x111   :  { %v521_v58 = vmax.f32 %v383_v50, 0.0  ;;  %v537_v59 = vmax.f32 %v423_v51, 0.0 }
 0x112   :  { %v1016_v48 = vpack.c.bf16 %v552_v46, %v551_v44  ;;  %v1056_v49 = vpack.c.bf16 %v568_v47, %v567_v45 }
 0x114   :  { %1084 = vst [vmem:[%s1427_s3 + $0xb0] sm:$0xff] %v1016_v48  }
 0x115   :  { %1092 = vst [vmem:[%s1427_s3 + $0xf0] sm:$0xff] %v1056_v49   ;;  %v462_v52 = vpop.f32.mrf.mxu2  ;;  %v502_v53 = vpop.f32.mrf.mxu3 }
 0x116   :  { %v384_v54 = vpop.f32.mrf.mxu0  ;;  %v424_v55 = vpop.f32.mrf.mxu1  ;;  %v463_v0 = vadd.f32 %v1262_v42, %v462_v52  ;;  %v503_v1 = vadd.f32 %v1262_v42, %v502_v53 }
 0x117   :  { %v385_v56 = vadd.f32 %v1262_v42, %v384_v54  ;;  %v425_v57 = vadd.f32 %v1262_v42, %v424_v55 }
 0x118   :  { %v553_v6 = vmax.f32 %v463_v0, 0.0  ;;  %v569_v7 = vmax.f32 %v503_v1, 0.0 }
 0x119   :  { %v522_v60 = vmax.f32 %v385_v56, 0.0  ;;  %v538_v61 = vmax.f32 %v425_v57, 0.0 }
 0x11b   :  { %v941_v62 = vpack.c.bf16 %v522_v60, %v521_v58  ;;  %v981_v63 = vpack.c.bf16 %v538_v61, %v537_v59 }
 0x11d   :  { %1069 = vst [vmem:[%s1427_s3 + $0x38] sm:$0xff] %v941_v62   ;;  %v464_v2 = vpop.f32.mrf.mxu2  ;;  %v504_v3 = vpop.f32.mrf.mxu3 }
 0x11e   :  { %1077 = vst [vmem:[%s1427_s3 + $0x78] sm:$0xff] %v981_v63   ;;  %v465_v4 = vadd.f32 %v1262_v42, %v464_v2  ;;  %v505_v5 = vadd.f32 %v1262_v42, %v504_v3 }
 0x120   :  { %v554_v8 = vmax.f32 %v465_v4, 0.0  ;;  %v570_v9 = vmax.f32 %v505_v5, 0.0 }
 0x122   :  { %v1021_v10 = vpack.c.bf16 %v554_v8, %v553_v6  ;;  %v1061_v11 = vpack.c.bf16 %v570_v9, %v569_v7 }
 0x124   :  { %1085 = vst [vmem:[%s1427_s3 + $0xb8] sm:$0xff] %v1021_v10  }
 0x125   :  { %1093 = vst [vmem:[%s1427_s3 + $0xf8] sm:$0xff] %v1061_v11  }

// kernel: conv25_forward.8
= control target key start
LH: loop header
LB: loop body
LE: loop exit
PB: predicated region body
PF: predicated region fallthrough
CT: control target
= control target key end

     0   :  { %s2632_s12 = smov 0   ;;  %s2634_s13 = smov 0   ;;  %s3027_s0 = inlined_call_operand.vmem [shape: bf16[2,4,90,128], index: 0, kind: input, shape index: {}]   ;;  %s3028_s1 = inlined_call_operand.vmem [shape: bf16[9,128,128], index: 1, kind: input, shape index: {}]   ;;  %s3029_s2 = inlined_call_operand.vmem [shape: f32[1,128], index: 2, kind: input, shape index: {}]   ;;  %s3030_s3 = inlined_call_operand.vmem [shape: bf16[2,72,128], index: 3, kind: output, shape index: {}]  }
   0x1   :  { %s2636_s14 = smov 0  }
   0x2 LB: > { %s25_s15 = sadd.s32 1, %s2606_s13  ;;  %p1804_p0 = scmp.ge.s32.totalorder %s2610_s14, 1  ;;  %s2610_s14 = sphi %s2636_s14, %s13_s14   ;;  %s2606_s13 = sphi %s2634_s13, %s3032_s13   ;;  %s2602_s12 = sphi %s2632_s12, %s3031_s12  }
   0x3   : > { %p27_p1 = scmp.ge.s32.totalorder %s25_s15, 2  ;;  %p168_p2 = scmp.lt.s32.totalorder %s2610_s14, 3 }
   0x5   : > { %s3034_s15 = smov (%p27_p1, %s25_s15), 0  ;;  %p169_p3 = pnand %p1804_p0, %p168_p2 }
   0x6   : > { %p202_p4 = scmp.lt.s32.totalorder (!%p169_p3), %s2602_s12, 1 }
   0x7   : > { %172 = sbr.rel (%p169_p3) target bundleno = 368 (0x170), region = 32 }
   0xc   : > { %v2435_v0 = vld [vmem:[%s3028_s1 + $0x78] sm:$0xff]  ;;  %v2434_v1 = vld [vmem:[%s3028_s1 + $0x70] sm:$0xff]  ;;  %v2433_v4 = vld [vmem:[%s3028_s1 + $0x68] sm:$0xff]  ;;  %s3036_s12 = smov (!%p202_p4, %s2602_s12), 1  ;;  %vm544_vm0 = vsmask.f32 7424 }
   0xd   : > { %350 = vmatpush.bf16.msra.mxu0 %v2435_v0  ;;  %2542 = vmatpush.bf16.msra.mxu1 %v2435_v0  ;;  %v2460_v2 = vld [vmem:[%s3028_s1 + $0xf8] sm:$0xff]  ;;  %v2459_v3 = vld [vmem:[%s3028_s1 + $0xf0] sm:$0xff]  ;;  %v2458_v5 = vld [vmem:[%s3028_s1 + $0xe8] sm:$0xff]  ;;  %s2558_s11 = smul.u32 192, %s3036_s12  ;;  %vm1548_vm1 = vcmask 1046528  }
   0xe   : > { %2543 = vmatpush.bf16.msra.mxu2 %v2435_v0  ;;  %782 = vmatpush.bf16.msra.mxu3 %v2460_v2  ;;  %v2432_v6 = vld [vmem:[%s3028_s1 + $0x60] sm:$0xff]  ;;  %v2431_v8 = vld [vmem:[%s3028_s1 + $0x58] sm:$0xff]  ;;  %v2430_v10 = vld [vmem:[%s3028_s1 + $0x50] sm:$0xff]  ;;  %s2559_s5 = smul.u32 36, %s3036_s12 }
   0xf   : > { %v2457_v7 = vld [vmem:[%s3028_s1 + $0xe0] sm:$0xff]  ;;  %v2456_v9 = vld [vmem:[%s3028_s1 + $0xd8] sm:$0xff]  ;;  %v2455_v11 = vld [vmem:[%s3028_s1 + $0xd0] sm:$0xff]  ;;  %s2699_s22 = scalar_lea.vmem %s3027_s0, %s2558_s11 }
  0x10   : > { %v2429_v12 = vld [vmem:[%s3028_s1 + $0x48] sm:$0xff]  ;;  %v1815_v13 = vld [vmem:[%s2699_s22 + $0x50] sm:$0xf]  ;;  %v2428_v15 = vld [vmem:[%s3028_s1 + $0x40] sm:$0xff]  ;;  %s2998_s8 = scalar_lea.vmem %s3030_s3, %s2559_s5 }
  0x11   : > { %351 = vmatpush.bf16.msra.mxu0 %v2434_v1  ;;  %2544 = vmatpush.bf16.msra.mxu1 %v2434_v1  ;;  %v2454_v14 = vld [vmem:[%s3028_s1 + $0xc8] sm:$0xff]  ;;  %v291_v16 = vunpack.c.l.b16 %v1815_v13  ;;  %v2423_v17 = vld [vmem:[%s3028_s1 + $0x38] sm:$0xff]  ;;  %v2424_v20 = vld [vmem:[%s2699_s22 + $0x30] sm:$0xff] }
  0x12   : > { %2545 = vmatpush.bf16.msra.mxu2 %v2434_v1  ;;  %783 = vmatpush.bf16.msra.mxu3 %v2459_v3  ;;  %v2448_v18 = vld [vmem:[%s3028_s1 + $0xb8] sm:$0xff]  ;;  %v2426_v21 = vld [vmem:[%s2699_s22 + $0x40] sm:$0xff]  ;;  %v2422_v24 = vld [vmem:[%s3028_s1 + $0x30] sm:$0xff] }
  0x13   : > { %v2472_v19 = vld [vmem:[%s3028_s1 + $0x138] sm:$0xff]  ;;  %v296_v22 = vpack.c.b16 %v291_v16, %v291_v16  ;;  %v2453_v23 = vld [vmem:[%s3028_s1 + $0xc0] sm:$0xff]  ;;  %v2447_v26 = vld [vmem:[%s3028_s1 + $0xb0] sm:$0xff] }
  0x14   : > { %v2510_v25 = vld [vmem:[%s3028_s1 + $0x1f8] sm:$0xff]  ;;  %v2471_v27 = vld [vmem:[%s3028_s1 + $0x130] sm:$0xff]  ;;  %v2449_v28 = vld [vmem:[%s2699_s22 + $0x60] sm:$0xff] }
  0x15   : > { %352 = vmatpush.bf16.msra.mxu0 %v2433_v4  ;;  %2546 = vmatpush.bf16.msra.mxu1 %v2433_v4  ;;  %v2421_v29 = vld [vmem:[%s3028_s1 + $0x28] sm:$0xff]  ;;  %v2509_v30 = vld [vmem:[%s3028_s1 + $0x1f0] sm:$0xff]  ;;  %v2420_v33 = vld [vmem:[%s3028_s1 + $0x20] sm:$0xff] }
  0x16   : > { %2547 = vmatpush.bf16.msra.mxu2 %v2433_v4  ;;  %784 = vmatpush.bf16.msra.mxu3 %v2458_v5  ;;  %v2446_v31 = vld [vmem:[%s3028_s1 + $0xa8] sm:$0xff]  ;;  %v2445_v34 = vld [vmem:[%s3028_s1 + $0xa0] sm:$0xff]  ;;  %v2419_v36 = vld [vmem:[%s3028_s1 + $0x18] sm:$0xff] }
  0x17   : > { %v2470_v32 = vld [vmem:[%s3028_s1 + $0x128] sm:$0xff]  ;;  %v2469_v35 = vld [vmem:[%s3028_s1 + $0x120] sm:$0xff]  ;;  %v2444_v37 = vld [vmem:[%s3028_s1 + $0x98] sm:$0xff] }
  0x18   : > { %v2468_v38 = vld [vmem:[%s3028_s1 + $0x118] sm:$0xff]  ;;  %v2436_v39 = vld [vmem:[%s2699_s22] sm:$0xff]  ;;  %v2427_v41 = vld [vmem:[%s2699_s22 + $0x48] sm:$0xff] }
  0x19   : > { %353 = vmatpush.bf16.msra.mxu0 %v2432_v6  ;;  %2548 = vmatpush.bf16.msra.mxu1 %v2432_v6  ;;  %v2425_v40 = vld [vmem:[%s2699_s22 + $0x38] sm:$0xff]  ;;  %v2418_v42 = vld [vmem:[%s3028_s1 + $0x10] sm:$0xff]  ;;  %v2778_v45 = vld [vmem:[%s2699_s22 + $0x8] sm:$0xff]  ;;  %v548_v46 = vshll.u32 %v2436_v39, 16  ;;  %v546_v52 = vshrl.u32 %v2436_v39, 16 }
  0x1a   : > { %2549 = vmatpush.bf16.msra.mxu2 %v2432_v6  ;;  %785 = vmatpush.bf16.msra.mxu3 %v2457_v7  ;;  %v2443_v43 = vld [vmem:[%s3028_s1 + $0x90] sm:$0xff]  ;;  %v2450_v47 = vld [vmem:[%s2699_s22 + $0x68] sm:$0xff]  ;;  %v553_v54 = vshll.u32 %v2778_v45, 16  ;;  %v2416_v55 = vld [vmem:[%s3028_s1] sm:$0xff] }
  0x1b   : > { %v2467_v44 = vld [vmem:[%s3028_s1 + $0x110] sm:$0xff]  ;;  %v2508_v48 = vld [vmem:[%s3028_s1 + $0x1e8] sm:$0xff]  ;;  %v550_v53 = vrot.slane %v548_v46, 1  ;;  %v2441_v56 = vld [vmem:[%s3028_s1 + $0x80] sm:$0xff] }
  0x1c   : > { %v2417_v49 = vld [vmem:[%s3028_s1 + $0x8] sm:$0xff]  ;;  %v555_v58 = vrot.slane %v553_v54, 1  ;;  %v2465_v59 = vld [vmem:[%s3028_s1 + $0x100] sm:$0xff]  ;;  %v2497_v60 = vld [vmem:[%s3028_s1 + $0x1b8] sm:$0xff] }
  0x1d   : > { %354 = vmatpush.bf16.msra.mxu0 %v2431_v8  ;;  %2550 = vmatpush.bf16.msra.mxu1 %v2431_v8  ;;  %v2442_v50 = vld [vmem:[%s3028_s1 + $0x88] sm:$0xff]  ;;  %v551_v57 = vor.u32 %v550_v53, %v546_v52  ;;  %v2485_v61 = vld [vmem:[%s3028_s1 + $0x178] sm:$0xff]  ;;  %v2412_v0 = vld [vmem:[%s2699_s22] sm:$0xff] }
  0x1e   : > { %2551 = vmatpush.bf16.msra.mxu2 %v2431_v8  ;;  %786 = vmatpush.bf16.msra.mxu3 %v2456_v9  ;;  %v2466_v51 = vld [vmem:[%s3028_s1 + $0x108] sm:$0xff]  ;;  %v2518_v62 = vld [vmem:[%s3028_s1 + $0x238] sm:$0xff]  ;;  %v2461_v1 = vld [vmem:[%s2699_s22 + $0x90] sm:$0xff] }
  0x1f   : > { %v556_v63 = vsel %vm544_vm0, %v551_v57, %v555_v58  ;;  %v2496_v2 = vld [vmem:[%s3028_s1 + $0x1b0] sm:$0xff]  ;;  %v2507_v5 = vld [vmem:[%s3028_s1 + $0x1e0] sm:$0xff]  ;;  %v2495_v8 = vld [vmem:[%s3028_s1 + $0x1a8] sm:$0xff] }
  0x20   : > { %v2484_v3 = vld [vmem:[%s3028_s1 + $0x170] sm:$0xff]  ;;  %v2483_v9 = vld [vmem:[%s3028_s1 + $0x168] sm:$0xff]  ;;  %v2515_v16 = vld [vmem:[%s3028_s1 + $0x220] sm:$0xff] }
  0x21   : > { %355 = vmatpush.bf16.msra.mxu0 %v2430_v10  ;;  %2552 = vmatpush.bf16.msra.mxu1 %v2430_v10  ;;  %v2517_v4 = vld [vmem:[%s3028_s1 + $0x230] sm:$0xff]  ;;  %v2499_v54 = vld [vmem:[%s2699_s22 + $0x3c] sm:$0xff] }
  0x22   : > { %2553 = vmatpush.bf16.msra.mxu2 %v2430_v10  ;;  %787 = vmatpush.bf16.msra.mxu3 %v2455_v11  ;;  %v2438_v6 = vld [vmem:[%s2699_s22 + $0x10] sm:$0xff]  ;;  %v2516_v10 = vld [vmem:[%s3028_s1 + $0x228] sm:$0xff]  ;;  %v2506_v11 = vld [vmem:[%s3028_s1 + $0x1d8] sm:$0xff] }
  0x23   : > { %v2451_v7 = vld [vmem:[%s2699_s22 + $0x70] sm:$0xff]  ;;  %v561_v13 = vshll.u32 %v2438_v6, 16 }
  0x24   : > { %v2414_v39 = vld [vmem:[%s2699_s22 + $0x10] sm:$0xff] }
  0x25   : > { %356 = vmatpush.bf16.msra.mxu0 %v2429_v12  ;;  %2554 = vmatpush.bf16.msra.mxu1 %v2429_v12 }
  0x26   : > { %2555 = vmatpush.bf16.msra.mxu2 %v2429_v12  ;;  %788 = vmatpush.bf16.msra.mxu3 %v2454_v14  ;;  %v557_v12 = vshrl.u32 %v2778_v45, 16  ;;  %v2494_v14 = vld [vmem:[%s3028_s1 + $0x1a0] sm:$0xff] }
  0x29   : > { %357 = vmatpush.bf16.msra.mxu0 %v2428_v15  ;;  %2556 = vmatpush.bf16.msra.mxu1 %v2428_v15 }
  0x2a   : > { %2557 = vmatpush.bf16.msra.mxu2 %v2428_v15  ;;  %789 = vmatpush.bf16.msra.mxu3 %v2453_v23  ;;  %v2482_v15 = vld [vmem:[%s3028_s1 + $0x160] sm:$0xff]  ;;  %v2462_v23 = vld [vmem:[%s2699_s22 + $0x98] sm:$0xff] }
  0x2c   : > { %358 = vmatmul.bf16.vlgmr.msra.gmra.mxu0 %v2424_v20  ;;  %368 = vmatmul.bf16.vlgmr.msra.gmra.mxu1 %v2426_v21  ;;  %v2481_v20 = vld [vmem:[%s3028_s1 + $0x158] sm:$0xff] }
  0x2d   : > { %459 = vmatpush.bf16.msrb.mxu1 %v2423_v17  ;;  %927 = vmatpush.bf16.msrb.mxu0 %v2472_v19  ;;  %v559_v17 = vor.u32 %v557_v12, %v555_v58  ;;  %v2493_v19 = vld [vmem:[%s3028_s1 + $0x198] sm:$0xff]  ;;  %v1405_v12 = vshrl.u32 %v2499_v54, 16 }
  0x2e   : > { %637 = vmatpush.bf16.msrb.mxu2 %v2448_v18  ;;  %1485 = vmatpush.bf16.msrb.mxu3 %v2510_v25  ;;  %v563_v18 = vrot.slane %v561_v13, 1  ;;  %v2514_v25 = vld [vmem:[%s3028_s1 + $0x218] sm:$0xff] }
  0x2f   : > { %378 = vmatmul.bf16.vlgmr.msra.gmra.mxu2 %v296_v22  ;;  %790 = vmatmul.bf16.vlgmr.msra.gmra.mxu3 %v2449_v28  ;;  %v2413_v22 = vld [vmem:[%s2699_s22 + $0x8] sm:$0xff]  ;;  %v2505_v28 = vld [vmem:[%s3028_s1 + $0x1d0] sm:$0xff] }
  0x30   : > { %v564_v21 = vsel %vm544_vm0, %v559_v17, %v563_v18  ;;  %v2473_v17 = vld [vmem:[%s2699_s22 + $0x60] sm:$0xff] }
  0x31   : > { %460 = vmatpush.bf16.msrb.mxu1 %v2422_v24  ;;  %928 = vmatpush.bf16.msrb.mxu0 %v2471_v27  ;;  %v2492_v24 = vld [vmem:[%s3028_s1 + $0x190] sm:$0xff]  ;;  %v2452_v27 = vld [vmem:[%s2699_s22 + $0x78] sm:$0xff] }
  0x32   : > { %638 = vmatpush.bf16.msrb.mxu2 %v2447_v26  ;;  %1486 = vmatpush.bf16.msrb.mxu3 %v2509_v30  ;;  %v2439_v26 = vld [vmem:[%s2699_s22 + $0x18] sm:$0xff]  ;;  %v2491_v30 = vld [vmem:[%s3028_s1 + $0x188] sm:$0xff] }
  0x33   : > { %v573_v52 = vshrl.u32 %v2439_v26, 16 }
  0x35   : > { %461 = vmatpush.bf16.msrb.mxu1 %v2421_v29  ;;  %929 = vmatpush.bf16.msrb.mxu0 %v2470_v32  ;;  %v2480_v29 = vld [vmem:[%s3028_s1 + $0x150] sm:$0xff]  ;;  %v2504_v32 = vld [vmem:[%s3028_s1 + $0x1c8] sm:$0xff] }
  0x36   : > { %639 = vmatpush.bf16.msrb.mxu2 %v2446_v31  ;;  %1487 = vmatpush.bf16.msrb.mxu3 %v2508_v48  ;;  %v2513_v31 = vld [vmem:[%s3028_s1 + $0x210] sm:$0xff]  ;;  %v2512_v48 = vld [vmem:[%s3028_s1 + $0x208] sm:$0xff] }
  0x39   : > { %462 = vmatpush.bf16.msrb.mxu1 %v2420_v33  ;;  %930 = vmatpush.bf16.msrb.mxu0 %v2469_v35  ;;  %v565_v33 = vshrl.u32 %v2438_v6, 16  ;;  %v230_v6 = vld [vmem:[%s2699_s22 + $0x20] sm:$0xf] }
  0x3a   : > { %640 = vmatpush.bf16.msrb.mxu2 %v2445_v34  ;;  %1488 = vmatpush.bf16.msrb.mxu3 %v2507_v5  ;;  %v569_v34 = vshll.u32 %v2439_v26, 16  ;;  %v2585_v5 = vld [vmem:[%s2699_s22 + $0x4] sm:$0xf0] }
  0x3b   : > { %v567_v35 = vor.u32 %v565_v33, %v563_v18  ;;  %v2501_v33 = vld [vmem:[%s2699_s22 + $0x4c] sm:$0xff] }
  0x3c   : > { %363 = vmatmul.bf16.gmra.mxu0 %v2425_v40  ;;  %373 = vmatmul.bf16.gmra.mxu1 %v2427_v41  ;;  %v2463_v40 = vld [vmem:[%s2699_s22 + $0xa0] sm:$0xff] }
  0x3d   : > { %463 = vmatpush.bf16.msrb.mxu1 %v2419_v36  ;;  %931 = vmatpush.bf16.msrb.mxu0 %v2468_v38  ;;  %v571_v36 = vrot.slane %v569_v34, 1  ;;  %v1962_v41 = vld [vmem:[%s2699_s22 + $0x20] sm:$0xf] }
  0x3e   : > { %641 = vmatpush.bf16.msrb.mxu2 %v2444_v37  ;;  %1489 = vmatpush.bf16.msrb.mxu3 %v2506_v11  ;;  %v2004_v37 = vld [vmem:[%s2699_s22 + $0x80] sm:$0xf] }
  0x3f   : > { %795 = vmatmul.bf16.gmra.mxu3 %v2450_v47  ;;  %v572_v38 = vsel %vm544_vm0, %v567_v35, %v571_v36  ;;  %v2490_v47 = vld [vmem:[%s3028_s1 + $0x180] sm:$0xff] }
  0x41   : > { %464 = vmatpush.bf16.msrb.mxu1 %v2418_v42  ;;  %932 = vmatpush.bf16.msrb.mxu0 %v2467_v44  ;;  %v2440_v42 = vld [vmem:[%s2699_s22 + $0x20] sm:$0x10]  ;;  %v2479_v44 = vld [vmem:[%s3028_s1 + $0x148] sm:$0xff] }
  0x42   : > { %642 = vmatpush.bf16.msrb.mxu2 %v2443_v43  ;;  %1490 = vmatpush.bf16.msrb.mxu3 %v2505_v28  ;;  %v723_v43 = vunpack.c.l.b16 %v2004_v37  ;;  %v1963_v45 = vor.u32 %v2440_v42, %v1962_v41  ;;  %v1417_v41 = vshll.u32 %v2501_v33, 16 }
  0x44   : > { %v728_v46 = vpack.c.b16 %v723_v43, %v723_v43  ;;  %v577_v53 = vshll.u32 %v1963_v45, 16 }
  0x45   : > { %465 = vmatpush.bf16.msrb.mxu1 %v2417_v49  ;;  %933 = vmatpush.bf16.msrb.mxu0 %v2466_v51  ;;  %v2503_v49 = vld [vmem:[%s3028_s1 + $0x1c0] sm:$0xff]  ;;  %v2498_v51 = vld [vmem:[%s2699_s22 + $0x34] sm:$0xff] }
  0x46   : > { %643 = vmatpush.bf16.msrb.mxu2 %v2442_v50  ;;  %1491 = vmatpush.bf16.msrb.mxu3 %v2504_v32  ;;  %v2478_v50 = vld [vmem:[%s3028_s1 + $0x140] sm:$0xff]  ;;  %v579_v57 = vrot.slane %v577_v53, 1  ;;  %v1394_v58 = vshrl.u32 %v2498_v51, 16 }
  0x49   : > { %466 = vmatpush.bf16.msrb.mxu1 %v2416_v55  ;;  %934 = vmatpush.bf16.msrb.mxu0 %v2465_v59  ;;  %v1396_v55 = vshll.u32 %v2498_v51, 16  ;;  %v2502_v51 = vld [vmem:[%s2699_s22 + $0x54] sm:$0x10] }
  0x4a   : > { %644 = vmatpush.bf16.msrb.mxu2 %v2441_v56  ;;  %1492 = vmatpush.bf16.msrb.mxu3 %v2503_v49  ;;  %v575_v56 = vor.u32 %v573_v52, %v571_v36 }
  0x4b   : > { %v1398_v59 = vrot.slane %v1396_v55, 1 }
  0x4c   : > { %467 = vmatmul.bf16.vlgmr.msrb.gmra.mxu1 %v2412_v0  ;;  %935 = vmatmul.bf16.vlgmr.msrb.gmra.mxu0 %v2461_v1  ;;  %v2511_v0 = vld [vmem:[%s3028_s1 + $0x200] sm:$0xff] }
  0x4d   : > { %1113 = vmatpush.bf16.msra.mxu1 %v2485_v61  ;;  %1611 = vmatpush.bf16.msra.mxu0 %v2518_v62  ;;  %v580_v61 = vsel %vm544_vm0, %v575_v56, %v579_v57  ;;  %v2415_v62 = vld [vmem:[%s2699_s22 + $0x18] sm:$0xff]  ;;  %v1399_v1 = vor.u32 %v1398_v59, %v1394_v58 }
  0x4e   : > { %1299 = vmatpush.bf16.msra.mxu2 %v2497_v60  ;;  %v1401_v60 = vshll.u32 %v2499_v54, 16 }
  0x4f   : > { %645 = vmatmul.bf16.vlgmr.msrb.gmra.mxu2 %v556_v63  ;;  %800 = vmatmul.bf16.gmra.mxu3 %v2451_v7  ;;  %v2464_v63 = vld [vmem:[%s2699_s22 + $0xa8] sm:$0xff]  ;;  %v2077_v7 = vld [vmem:[%s2699_s22 + $0xb0] sm:$0xf] }
  0x50   : > { %v868_v11 = vunpack.c.l.b16 %v2077_v7  ;;  %v2488_v7 = vld [vmem:[%s2699_s22 + $0x1c] sm:$0xff] }
  0x51   : > { %1114 = vmatpush.bf16.msra.mxu1 %v2484_v3  ;;  %1612 = vmatpush.bf16.msra.mxu0 %v2517_v4  ;;  %v1155_v4 = vld [vmem:[%s2699_s22 + $0x4] sm:$0xff]  }
  0x52   : > { %1300 = vmatpush.bf16.msra.mxu2 %v2496_v2  ;;  %v1403_v2 = vrot.slane %v1401_v60, 1  ;;  %v1208_v26 = vshrl.u32 %v1155_v4, 16 }
  0x54   : > { %v1404_v3 = vsel %vm544_vm0, %v1399_v1, %v1403_v2  ;;  %v1407_v18 = vor.u32 %v1405_v12, %v1403_v2 }
  0x55   : > { %1115 = vmatpush.bf16.msra.mxu1 %v2483_v9  ;;  %1613 = vmatpush.bf16.msra.mxu0 %v2516_v10  ;;  %v581_v9 = vshrl.u32 %v1963_v45, 16  ;;  %v400_v10 = vunpack.c.l.b16 %v230_v6 }
  0x56   : > { %1301 = vmatpush.bf16.msra.mxu2 %v2495_v8  ;;  %v2500_v8 = vld [vmem:[%s2699_s22 + $0x44] sm:$0xff] }
  0x57   : > { %v1409_v13 = vshll.u32 %v2500_v8, 16 }
  0x59   : > { %1116 = vmatpush.bf16.msra.mxu1 %v2482_v15  ;;  %1614 = vmatpush.bf16.msra.mxu0 %v2515_v16  ;;  %v405_v15 = vpack.c.b16 %v400_v10, %v400_v10  ;;  %v873_v16 = vpack.c.b16 %v868_v11, %v868_v11  ;;  %v1231_v11 = vshll.u32 %v2488_v7, 16 }
  0x5a   : > { %1302 = vmatpush.bf16.msra.mxu2 %v2494_v14  ;;  %v583_v14 = vor.u32 %v581_v9, %v579_v57 }
  0x5c   : > { %472 = vmatmul.bf16.gmra.mxu1 %v2413_v22  ;;  %940 = vmatmul.bf16.gmra.mxu0 %v2462_v23  ;;  %v1210_v22 = vshll.u32 %v1155_v4, 16  ;;  %v2474_v23 = vld [vmem:[%s2699_s22 + $0x68] sm:$0xff] }
  0x5d   : > { %1117 = vmatpush.bf16.msra.mxu1 %v2481_v20  ;;  %1615 = vmatpush.bf16.msra.mxu0 %v2514_v25  ;;  %v2586_v20 = vld [vmem:[%s2699_s22 + $0x4] sm:$0xe]  ;;  %v1033_v54 = vshrl.u32 %v2474_v23, 16 }
  0x5e   : > { %1303 = vmatpush.bf16.msra.mxu2 %v2493_v19  ;;  %v1411_v19 = vrot.slane %v1409_v13, 1  ;;  %v2587_v32 = vor.u32 %v2586_v20, %v2585_v5 }
  0x5f   : > { %650 = vmatmul.bf16.gmra.mxu2 %v564_v21  ;;  %805 = vmatmul.bf16.gmra.mxu3 %v2452_v27  ;;  %v2486_v21 = vld [vmem:[%s2699_s22 + $0xc] sm:$0xff]  ;;  %v1212_v27 = vrot.slane %v1210_v22, 1  ;;  %v1554_v22 = vrot.slane %v2488_v7, 1 }
  0x60   : > { %v1412_v25 = vsel %vm544_vm0, %v1407_v18, %v1411_v19  ;;  %v1215_v28 = vshll.u32 %v2486_v21, 16  ;;  %v1219_v52 = vshrl.u32 %v2486_v21, 16  ;;  %v1233_v18 = vrot.slane %v1231_v11, 1 }
  0x61   : > { %1118 = vmatpush.bf16.msra.mxu1 %v2480_v29  ;;  %1616 = vmatpush.bf16.msra.mxu0 %v2513_v31  ;;  %v1022_v29 = vshrl.u32 %v2473_v17, 16  ;;  %v1029_v31 = vshll.u32 %v2474_v23, 16  ;;  %v1213_v34 = vor.u32 %v1212_v27, %v1208_v26  ;;  %v2489_v26 = vld [vmem:[%s2699_s22 + $0x24] sm:$0x10] }
  0x62   : > { %1304 = vmatpush.bf16.msra.mxu2 %v2492_v24  ;;  %v1024_v24 = vshll.u32 %v2473_v17, 16  ;;  %v1217_v35 = vrot.slane %v1215_v28, 1 }
  0x63   : > { %v1031_v37 = vrot.slane %v1029_v31, 1 }
  0x64   : > { %v1218_v42 = vsel %vm544_vm0, %v1213_v34, %v1217_v35  ;;  %v1221_v57 = vor.u32 %v1219_v52, %v1217_v35 }
  0x65   : > { %1119 = vmatpush.bf16.msra.mxu1 %v2479_v44  ;;  %1617 = vmatpush.bf16.msra.mxu0 %v2512_v48  ;;  %v2475_v48 = vld [vmem:[%s2699_s22 + $0x70] sm:$0xff]  ;;  %v1035_v59 = vor.u32 %v1033_v54, %v1031_v37 }
  0x66   : > { %1305 = vmatpush.bf16.msra.mxu2 %v2491_v30  ;;  %v1026_v30 = vrot.slane %v1024_v24, 1  ;;  %v1037_v55 = vshll.u32 %v2475_v48, 16 }
  0x68   : > { %v1027_v36 = vor.u32 %v1026_v30, %v1022_v29  ;;  %v1039_v60 = vrot.slane %v1037_v55, 1 }
  0x69   : > { %1120 = vmatpush.bf16.msra.mxu1 %v2478_v50  ;;  %1618 = vmatpush.bf16.msra.mxu0 %v2511_v0  ;;  %v2328_v50 = vld [vmem:[%s2699_s22 + $0x54] sm:$0xf] }
  0x6a   : > { %1306 = vmatpush.bf16.msra.mxu2 %v2490_v47  ;;  %v1032_v43 = vsel %vm544_vm0, %v1027_v36, %v1031_v37  ;;  %v2487_v47 = vld [vmem:[%s2699_s22 + $0x14] sm:$0xff]  ;;  %v2329_v56 = vor.u32 %v2502_v51, %v2328_v50 }
  0x6b   : > { %v1223_v53 = vshll.u32 %v2487_v47, 16  ;;  %v1227_v10 = vshrl.u32 %v2487_v47, 16 }
  0x6c   : > { %477 = vmatmul.bf16.gmra.mxu1 %v2414_v39  ;;  %945 = vmatmul.bf16.gmra.mxu0 %v2463_v40  ;;  %v1550_v39 = vrot.slane %v2486_v21, 1  ;;  %v1413_v40 = vshrl.u32 %v2500_v8, 16  ;;  %v2476_v8 = vld [vmem:[%s2699_s22 + $0x78] sm:$0xff]  ;;  %v1429_v27 = vshrl.u32 %v2329_v56, 16 }
  0x6d   : > { %v1225_v58 = vrot.slane %v1223_v53, 1 }
  0x6e   : > { %v1415_v45 = vor.u32 %v1413_v40, %v1411_v19 }
  0x6f   : > { %655 = vmatmul.bf16.gmra.mxu2 %v572_v38  ;;  %810 = vmatmul.bf16.gmra.mxu3 %v728_v46  ;;  %v1549_v38 = vrot.slane %v2587_v32, 1  ;;  %v1419_v46 = vrot.slane %v1417_v41, 1  ;;  %v1226_v0 = vsel %vm544_vm0, %v1221_v57, %v1225_v58  ;;  %v1229_v17 = vor.u32 %v1227_v10, %v1225_v58  ;;  %v2186_v32 = vld [vmem:[%s2699_s22 + $0x80] sm:$0xf] }
  0x71   : > { %v1551_v44 = vsel %vm1548_vm1, %v1549_v38, %v1550_v39  ;;  %v1420_v49 = vsel %vm544_vm0, %v1415_v45, %v1419_v46  ;;  %v1234_v23 = vsel %vm544_vm0, %v1229_v17, %v1233_v18  ;;  %v1235_v38 = vshrl.u32 %v2488_v7, 16 }
  0x7c   : > { %482 = vmatmul.bf16.gmra.mxu1 %v2415_v62  ;;  %950 = vmatmul.bf16.gmra.mxu0 %v2464_v63  ;;  %v1421_v62 = vshrl.u32 %v2501_v33, 16  ;;  %v1425_v63 = vshll.u32 %v2329_v56, 16  ;;  %v2477_v33 = vld [vmem:[%s2699_s22 + $0x80] sm:$0x10] }
  0x7d   : > { %v2187_v37 = vor.u32 %v2477_v33, %v2186_v32 }
  0x7e   : > { %v1423_v5 = vor.u32 %v1421_v62, %v1419_v46  ;;  %v1427_v6 = vrot.slane %v1425_v63, 1 }
  0x7f   : > { %660 = vmatmul.bf16.gmra.mxu2 %v580_v61  ;;  %1493 = vmatmul.bf16.vlgmr.msrb.gmra.mxu3 %v1404_v3  ;;  %v1552_v61 = vrot.slane %v2487_v47, 1  ;;  %v1040_v3 = vsel %vm544_vm0, %v1035_v59, %v1039_v60 }
  0x80   : > { %v1428_v9 = vsel %vm544_vm0, %v1423_v5, %v1427_v6  ;;  %v1431_v36 = vor.u32 %v1429_v27, %v1427_v6 }
  0x81   : > { %v1553_v4 = vsel %vm1548_vm1, %v1550_v39, %v1552_v61  ;;  %v1555_v31 = vsel %vm1548_vm1, %v1552_v61, %v1554_v22 }
  0x8c   : > { %487 = vmatmul.bf16.gmra.mxu1 %v405_v15  ;;  %955 = vmatmul.bf16.gmra.mxu0 %v873_v16  ;;  %v1041_v15 = vshrl.u32 %v2475_v48, 16  ;;  %v1045_v16 = vshll.u32 %v2476_v8, 16 }
  0x8e   : > { %v1043_v20 = vor.u32 %v1041_v15, %v1039_v60  ;;  %v1047_v21 = vrot.slane %v1045_v16, 1 }
  0x8f   : > { %665 = vmatmul.bf16.gmra.mxu2 %v583_v14  ;;  %1498 = vmatmul.bf16.gmra.mxu3 %v1412_v25  ;;  %v2250_v25 = vld [vmem:[%s2699_s22 + $0x24] sm:$0xf] }
  0x90   : > { %v1048_v30 = vsel %vm544_vm0, %v1043_v20, %v1047_v21  ;;  %v2251_v34 = vor.u32 %v2489_v26, %v2250_v25 }
  0x92   : > { %v1239_v39 = vshll.u32 %v2251_v34, 16  ;;  %v1243_v63 = vshrl.u32 %v2251_v34, 16 }
  0x94   : > { %v1241_v45 = vrot.slane %v1239_v39, 1 }
  0x96   : > { %v1245_v7 = vor.u32 %v1243_v63, %v1241_v45 }
  0x9c   : > { %1121 = vmatmul.bf16.vlgmr.msra.gmra.mxu1 %v1032_v43  ;;  %1619 = vmatmul.bf16.vlgmr.msra.gmra.mxu0 %v1551_v44  ;;  %v1053_v43 = vshll.u32 %v2187_v37, 16  ;;  %v1237_v44 = vor.u32 %v1235_v38, %v1233_v18 }
  0x9e   : > { %v1055_v48 = vrot.slane %v1053_v43, 1  ;;  %v1242_v50 = vsel %vm544_vm0, %v1237_v44, %v1241_v45 }
  0x9f   : > { %1307 = vmatmul.bf16.vlgmr.msra.gmra.mxu2 %v1218_v42  ;;  %1503 = vmatmul.bf16.gmra.mxu3 %v1420_v49  ;;  %v1049_v42 = vshrl.u32 %v2476_v8, 16  ;;  %v1556_v49 = vrot.slane %v2251_v34, 1 }
  0xa1   : > { %v1051_v47 = vor.u32 %v1049_v42, %v1047_v21  ;;  %v1557_v54 = vsel %vm1548_vm1, %v1554_v22, %v1556_v49 }
  0xa3   : > { %v1056_v53 = vsel %vm544_vm0, %v1051_v47, %v1055_v48 }
  0xa9   : > { %v2933_v1 = vpop.f32.mrf.mxu0  ;;  %v2935_v2 = vpop.f32.mrf.mxu1 }
  0xac   : > { %1126 = vmatmul.bf16.gmra.mxu1 %v1040_v3  ;;  %1624 = vmatmul.bf16.gmra.mxu0 %v1553_v4  ;;  %v1057_v4 = vshrl.u32 %v2187_v37, 16 }
  0xaf   : > { %1312 = vmatmul.bf16.gmra.mxu2 %v1226_v0  ;;  %1508 = vmatmul.bf16.gmra.mxu3 %v1428_v9 }
  0xb1   : > { %v361_v13 = vpop.f32.mrf.mxu0  ;;  %v2944_v14 = vpop.f32.mrf.mxu1 }
  0xb2   : > { %v2942_v12 = vpop.f32.mrf.mxu2  ;;  %v791_v19 = vpop.f32.mrf.mxu3 }
  0xb9   : > { %v364_v28 = vpop.f32.mrf.mxu0  ;;  %v2949_v29 = vpop.f32.mrf.mxu1 }
  0xba   : > { %v381_v24 = vpop.f32.mrf.mxu2  ;;  %v793_v35 = vpop.f32.mrf.mxu3 }
  0xbc   : > { %1131 = vmatmul.bf16.gmra.mxu1 %v1048_v30  ;;  %1629 = vmatmul.bf16.gmra.mxu0 %v1555_v31 }
  0xbf   : > { %1317 = vmatmul.bf16.gmra.mxu2 %v1234_v23  ;;  %1513 = vmatmul.bf16.gmra.mxu3 %v1431_v36 }
  0xc1   : > { %v366_v40 = vpop.f32.mrf.mxu0  ;;  %v2955_v41 = vpop.f32.mrf.mxu1 }
  0xc2   : > { %v796_v46 = vpop.f32.mrf.mxu3 }
  0xc9   : > { %v468_v51 = vpop.f32.mrf.mxu1  ;;  %v936_v52 = vpop.f32.mrf.mxu0 }
  0xca   : > { %v469_v55 = vadd.f32 %v468_v51, %v2933_v1  ;;  %v798_v56 = vpop.f32.mrf.mxu3  ;;  %v1059_v1 = vor.u32 %v1057_v4, %v1055_v48 }
  0xcc   : > { %1136 = vmatmul.bf16.gmra.mxu1 %v1056_v53  ;;  %1634 = vmatmul.bf16.gmra.mxu0 %v1557_v54 }
  0xcf   : > { %1322 = vmatmul.bf16.gmra.mxu2 %v1242_v50 }
  0xd1   : > { %v470_v60 = vpop.f32.mrf.mxu1  ;;  %v938_v61 = vpop.f32.mrf.mxu0 }
  0xd2   : > { %v646_v57 = vpop.f32.mrf.mxu2  ;;  %v471_v62 = vadd.f32 %v470_v60, %v361_v13  ;;  %v801_v3 = vpop.f32.mrf.mxu3 }
  0xd3   : > { %v670_v58 = vadd.f32 %v646_v57, %v469_v55 }
  0xd5   : > { %v815_v59 = vadd.f32 %v791_v19, %v670_v58 }
  0xd7   : > { %v2961_v0 = vadd.f32 %v936_v52, %v815_v59 }
  0xd9   : > { %v473_v9 = vpop.f32.mrf.mxu1  ;;  %v941_v10 = vpop.f32.mrf.mxu0 }
  0xda   : > { %v648_v5 = vpop.f32.mrf.mxu2  ;;  %v474_v11 = vadd.f32 %v473_v9, %v364_v28  ;;  %v803_v16 = vpop.f32.mrf.mxu3 }
  0xdb   : > { %v671_v6 = vadd.f32 %v648_v5, %v471_v62 }
  0xdc   : > { %1141 = vmatmul.bf16.gmra.mxu1 %v1059_v1  ;;  %1639 = vmatmul.bf16.gmra.mxu0 %v1556_v49 }
  0xdd   : > { %v816_v8 = vadd.f32 %v793_v35, %v671_v6 }
  0xdf   : > { %1327 = vmatmul.bf16.gmra.mxu2 %v1245_v7  ;;  %v2963_v15 = vadd.f32 %v938_v61, %v816_v8 }
  0xe1   : > { %v475_v19 = vpop.f32.mrf.mxu1  ;;  %v943_v20 = vpop.f32.mrf.mxu0 }
  0xe2   : > { %v651_v13 = vpop.f32.mrf.mxu2  ;;  %v476_v21 = vadd.f32 %v475_v19, %v366_v40  ;;  %v806_v23 = vpop.f32.mrf.mxu3 }
  0xe3   : > { %v672_v17 = vadd.f32 %v651_v13, %v474_v11 }
  0xe5   : > { %v817_v18 = vadd.f32 %v796_v46, %v672_v17 }
  0xe7   : > { %v2965_v22 = vadd.f32 %v941_v10, %v817_v18 }
  0xe9   : > { %v478_v27 = vpop.f32.mrf.mxu1  ;;  %v946_v28 = vpop.f32.mrf.mxu0 }
  0xea   : > { %v653_v24 = vpop.f32.mrf.mxu2  ;;  %v479_v30 = vadd.f32 %v478_v27, %v2935_v2  ;;  %v808_v32 = vpop.f32.mrf.mxu3 }
  0xeb   : > { %v673_v25 = vadd.f32 %v653_v24, %v476_v21  ;;  %v2989_v24 = vld [vmem:[%s3029_s2] ss:$0 sm:$0xff] }
  0xed   : > { %v818_v26 = vadd.f32 %v798_v56, %v673_v25 }
  0xef   : > { %v2968_v31 = vadd.f32 %v943_v20, %v818_v26 }
  0xf1   : > { %v480_v36 = vpop.f32.mrf.mxu1  ;;  %v948_v37 = vpop.f32.mrf.mxu0 }
  0xf2   : > { %v656_v33 = vpop.f32.mrf.mxu2  ;;  %v481_v38 = vadd.f32 %v480_v36, %v2944_v14  ;;  %v811_v40 = vpop.f32.mrf.mxu3 }
  0xf3   : > { %v674_v34 = vadd.f32 %v656_v33, %v479_v30 }
  0xf5   : > { %v819_v35 = vadd.f32 %v801_v3, %v674_v34 }
  0xf7   : > { %v2971_v39 = vadd.f32 %v946_v28, %v819_v35 }
  0xf9   : > { %v483_v45 = vpop.f32.mrf.mxu1  ;;  %v951_v46 = vpop.f32.mrf.mxu0 }
  0xfa   : > { %v658_v42 = vpop.f32.mrf.mxu2  ;;  %v484_v2 = vadd.f32 %v483_v45, %v2949_v29  ;;  %v813_v48 = vpop.f32.mrf.mxu3 }
  0xfb   : > { %v675_v43 = vadd.f32 %v658_v42, %v481_v38 }
  0xfd   : > { %v820_v44 = vadd.f32 %v803_v16, %v675_v43 }
  0xff   : > { %v2974_v47 = vadd.f32 %v948_v37, %v820_v44 }
 0x101   : > { %v485_v52 = vpop.f32.mrf.mxu1  ;;  %v953_v53 = vpop.f32.mrf.mxu0 }
 0x102   : > { %v661_v49 = vpop.f32.mrf.mxu2  ;;  %v486_v14 = vadd.f32 %v485_v52, %v2955_v41  ;;  %v1494_v55 = vpop.f32.mrf.mxu3 }
 0x103   : > { %v676_v50 = vadd.f32 %v661_v49, %v484_v2 }
 0x105   : > { %v821_v51 = vadd.f32 %v806_v23, %v676_v50 }
 0x107   : > { %v2977_v54 = vadd.f32 %v951_v46, %v821_v51 }
 0x109   : > { %v488_v59 = vpop.f32.mrf.mxu1  ;;  %v956_v60 = vpop.f32.mrf.mxu0 }
 0x10a   : > { %v663_v56 = vpop.f32.mrf.mxu2  ;;  %v489_v29 = vadd.f32 %v488_v59, %v2942_v12  ;;  %v1496_v62 = vpop.f32.mrf.mxu3 }
 0x10b   : > { %v677_v57 = vadd.f32 %v663_v56, %v486_v14 }
 0x10d   : > { %v822_v58 = vadd.f32 %v808_v32, %v677_v57 }
 0x10f   : > { %v2980_v61 = vadd.f32 %v953_v53, %v822_v58 }
 0x111   : > { %v490_v5 = vpop.f32.mrf.mxu1  ;;  %v958_v6 = vpop.f32.mrf.mxu0 }
 0x112   : > { %v666_v63 = vpop.f32.mrf.mxu2  ;;  %v1499_v41 = vpop.f32.mrf.mxu3 }
 0x113   : > { %v678_v3 = vadd.f32 %v666_v63, %v489_v29 }
 0x115   : > { %v823_v4 = vadd.f32 %v811_v40, %v678_v3 }
 0x117   : > { %v2982_v7 = vadd.f32 %v956_v60, %v823_v4 }
 0x119   : > { %v1122_v1 = vpop.f32.mrf.mxu1  ;;  %v1620_v9 = vpop.f32.mrf.mxu0 }
 0x11a   : > { %v668_v8 = vpop.f32.mrf.mxu2  ;;  %v1146_v10 = vadd.f32 %v1122_v1, %v2961_v0  ;;  %v1501_v11 = vpop.f32.mrf.mxu3 }
 0x121   : > { %v1124_v12 = vpop.f32.mrf.mxu1  ;;  %v1622_v17 = vpop.f32.mrf.mxu0 }
 0x122   : > { %v1308_v16 = vpop.f32.mrf.mxu2  ;;  %v1147_v19 = vadd.f32 %v1124_v12, %v2963_v15  ;;  %v1504_v20 = vpop.f32.mrf.mxu3 }
 0x123   : > { %v1332_v13 = vadd.f32 %v1308_v16, %v1146_v10 }
 0x125   : > { %v1518_v18 = vadd.f32 %v1494_v55, %v1332_v13 }
 0x127   : > { %v1644_v23 = vadd.f32 %v1620_v9, %v1518_v18 }
 0x129   : > { %v1127_v0 = vpop.f32.mrf.mxu1  ;;  %v1625_v27 = vpop.f32.mrf.mxu0  ;;  %v1657_v28 = vadd.f32 %v2989_v24, %v1644_v23 }
 0x12a   : > { %v1310_v21 = vpop.f32.mrf.mxu2  ;;  %v1148_v32 = vadd.f32 %v1127_v0, %v2965_v22  ;;  %v1506_v33 = vpop.f32.mrf.mxu3 }
 0x12b   : > { %v1333_v25 = vadd.f32 %v1310_v21, %v1147_v19  ;;  %v1666_v35 = vmax.f32 %v1657_v28, 0.0 }
 0x12d   : > { %v1519_v26 = vadd.f32 %v1496_v62, %v1333_v25 }
 0x12f   : > { %v1645_v30 = vadd.f32 %v1622_v17, %v1519_v26 }
 0x131   : > { %v1658_v15 = vadd.f32 %v2989_v24, %v1645_v30  ;;  %v1129_v40 = vpop.f32.mrf.mxu1  ;;  %v1627_v42 = vpop.f32.mrf.mxu0 }
 0x132   : > { %v1313_v34 = vpop.f32.mrf.mxu2  ;;  %v1149_v22 = vadd.f32 %v1129_v40, %v2968_v31  ;;  %v1509_v44 = vpop.f32.mrf.mxu3 }
 0x133   : > { %v1667_v36 = vmax.f32 %v1658_v15, 0.0  ;;  %v1334_v37 = vadd.f32 %v1313_v34, %v1148_v32 }
 0x135   : > { %v2522_v38 = vpack.c.bf16 %v1667_v36, %v1666_v35  ;;  %v1520_v43 = vadd.f32 %v1499_v41, %v1334_v37 }
 0x137   : > { %2523 = vst [vmem:[%s2998_s8] sm:$0xff] %v2522_v38   ;;  %v1646_v46 = vadd.f32 %v1625_v27, %v1520_v43 }
 0x139   : > { %v1132_v49 = vpop.f32.mrf.mxu1  ;;  %v1630_v50 = vpop.f32.mrf.mxu0  ;;  %v1659_v51 = vadd.f32 %v2989_v24, %v1646_v46 }
 0x13a   : > { %v1315_v45 = vpop.f32.mrf.mxu2  ;;  %v1150_v53 = vadd.f32 %v1132_v49, %v2971_v39  ;;  %v1511_v14 = vpop.f32.mrf.mxu3 }
 0x13b   : > { %v1335_v2 = vadd.f32 %v1315_v45, %v1149_v22  ;;  %v1668_v57 = vmax.f32 %v1659_v51, 0.0 }
 0x13d   : > { %v1521_v48 = vadd.f32 %v1501_v11, %v1335_v2 }
 0x13f   : > { %v1647_v52 = vadd.f32 %v1627_v42, %v1521_v48 }
 0x141   : > { %v1660_v55 = vadd.f32 %v2989_v24, %v1647_v52  ;;  %v1134_v60 = vpop.f32.mrf.mxu1  ;;  %v1632_v29 = vpop.f32.mrf.mxu0 }
 0x142   : > { %v1318_v56 = vpop.f32.mrf.mxu2  ;;  %v1151_v63 = vadd.f32 %v1134_v60, %v2974_v47  ;;  %v1514_v3 = vpop.f32.mrf.mxu3 }
 0x143   : > { %v1669_v58 = vmax.f32 %v1660_v55, 0.0  ;;  %v1336_v31 = vadd.f32 %v1318_v56, %v1150_v53 }
 0x145   : > { %v2527_v59 = vpack.c.bf16 %v1669_v58, %v1668_v57  ;;  %v1522_v62 = vadd.f32 %v1504_v20, %v1336_v31 }
 0x147   : > { %2539 = vst [vmem:[%s2998_s8 + $0x8] sm:$0xff] %v2527_v59   ;;  %v1648_v5 = vadd.f32 %v1630_v50, %v1522_v62 }
 0x149   : > { %v1137_v41 = vpop.f32.mrf.mxu1  ;;  %v1635_v8 = vpop.f32.mrf.mxu0  ;;  %v1661_v1 = vadd.f32 %v2989_v24, %v1648_v5 }
 0x14a   : > { %v1320_v4 = vpop.f32.mrf.mxu2  ;;  %v1152_v10 = vadd.f32 %v1137_v41, %v2977_v54  ;;  %v1516_v11 = vpop.f32.mrf.mxu3 }
 0x14b   : > { %v1337_v6 = vadd.f32 %v1320_v4, %v1151_v63  ;;  %v1670_v12 = vmax.f32 %v1661_v1, 0.0 }
 0x14d   : > { %v1523_v39 = vadd.f32 %v1506_v33, %v1337_v6 }
 0x14f   : > { %v1649_v9 = vadd.f32 %v1632_v29, %v1523_v39 }
 0x151   : > { %v1662_v16 = vadd.f32 %v2989_v24, %v1649_v9  ;;  %v1139_v19 = vpop.f32.mrf.mxu1  ;;  %v1637_v20 = vpop.f32.mrf.mxu0 }
 0x152   : > { %v1323_v13 = vpop.f32.mrf.mxu2  ;;  %v1153_v23 = vadd.f32 %v1139_v19, %v2980_v61 }
 0x153   : > { %v1671_v17 = vmax.f32 %v1662_v16, 0.0  ;;  %v1338_v47 = vadd.f32 %v1323_v13, %v1152_v10 }
 0x155   : > { %v2532_v18 = vpack.c.bf16 %v1671_v17, %v1670_v12  ;;  %v1524_v21 = vadd.f32 %v1509_v44, %v1338_v47 }
 0x157   : > { %2540 = vst [vmem:[%s2998_s8 + $0x10] sm:$0xff] %v2532_v18   ;;  %v1650_v26 = vadd.f32 %v1635_v8, %v1524_v21 }
 0x159   : > { %v1142_v54 = vpop.f32.mrf.mxu1  ;;  %v1640_v28 = vpop.f32.mrf.mxu0  ;;  %v1663_v30 = vadd.f32 %v2989_v24, %v1650_v26 }
 0x15a   : > { %v1325_v25 = vpop.f32.mrf.mxu2  ;;  %v1154_v33 = vadd.f32 %v1142_v54, %v2982_v7 }
 0x15b   : > { %v1339_v0 = vadd.f32 %v1325_v25, %v1153_v23  ;;  %v1672_v35 = vmax.f32 %v1663_v30, 0.0 }
 0x15d   : > { %v1525_v27 = vadd.f32 %v1511_v14, %v1339_v0 }
 0x15f   : > { %v1651_v32 = vadd.f32 %v1637_v20, %v1525_v27 }
 0x161   : > { %v1664_v15 = vadd.f32 %v2989_v24, %v1651_v32  ;;  %v1144_v40 = vpop.f32.mrf.mxu1  ;;  %v1642_v42 = vpop.f32.mrf.mxu0 }
 0x162   : > { %v1328_v34 = vpop.f32.mrf.mxu2 }
 0x163   : > { %v1673_v36 = vmax.f32 %v1664_v15, 0.0  ;;  %v1340_v37 = vadd.f32 %v1328_v34, %v1154_v33 }
 0x165   : > { %v2537_v61 = vpack.c.bf16 %v1673_v36, %v1672_v35  ;;  %v1526_v38 = vadd.f32 %v1514_v3, %v1340_v37 }
 0x167   : > { %2541 = vst [vmem:[%s2998_s8 + $0x18] sm:$0xff] %v2537_v61   ;;  %v1652_v43 = vadd.f32 %v1640_v28, %v1526_v38 }
 0x169   : > { %v1665_v22 = vadd.f32 %v2989_v24, %v1652_v43 }
 0x16a   : > { %v1330_v44 = vpop.f32.mrf.mxu2 }
 0x16b   : > { %v1674_v45 = vmax.f32 %v1665_v22, 0.0 }
 0x16d   : > { %v1683_v46 = vpack.c.bf16 %v1674_v45, %v1674_v45 }
 0x16f   : > { %1692 = vst [vmem:[%s2998_s8 + $0x20] sm:$0xf] %v1683_v46 }
 0x170 PF: > { %s13_s14 = sadd.s32 1, %s2610_s14   ;;  %s3031_s12 = smov %s2606_s13 }
 0x171   : > { %p10_p5 = scmp.ge.s32.totalorder %s13_s14, 4   ;;  %s3032_s13 = smov %s3034_s15 }
 0x173   :  { %12 = sbr.rel (!%p10_p5) target bundleno = 2 (0x2), region = 79 }

// kernel: conv25_forward.9
= control target key start
LH: loop header
LB: loop body
LE: loop exit
PB: predicated region body
PF: predicated region fallthrough
CT: control target
= control target key end

     0   :  { %s478_s1 = inlined_call_operand.vmem [shape: bf16[128,128], index: 1, kind: input, shape index: {}]   ;;  %s479_s2 = inlined_call_operand.vmem [shape: f32[1,128], index: 2, kind: input, shape index: {}]   ;;  %s480_s0 = inlined_call_operand.vmem [shape: bf16[128,128], index: 0, kind: input, shape index: {}]   ;;  %s481_s3 = inlined_call_operand.vmem [shape: bf16[128,128], index: 3, kind: output, shape index: {}]  }
   0x1   :  { %v310_v0 = vld [vmem:[%s478_s1 + $0x38] sm:$0xff]  ;;  %v309_v1 = vld [vmem:[%s478_s1 + $0x30] sm:$0xff]  ;;  %v308_v2 = vld [vmem:[%s478_s1 + $0x28] sm:$0xff] }
   0x2   :  { %146 = vmatpush.bf16.msra.mxu0 %v310_v0  ;;  %358 = vmatpush.bf16.msra.mxu1 %v310_v0  ;;  %v307_v3 = vld [vmem:[%s478_s1 + $0x20] sm:$0xff]  ;;  %v306_v4 = vld [vmem:[%s478_s1 + $0x18] sm:$0xff]  ;;  %v305_v5 = vld [vmem:[%s478_s1 + $0x10] sm:$0xff] }
   0x3   :  { %359 = vmatpush.bf16.msra.mxu2 %v310_v0  ;;  %360 = vmatpush.bf16.msra.mxu3 %v310_v0  ;;  %v304_v6 = vld [vmem:[%s478_s1 + $0x8] sm:$0xff]  ;;  %v303_v7 = vld [vmem:[%s478_s1] sm:$0xff]  ;;  %v297_v9 = vld [vmem:[%s480_s0 + $0x10] sm:$0xff] }
   0x4   :  { %v295_v8 = vld [vmem:[%s480_s0] sm:$0xff]  ;;  %v301_v11 = vld [vmem:[%s480_s0 + $0x30] sm:$0xff]  ;;  %v296_v12 = vld [vmem:[%s480_s0 + $0x8] sm:$0xff] }
   0x5   :  { %v299_v10 = vld [vmem:[%s480_s0 + $0x20] sm:$0xff]  ;;  %v298_v13 = vld [vmem:[%s480_s0 + $0x18] sm:$0xff]  ;;  %v300_v14 = vld [vmem:[%s480_s0 + $0x28] sm:$0xff] }
   0x6   :  { %147 = vmatpush.bf16.msra.mxu0 %v309_v1  ;;  %361 = vmatpush.bf16.msra.mxu1 %v309_v1  ;;  %v302_v15 = vld [vmem:[%s480_s0 + $0x38] sm:$0xff]  ;;  %v382_v18 = vld [vmem:[%s479_s2] ss:$0 sm:$0xff] }
   0x7   :  { %362 = vmatpush.bf16.msra.mxu2 %v309_v1  ;;  %363 = vmatpush.bf16.msra.mxu3 %v309_v1 }
   0xa   :  { %148 = vmatpush.bf16.msra.mxu0 %v308_v2  ;;  %364 = vmatpush.bf16.msra.mxu1 %v308_v2 }
   0xb   :  { %365 = vmatpush.bf16.msra.mxu2 %v308_v2  ;;  %366 = vmatpush.bf16.msra.mxu3 %v308_v2 }
   0xe   :  { %149 = vmatpush.bf16.msra.mxu0 %v307_v3  ;;  %367 = vmatpush.bf16.msra.mxu1 %v307_v3 }
   0xf   :  { %368 = vmatpush.bf16.msra.mxu2 %v307_v3  ;;  %369 = vmatpush.bf16.msra.mxu3 %v307_v3 }
  0x12   :  { %150 = vmatpush.bf16.msra.mxu0 %v306_v4  ;;  %370 = vmatpush.bf16.msra.mxu1 %v306_v4 }
  0x13   :  { %371 = vmatpush.bf16.msra.mxu2 %v306_v4  ;;  %372 = vmatpush.bf16.msra.mxu3 %v306_v4 }
  0x16   :  { %151 = vmatpush.bf16.msra.mxu0 %v305_v5  ;;  %373 = vmatpush.bf16.msra.mxu1 %v305_v5 }
  0x17   :  { %374 = vmatpush.bf16.msra.mxu2 %v305_v5  ;;  %375 = vmatpush.bf16.msra.mxu3 %v305_v5 }
  0x1a   :  { %152 = vmatpush.bf16.msra.mxu0 %v304_v6  ;;  %376 = vmatpush.bf16.msra.mxu1 %v304_v6 }
  0x1b   :  { %377 = vmatpush.bf16.msra.mxu2 %v304_v6  ;;  %378 = vmatpush.bf16.msra.mxu3 %v304_v6 }
  0x1e   :  { %153 = vmatpush.bf16.msra.mxu0 %v303_v7  ;;  %379 = vmatpush.bf16.msra.mxu1 %v303_v7 }
  0x1f   :  { %380 = vmatpush.bf16.msra.mxu2 %v303_v7  ;;  %381 = vmatpush.bf16.msra.mxu3 %v303_v7 }
  0x21   :  { %154 = vmatmul.bf16.vlgmr.msra.gmra.mxu0 %v295_v8  ;;  %164 = vmatmul.bf16.vlgmr.msra.gmra.mxu1 %v297_v9 }
  0x22   :  { %174 = vmatmul.bf16.vlgmr.msra.gmra.mxu2 %v299_v10  ;;  %184 = vmatmul.bf16.vlgmr.msra.gmra.mxu3 %v301_v11 }
  0x31   :  { %159 = vmatmul.bf16.gmra.mxu0 %v296_v12  ;;  %169 = vmatmul.bf16.gmra.mxu1 %v298_v13 }
  0x32   :  { %179 = vmatmul.bf16.gmra.mxu2 %v300_v14  ;;  %189 = vmatmul.bf16.gmra.mxu3 %v302_v15 }
  0x9e   :  { %v155_v16 = vpop.f32.mrf.mxu0  ;;  %v165_v17 = vpop.f32.mrf.mxu1 }
  0x9f   :  { %v156_v23 = vadd.f32 %v382_v18, %v155_v16  ;;  %v166_v24 = vadd.f32 %v382_v18, %v165_v17 }
  0xa5   :  { %v175_v19 = vpop.f32.mrf.mxu2  ;;  %v185_v20 = vpop.f32.mrf.mxu3 }
  0xa6   :  { %v157_v21 = vpop.f32.mrf.mxu0  ;;  %v167_v22 = vpop.f32.mrf.mxu1  ;;  %v176_v31 = vadd.f32 %v382_v18, %v175_v19  ;;  %v186_v32 = vadd.f32 %v382_v18, %v185_v20 }
  0xa7   :  { %v158_v25 = vadd.f32 %v382_v18, %v157_v21  ;;  %v168_v26 = vadd.f32 %v382_v18, %v167_v22 }
  0xa9   :  { %v314_v27 = vpack.c.bf16 %v158_v25, %v156_v23  ;;  %v324_v28 = vpack.c.bf16 %v168_v26, %v166_v24 }
  0xab   :  { %315 = vst [vmem:[%s481_s3] sm:$0xff] %v314_v27  }
  0xac   :  { %352 = vst [vmem:[%s481_s3 + $0x10] sm:$0xff] %v324_v28  }
  0xad   :  { %v177_v29 = vpop.f32.mrf.mxu2  ;;  %v187_v30 = vpop.f32.mrf.mxu3 }
  0xae   :  { %v178_v33 = vadd.f32 %v382_v18, %v177_v29  ;;  %v188_v34 = vadd.f32 %v382_v18, %v187_v30  ;;  %v160_v35 = vpop.f32.mrf.mxu0  ;;  %v170_v36 = vpop.f32.mrf.mxu1 }
  0xaf   :  { %v161_v43 = vadd.f32 %v382_v18, %v160_v35  ;;  %v171_v44 = vadd.f32 %v382_v18, %v170_v36 }
  0xb0   :  { %v334_v37 = vpack.c.bf16 %v178_v33, %v176_v31  ;;  %v344_v38 = vpack.c.bf16 %v188_v34, %v186_v32 }
  0xb2   :  { %354 = vst [vmem:[%s481_s3 + $0x20] sm:$0xff] %v334_v37  }
  0xb3   :  { %356 = vst [vmem:[%s481_s3 + $0x30] sm:$0xff] %v344_v38  }
  0xb5   :  { %v180_v39 = vpop.f32.mrf.mxu2  ;;  %v190_v40 = vpop.f32.mrf.mxu3 }
  0xb6   :  { %v162_v41 = vpop.f32.mrf.mxu0  ;;  %v172_v42 = vpop.f32.mrf.mxu1  ;;  %v181_v51 = vadd.f32 %v382_v18, %v180_v39  ;;  %v191_v52 = vadd.f32 %v382_v18, %v190_v40 }
  0xb7   :  { %v163_v45 = vadd.f32 %v382_v18, %v162_v41  ;;  %v173_v46 = vadd.f32 %v382_v18, %v172_v42 }
  0xb9   :  { %v319_v47 = vpack.c.bf16 %v163_v45, %v161_v43  ;;  %v329_v48 = vpack.c.bf16 %v173_v46, %v171_v44 }
  0xbb   :  { %351 = vst [vmem:[%s481_s3 + $0x8] sm:$0xff] %v319_v47  }
  0xbc   :  { %353 = vst [vmem:[%s481_s3 + $0x18] sm:$0xff] %v329_v48  }
  0xbd   :  { %v182_v49 = vpop.f32.mrf.mxu2  ;;  %v192_v50 = vpop.f32.mrf.mxu3 }
  0xbe   :  { %v183_v53 = vadd.f32 %v382_v18, %v182_v49  ;;  %v193_v54 = vadd.f32 %v382_v18, %v192_v50 }
  0xc0   :  { %v339_v55 = vpack.c.bf16 %v183_v53, %v181_v51  ;;  %v349_v56 = vpack.c.bf16 %v193_v54, %v191_v52 }
  0xc2   :  { %355 = vst [vmem:[%s481_s3 + $0x28] sm:$0xff] %v339_v55  }
  0xc3   :  { %357 = vst [vmem:[%s481_s3 + $0x38] sm:$0xff] %v349_v56  }

// kernel: conv25_forward.10
= control target key start
LH: loop header
LB: loop body
LE: loop exit
PB: predicated region body
PF: predicated region fallthrough
CT: control target
= control target key end

     0   :  { %s631_s1 = inlined_call_operand.vmem [shape: bf16[128,128], index: 1, kind: input, shape index: {}]   ;;  %s632_s2 = inlined_call_operand.vmem [shape: f32[1,128], index: 2, kind: input, shape index: {}]   ;;  %s633_s0 = inlined_call_operand.vmem [shape: bf16[128,128], index: 0, kind: input, shape index: {}]   ;;  %s634_s3 = inlined_call_operand.vmem [shape: bf16[128,128], index: 3, kind: input, shape index: {}]   ;;  %s635_s4 = inlined_call_operand.vmem [shape: bf16[128,128], index: 4, kind: output, shape index: {}]  }
   0x1   :  { %v377_v0 = vld [vmem:[%s631_s1 + $0x38] sm:$0xff]  ;;  %v376_v1 = vld [vmem:[%s631_s1 + $0x30] sm:$0xff]  ;;  %v375_v2 = vld [vmem:[%s631_s1 + $0x28] sm:$0xff] }
   0x2   :  { %149 = vmatpush.bf16.msra.mxu0 %v377_v0  ;;  %464 = vmatpush.bf16.msra.mxu1 %v377_v0  ;;  %v374_v3 = vld [vmem:[%s631_s1 + $0x20] sm:$0xff]  ;;  %v373_v4 = vld [vmem:[%s631_s1 + $0x18] sm:$0xff]  ;;  %v372_v5 = vld [vmem:[%s631_s1 + $0x10] sm:$0xff] }
   0x3   :  { %465 = vmatpush.bf16.msra.mxu2 %v377_v0  ;;  %466 = vmatpush.bf16.msra.mxu3 %v377_v0  ;;  %v371_v6 = vld [vmem:[%s631_s1 + $0x8] sm:$0xff]  ;;  %v370_v7 = vld [vmem:[%s631_s1] sm:$0xff]  ;;  %v364_v9 = vld [vmem:[%s633_s0 + $0x10] sm:$0xff] }
   0x4   :  { %v362_v8 = vld [vmem:[%s633_s0] sm:$0xff]  ;;  %v368_v11 = vld [vmem:[%s633_s0 + $0x30] sm:$0xff]  ;;  %v363_v12 = vld [vmem:[%s633_s0 + $0x8] sm:$0xff] }
   0x5   :  { %v366_v10 = vld [vmem:[%s633_s0 + $0x20] sm:$0xff]  ;;  %v365_v13 = vld [vmem:[%s633_s0 + $0x18] sm:$0xff]  ;;  %v367_v14 = vld [vmem:[%s633_s0 + $0x28] sm:$0xff] }
   0x6   :  { %150 = vmatpush.bf16.msra.mxu0 %v376_v1  ;;  %467 = vmatpush.bf16.msra.mxu1 %v376_v1  ;;  %v369_v15 = vld [vmem:[%s633_s0 + $0x38] sm:$0xff]  ;;  %v565_v18 = vld [vmem:[%s632_s2] ss:$0 sm:$0xff]  ;;  %v451_v20 = vld [vmem:[%s634_s3 + $0x10] sm:$0xff]  }
   0x7   :  { %468 = vmatpush.bf16.msra.mxu2 %v376_v1  ;;  %469 = vmatpush.bf16.msra.mxu3 %v376_v1  ;;  %v379_v19 = vld [vmem:[%s634_s3] sm:$0xff]   ;;  %v388_v24 = vunpack.c.l.bf16 %v451_v20  ;;  %v389_v28 = vunpack.c.h.bf16 %v451_v20  ;;  %v455_v34 = vld [vmem:[%s634_s3 + $0x30] sm:$0xff]   ;;  %v450_v61 = vld [vmem:[%s634_s3 + $0x8] sm:$0xff]  }
   0x8   :  { %v380_v22 = vunpack.c.l.bf16 %v379_v19  ;;  %v381_v27 = vunpack.c.h.bf16 %v379_v19  ;;  %v453_v33 = vld [vmem:[%s634_s3 + $0x20] sm:$0xff]   ;;  %v404_v42 = vunpack.c.l.bf16 %v455_v34  ;;  %v405_v48 = vunpack.c.h.bf16 %v455_v34  ;;  %v452_v62 = vld [vmem:[%s634_s3 + $0x18] sm:$0xff]  }
   0x9   :  { %v396_v40 = vunpack.c.l.bf16 %v453_v33  ;;  %v397_v47 = vunpack.c.h.bf16 %v453_v33  ;;  %v456_v19 = vld [vmem:[%s634_s3 + $0x38] sm:$0xff]  }
   0xa   :  { %151 = vmatpush.bf16.msra.mxu0 %v375_v2  ;;  %470 = vmatpush.bf16.msra.mxu1 %v375_v2  ;;  %v409_v33 = vunpack.c.h.bf16 %v456_v19 }
   0xb   :  { %471 = vmatpush.bf16.msra.mxu2 %v375_v2  ;;  %472 = vmatpush.bf16.msra.mxu3 %v375_v2 }
   0xe   :  { %152 = vmatpush.bf16.msra.mxu0 %v374_v3  ;;  %473 = vmatpush.bf16.msra.mxu1 %v374_v3 }
   0xf   :  { %474 = vmatpush.bf16.msra.mxu2 %v374_v3  ;;  %475 = vmatpush.bf16.msra.mxu3 %v374_v3 }
  0x12   :  { %153 = vmatpush.bf16.msra.mxu0 %v373_v4  ;;  %476 = vmatpush.bf16.msra.mxu1 %v373_v4 }
  0x13   :  { %477 = vmatpush.bf16.msra.mxu2 %v373_v4  ;;  %478 = vmatpush.bf16.msra.mxu3 %v373_v4  ;;  %v384_v4 = vunpack.c.l.bf16 %v450_v61 }
  0x16   :  { %154 = vmatpush.bf16.msra.mxu0 %v372_v5  ;;  %479 = vmatpush.bf16.msra.mxu1 %v372_v5 }
  0x17   :  { %480 = vmatpush.bf16.msra.mxu2 %v372_v5  ;;  %481 = vmatpush.bf16.msra.mxu3 %v372_v5 }
  0x1a   :  { %155 = vmatpush.bf16.msra.mxu0 %v371_v6  ;;  %482 = vmatpush.bf16.msra.mxu1 %v371_v6 }
  0x1b   :  { %483 = vmatpush.bf16.msra.mxu2 %v371_v6  ;;  %484 = vmatpush.bf16.msra.mxu3 %v371_v6  ;;  %v392_v6 = vunpack.c.l.bf16 %v452_v62 }
  0x1e   :  { %156 = vmatpush.bf16.msra.mxu0 %v370_v7  ;;  %485 = vmatpush.bf16.msra.mxu1 %v370_v7 }
  0x1f   :  { %486 = vmatpush.bf16.msra.mxu2 %v370_v7  ;;  %487 = vmatpush.bf16.msra.mxu3 %v370_v7 }
  0x21   :  { %157 = vmatmul.bf16.vlgmr.msra.gmra.mxu0 %v362_v8  ;;  %167 = vmatmul.bf16.vlgmr.msra.gmra.mxu1 %v364_v9 }
  0x22   :  { %177 = vmatmul.bf16.vlgmr.msra.gmra.mxu2 %v366_v10  ;;  %187 = vmatmul.bf16.vlgmr.msra.gmra.mxu3 %v368_v11  ;;  %v385_v11 = vunpack.c.h.bf16 %v450_v61 }
  0x31   :  { %162 = vmatmul.bf16.gmra.mxu0 %v363_v12  ;;  %172 = vmatmul.bf16.gmra.mxu1 %v365_v13  ;;  %v393_v12 = vunpack.c.h.bf16 %v452_v62 }
  0x32   :  { %182 = vmatmul.bf16.gmra.mxu2 %v367_v14  ;;  %192 = vmatmul.bf16.gmra.mxu3 %v369_v15 }
  0x9e   :  { %v158_v16 = vpop.f32.mrf.mxu0  ;;  %v168_v17 = vpop.f32.mrf.mxu1 }
  0x9f   :  { %v159_v21 = vadd.f32 %v565_v18, %v158_v16  ;;  %v169_v23 = vadd.f32 %v565_v18, %v168_v17  ;;  %v454_v17 = vld [vmem:[%s634_s3 + $0x28] sm:$0xff]  }
  0xa1   :  { %v230_v31 = vadd.f32 %v380_v22, %v159_v21  ;;  %v234_v32 = vadd.f32 %v388_v24, %v169_v23 }
  0xa3   :  { %v246_v43 = vmax.f32 %v230_v31, 0.0  ;;  %v250_v44 = vmax.f32 %v234_v32, 0.0  ;;  %v401_v32 = vunpack.c.h.bf16 %v454_v17 }
  0xa5   :  { %v178_v25 = vpop.f32.mrf.mxu2  ;;  %v188_v26 = vpop.f32.mrf.mxu3 }
  0xa6   :  { %v160_v29 = vpop.f32.mrf.mxu0  ;;  %v170_v30 = vpop.f32.mrf.mxu1  ;;  %v179_v39 = vadd.f32 %v565_v18, %v178_v25  ;;  %v189_v41 = vadd.f32 %v565_v18, %v188_v26  ;;  %v400_v25 = vunpack.c.l.bf16 %v454_v17 }
  0xa7   :  { %v161_v35 = vadd.f32 %v565_v18, %v160_v29  ;;  %v171_v36 = vadd.f32 %v565_v18, %v170_v30 }
  0xa8   :  { %v238_v53 = vadd.f32 %v396_v40, %v179_v39  ;;  %v242_v54 = vadd.f32 %v404_v42, %v189_v41 }
  0xa9   :  { %v231_v37 = vadd.f32 %v381_v27, %v161_v35  ;;  %v235_v38 = vadd.f32 %v389_v28, %v171_v36  ;;  %v408_v27 = vunpack.c.l.bf16 %v456_v19 }
  0xaa   :  { %v254_v63 = vmax.f32 %v238_v53, 0.0  ;;  %v258_v0 = vmax.f32 %v242_v54, 0.0 }
  0xab   :  { %v247_v45 = vmax.f32 %v231_v37, 0.0  ;;  %v251_v46 = vmax.f32 %v235_v38, 0.0 }
  0xad   :  { %v413_v49 = vpack.c.bf16 %v247_v45, %v246_v43  ;;  %v423_v50 = vpack.c.bf16 %v251_v46, %v250_v44  ;;  %v180_v51 = vpop.f32.mrf.mxu2  ;;  %v190_v52 = vpop.f32.mrf.mxu3 }
  0xae   :  { %v181_v55 = vadd.f32 %v565_v18, %v180_v51  ;;  %v191_v56 = vadd.f32 %v565_v18, %v190_v52  ;;  %v163_v57 = vpop.f32.mrf.mxu0  ;;  %v173_v58 = vpop.f32.mrf.mxu1 }
  0xaf   :  { %414 = vst [vmem:[%s635_s4] sm:$0xff] %v413_v49   ;;  %v164_v3 = vadd.f32 %v565_v18, %v163_v57  ;;  %v174_v5 = vadd.f32 %v565_v18, %v173_v58 }
  0xb0   :  { %458 = vst [vmem:[%s635_s4 + $0x10] sm:$0xff] %v423_v50   ;;  %v239_v59 = vadd.f32 %v397_v47, %v181_v55  ;;  %v243_v60 = vadd.f32 %v405_v48, %v191_v56 }
  0xb1   :  { %v232_v15 = vadd.f32 %v384_v4, %v164_v3  ;;  %v236_v16 = vadd.f32 %v392_v6, %v174_v5 }
  0xb2   :  { %v255_v1 = vmax.f32 %v239_v59, 0.0  ;;  %v259_v2 = vmax.f32 %v243_v60, 0.0 }
  0xb3   :  { %v248_v28 = vmax.f32 %v232_v15, 0.0  ;;  %v252_v29 = vmax.f32 %v236_v16, 0.0 }
  0xb4   :  { %v433_v7 = vpack.c.bf16 %v255_v1, %v254_v63  ;;  %v443_v8 = vpack.c.bf16 %v259_v2, %v258_v0 }
  0xb5   :  { %v183_v9 = vpop.f32.mrf.mxu2  ;;  %v193_v10 = vpop.f32.mrf.mxu3 }
  0xb6   :  { %460 = vst [vmem:[%s635_s4 + $0x20] sm:$0xff] %v433_v7   ;;  %v165_v13 = vpop.f32.mrf.mxu0  ;;  %v175_v14 = vpop.f32.mrf.mxu1  ;;  %v184_v24 = vadd.f32 %v565_v18, %v183_v9  ;;  %v194_v26 = vadd.f32 %v565_v18, %v193_v10 }
  0xb7   :  { %462 = vst [vmem:[%s635_s4 + $0x30] sm:$0xff] %v443_v8   ;;  %v166_v20 = vadd.f32 %v565_v18, %v165_v13  ;;  %v176_v21 = vadd.f32 %v565_v18, %v175_v14 }
  0xb8   :  { %v240_v38 = vadd.f32 %v400_v25, %v184_v24  ;;  %v244_v39 = vadd.f32 %v408_v27, %v194_v26 }
  0xb9   :  { %v233_v22 = vadd.f32 %v385_v11, %v166_v20  ;;  %v237_v23 = vadd.f32 %v393_v12, %v176_v21 }
  0xba   :  { %v256_v44 = vmax.f32 %v240_v38, 0.0  ;;  %v260_v45 = vmax.f32 %v244_v39, 0.0 }
  0xbb   :  { %v249_v30 = vmax.f32 %v233_v22, 0.0  ;;  %v253_v31 = vmax.f32 %v237_v23, 0.0 }
  0xbd   :  { %v418_v34 = vpack.c.bf16 %v249_v30, %v248_v28  ;;  %v428_v35 = vpack.c.bf16 %v253_v31, %v252_v29  ;;  %v185_v36 = vpop.f32.mrf.mxu2  ;;  %v195_v37 = vpop.f32.mrf.mxu3 }
  0xbe   :  { %v186_v40 = vadd.f32 %v565_v18, %v185_v36  ;;  %v196_v41 = vadd.f32 %v565_v18, %v195_v37 }
  0xbf   :  { %457 = vst [vmem:[%s635_s4 + $0x8] sm:$0xff] %v418_v34  }
  0xc0   :  { %459 = vst [vmem:[%s635_s4 + $0x18] sm:$0xff] %v428_v35   ;;  %v241_v42 = vadd.f32 %v401_v32, %v186_v40  ;;  %v245_v43 = vadd.f32 %v409_v33, %v196_v41 }
  0xc2   :  { %v257_v46 = vmax.f32 %v241_v42, 0.0  ;;  %v261_v47 = vmax.f32 %v245_v43, 0.0 }
  0xc4   :  { %v438_v48 = vpack.c.bf16 %v257_v46, %v256_v44  ;;  %v448_v49 = vpack.c.bf16 %v261_v47, %v260_v45 }
  0xc6   :  { %461 = vst [vmem:[%s635_s4 + $0x28] sm:$0xff] %v438_v48  }
  0xc7   :  { %463 = vst [vmem:[%s635_s4 + $0x38] sm:$0xff] %v448_v49  }

// kernel: conv25_forward.11
= control target key start
LH: loop header
LB: loop body
LE: loop exit
PB: predicated region body
PF: predicated region fallthrough
CT: control target
= control target key end

     0   :  { %s494_s1 = inlined_call_operand.vmem [shape: bf16[128,128], index: 1, kind: input, shape index: {}]   ;;  %s495_s2 = inlined_call_operand.vmem [shape: f32[1,128], index: 2, kind: input, shape index: {}]   ;;  %s496_s0 = inlined_call_operand.vmem [shape: bf16[128,128], index: 0, kind: input, shape index: {}]   ;;  %s497_s3 = inlined_call_operand.vmem [shape: bf16[128,128], index: 3, kind: output, shape index: {}]  }
   0x1   :  { %v326_v0 = vld [vmem:[%s494_s1 + $0x38] sm:$0xff]  ;;  %v325_v1 = vld [vmem:[%s494_s1 + $0x30] sm:$0xff]  ;;  %v324_v2 = vld [vmem:[%s494_s1 + $0x28] sm:$0xff] }
   0x2   :  { %146 = vmatpush.bf16.msra.mxu0 %v326_v0  ;;  %374 = vmatpush.bf16.msra.mxu1 %v326_v0  ;;  %v323_v3 = vld [vmem:[%s494_s1 + $0x20] sm:$0xff]  ;;  %v322_v4 = vld [vmem:[%s494_s1 + $0x18] sm:$0xff]  ;;  %v321_v5 = vld [vmem:[%s494_s1 + $0x10] sm:$0xff] }
   0x3   :  { %375 = vmatpush.bf16.msra.mxu2 %v326_v0  ;;  %376 = vmatpush.bf16.msra.mxu3 %v326_v0  ;;  %v320_v6 = vld [vmem:[%s494_s1 + $0x8] sm:$0xff]  ;;  %v319_v7 = vld [vmem:[%s494_s1] sm:$0xff]  ;;  %v313_v9 = vld [vmem:[%s496_s0 + $0x10] sm:$0xff] }
   0x4   :  { %v311_v8 = vld [vmem:[%s496_s0] sm:$0xff]  ;;  %v317_v11 = vld [vmem:[%s496_s0 + $0x30] sm:$0xff]  ;;  %v312_v12 = vld [vmem:[%s496_s0 + $0x8] sm:$0xff] }
   0x5   :  { %v315_v10 = vld [vmem:[%s496_s0 + $0x20] sm:$0xff]  ;;  %v314_v13 = vld [vmem:[%s496_s0 + $0x18] sm:$0xff]  ;;  %v316_v14 = vld [vmem:[%s496_s0 + $0x28] sm:$0xff] }
   0x6   :  { %147 = vmatpush.bf16.msra.mxu0 %v325_v1  ;;  %377 = vmatpush.bf16.msra.mxu1 %v325_v1  ;;  %v318_v15 = vld [vmem:[%s496_s0 + $0x38] sm:$0xff]  ;;  %v398_v18 = vld [vmem:[%s495_s2] ss:$0 sm:$0xff] }
   0x7   :  { %378 = vmatpush.bf16.msra.mxu2 %v325_v1  ;;  %379 = vmatpush.bf16.msra.mxu3 %v325_v1 }
   0xa   :  { %148 = vmatpush.bf16.msra.mxu0 %v324_v2  ;;  %380 = vmatpush.bf16.msra.mxu1 %v324_v2 }
   0xb   :  { %381 = vmatpush.bf16.msra.mxu2 %v324_v2  ;;  %382 = vmatpush.bf16.msra.mxu3 %v324_v2 }
   0xe   :  { %149 = vmatpush.bf16.msra.mxu0 %v323_v3  ;;  %383 = vmatpush.bf16.msra.mxu1 %v323_v3 }
   0xf   :  { %384 = vmatpush.bf16.msra.mxu2 %v323_v3  ;;  %385 = vmatpush.bf16.msra.mxu3 %v323_v3 }
  0x12   :  { %150 = vmatpush.bf16.msra.mxu0 %v322_v4  ;;  %386 = vmatpush.bf16.msra.mxu1 %v322_v4 }
  0x13   :  { %387 = vmatpush.bf16.msra.mxu2 %v322_v4  ;;  %388 = vmatpush.bf16.msra.mxu3 %v322_v4 }
  0x16   :  { %151 = vmatpush.bf16.msra.mxu0 %v321_v5  ;;  %389 = vmatpush.bf16.msra.mxu1 %v321_v5 }
  0x17   :  { %390 = vmatpush.bf16.msra.mxu2 %v321_v5  ;;  %391 = vmatpush.bf16.msra.mxu3 %v321_v5 }
  0x1a   :  { %152 = vmatpush.bf16.msra.mxu0 %v320_v6  ;;  %392 = vmatpush.bf16.msra.mxu1 %v320_v6 }
  0x1b   :  { %393 = vmatpush.bf16.msra.mxu2 %v320_v6  ;;  %394 = vmatpush.bf16.msra.mxu3 %v320_v6 }
  0x1e   :  { %153 = vmatpush.bf16.msra.mxu0 %v319_v7  ;;  %395 = vmatpush.bf16.msra.mxu1 %v319_v7 }
  0x1f   :  { %396 = vmatpush.bf16.msra.mxu2 %v319_v7  ;;  %397 = vmatpush.bf16.msra.mxu3 %v319_v7 }
  0x21   :  { %154 = vmatmul.bf16.vlgmr.msra.gmra.mxu0 %v311_v8  ;;  %164 = vmatmul.bf16.vlgmr.msra.gmra.mxu1 %v313_v9 }
  0x22   :  { %174 = vmatmul.bf16.vlgmr.msra.gmra.mxu2 %v315_v10  ;;  %184 = vmatmul.bf16.vlgmr.msra.gmra.mxu3 %v317_v11 }
  0x31   :  { %159 = vmatmul.bf16.gmra.mxu0 %v312_v12  ;;  %169 = vmatmul.bf16.gmra.mxu1 %v314_v13 }
  0x32   :  { %179 = vmatmul.bf16.gmra.mxu2 %v316_v14  ;;  %189 = vmatmul.bf16.gmra.mxu3 %v318_v15 }
  0x9e   :  { %v155_v16 = vpop.f32.mrf.mxu0  ;;  %v165_v17 = vpop.f32.mrf.mxu1 }
  0x9f   :  { %v156_v19 = vadd.f32 %v398_v18, %v155_v16  ;;  %v166_v20 = vadd.f32 %v398_v18, %v165_v17 }
  0xa1   :  { %v195_v27 = vmax.f32 %v156_v19, 0.0  ;;  %v199_v28 = vmax.f32 %v166_v20, 0.0 }
  0xa5   :  { %v175_v21 = vpop.f32.mrf.mxu2  ;;  %v185_v22 = vpop.f32.mrf.mxu3 }
  0xa6   :  { %v157_v23 = vpop.f32.mrf.mxu0  ;;  %v167_v24 = vpop.f32.mrf.mxu1  ;;  %v176_v33 = vadd.f32 %v398_v18, %v175_v21  ;;  %v186_v34 = vadd.f32 %v398_v18, %v185_v22 }
  0xa7   :  { %v158_v25 = vadd.f32 %v398_v18, %v157_v23  ;;  %v168_v26 = vadd.f32 %v398_v18, %v167_v24 }
  0xa8   :  { %v203_v41 = vmax.f32 %v176_v33, 0.0  ;;  %v207_v42 = vmax.f32 %v186_v34, 0.0 }
  0xa9   :  { %v196_v29 = vmax.f32 %v158_v25, 0.0  ;;  %v200_v30 = vmax.f32 %v168_v26, 0.0 }
  0xab   :  { %v330_v31 = vpack.c.bf16 %v196_v29, %v195_v27  ;;  %v340_v32 = vpack.c.bf16 %v200_v30, %v199_v28 }
  0xad   :  { %331 = vst [vmem:[%s497_s3] sm:$0xff] %v330_v31   ;;  %v177_v35 = vpop.f32.mrf.mxu2  ;;  %v187_v36 = vpop.f32.mrf.mxu3 }
  0xae   :  { %368 = vst [vmem:[%s497_s3 + $0x10] sm:$0xff] %v340_v32   ;;  %v178_v37 = vadd.f32 %v398_v18, %v177_v35  ;;  %v188_v38 = vadd.f32 %v398_v18, %v187_v36  ;;  %v160_v39 = vpop.f32.mrf.mxu0  ;;  %v170_v40 = vpop.f32.mrf.mxu1 }
  0xaf   :  { %v161_v47 = vadd.f32 %v398_v18, %v160_v39  ;;  %v171_v48 = vadd.f32 %v398_v18, %v170_v40 }
  0xb0   :  { %v204_v43 = vmax.f32 %v178_v37, 0.0  ;;  %v208_v44 = vmax.f32 %v188_v38, 0.0 }
  0xb1   :  { %v197_v55 = vmax.f32 %v161_v47, 0.0  ;;  %v201_v56 = vmax.f32 %v171_v48, 0.0 }
  0xb2   :  { %v350_v45 = vpack.c.bf16 %v204_v43, %v203_v41  ;;  %v360_v46 = vpack.c.bf16 %v208_v44, %v207_v42 }
  0xb4   :  { %370 = vst [vmem:[%s497_s3 + $0x20] sm:$0xff] %v350_v45  }
  0xb5   :  { %372 = vst [vmem:[%s497_s3 + $0x30] sm:$0xff] %v360_v46   ;;  %v180_v49 = vpop.f32.mrf.mxu2  ;;  %v190_v50 = vpop.f32.mrf.mxu3 }
  0xb6   :  { %v162_v51 = vpop.f32.mrf.mxu0  ;;  %v172_v52 = vpop.f32.mrf.mxu1  ;;  %v181_v61 = vadd.f32 %v398_v18, %v180_v49  ;;  %v191_v62 = vadd.f32 %v398_v18, %v190_v50 }
  0xb7   :  { %v163_v53 = vadd.f32 %v398_v18, %v162_v51  ;;  %v173_v54 = vadd.f32 %v398_v18, %v172_v52 }
  0xb8   :  { %v205_v3 = vmax.f32 %v181_v61, 0.0  ;;  %v209_v4 = vmax.f32 %v191_v62, 0.0 }
  0xb9   :  { %v198_v57 = vmax.f32 %v163_v53, 0.0  ;;  %v202_v58 = vmax.f32 %v173_v54, 0.0 }
  0xbb   :  { %v335_v59 = vpack.c.bf16 %v198_v57, %v197_v55  ;;  %v345_v60 = vpack.c.bf16 %v202_v58, %v201_v56 }
  0xbd   :  { %367 = vst [vmem:[%s497_s3 + $0x8] sm:$0xff] %v335_v59   ;;  %v182_v63 = vpop.f32.mrf.mxu2  ;;  %v192_v0 = vpop.f32.mrf.mxu3 }
  0xbe   :  { %369 = vst [vmem:[%s497_s3 + $0x18] sm:$0xff] %v345_v60   ;;  %v183_v1 = vadd.f32 %v398_v18, %v182_v63  ;;  %v193_v2 = vadd.f32 %v398_v18, %v192_v0 }
  0xc0   :  { %v206_v5 = vmax.f32 %v183_v1, 0.0  ;;  %v210_v6 = vmax.f32 %v193_v2, 0.0 }
  0xc2   :  { %v355_v7 = vpack.c.bf16 %v206_v5, %v205_v3  ;;  %v365_v8 = vpack.c.bf16 %v210_v6, %v209_v4 }
  0xc4   :  { %371 = vst [vmem:[%s497_s3 + $0x28] sm:$0xff] %v355_v7  }
  0xc5   :  { %373 = vst [vmem:[%s497_s3 + $0x38] sm:$0xff] %v365_v8  }

// kernel: conv25_forward.12
= control target key start
LH: loop header
LB: loop body
LE: loop exit
PB: predicated region body
PF: predicated region fallthrough
CT: control target
= control target key end

     0   :  { %s2406_s12 = smov 0   ;;  %s2408_s13 = smov 0   ;;  %s2921_s0 = inlined_call_operand.vmem [shape: bf16[2,1,110,128], index: 0, kind: input, shape index: {}]   ;;  %s2922_s1 = inlined_call_operand.vmem [shape: bf16[9,128,128], index: 1, kind: input, shape index: {}]   ;;  %s2923_s2 = inlined_call_operand.vmem [shape: f32[1,128], index: 2, kind: input, shape index: {}]   ;;  %s2924_s3 = inlined_call_operand.vmem [shape: bf16[2,80,128], index: 3, kind: output, shape index: {}]  }
   0x1   :  { %s2410_s14 = smov 0  }
   0x2 LB: > { %s25_s15 = sadd.s32 1, %s2380_s13  ;;  %p1730_p0 = scmp.ge.s32.totalorder %s2384_s14, 1  ;;  %s2384_s14 = sphi %s2410_s14, %s13_s14   ;;  %s2380_s13 = sphi %s2408_s13, %s2926_s13   ;;  %s2376_s12 = sphi %s2406_s12, %s2925_s12  }
   0x3   : > { %p27_p1 = scmp.ge.s32.totalorder %s25_s15, 2  ;;  %p168_p2 = scmp.lt.s32.totalorder %s2384_s14, 3 }
   0x5   : > { %s2928_s15 = smov (%p27_p1, %s25_s15), 0  ;;  %p169_p3 = pnand %p1730_p0, %p168_p2 }
   0x6   : > { %p202_p4 = scmp.lt.s32.totalorder (!%p169_p3), %s2376_s12, 1 }
   0x7   : > { %172 = sbr.rel (%p169_p3) target bundleno = 376 (0x178), region = 32 }
   0xc   : > { %v2218_v0 = vld [vmem:[%s2922_s1 + $0x78] sm:$0xff]  ;;  %v2217_v1 = vld [vmem:[%s2922_s1 + $0x70] sm:$0xff]  ;;  %s2930_s12 = smov (!%p202_p4, %s2376_s12), 1  ;;  %v2216_v4 = vld [vmem:[%s2922_s1 + $0x68] sm:$0xff]  ;;  %vm294_vm0 = vsmask.f32 7424 }
   0xd   : > { %392 = vmatpush.bf16.msra.mxu0 %v2218_v0  ;;  %2319 = vmatpush.bf16.msra.mxu1 %v2218_v0  ;;  %v2238_v2 = vld [vmem:[%s2922_s1 + $0xf8] sm:$0xff]  ;;  %v2237_v3 = vld [vmem:[%s2922_s1 + $0xf0] sm:$0xff]  ;;  %s2335_s26 = smul.u32 56, %s2930_s12  ;;  %v2236_v5 = vld [vmem:[%s2922_s1 + $0xe8] sm:$0xff]  ;;  %vm534_vm1 = vcmask 1046528   ;;  %vm1000_vm4 = vcmask 1045504  }
   0xe   : > { %2320 = vmatpush.bf16.msra.mxu2 %v2218_v0  ;;  %763 = vmatpush.bf16.msra.mxu3 %v2238_v2  ;;  %v2215_v6 = vld [vmem:[%s2922_s1 + $0x60] sm:$0xff]  ;;  %v2214_v9 = vld [vmem:[%s2922_s1 + $0x58] sm:$0xff]  ;;  %v2213_v17 = vld [vmem:[%s2922_s1 + $0x50] sm:$0xff]  ;;  %vm828_vm2 = vsmask.f32 6400  ;;  %vm1466_vm5 = vcmask 1044480  }
   0xf   : > { %s2451_s6 = scalar_lea.vmem %s2921_s0, %s2335_s26  ;;  %v2235_v7 = vld [vmem:[%s2922_s1 + $0xe0] sm:$0xff]  ;;  %v2234_v14 = vld [vmem:[%s2922_s1 + $0xd8] sm:$0xff]  ;;  %v2233_v24 = vld [vmem:[%s2922_s1 + $0xd0] sm:$0xff]  ;;  %vm1294_vm3 = vsmask.f32 5376  ;;  %s2336_s5 = smul.u32 40, %s2930_s12 }
  0x10   : > { %v248_v8 = vld [vmem:[%s2451_s6 + $0x28] sm:$0x1]  ;;  %v2461_v10 = vld [vmem:[%s2451_s6] sm:$0xff]   ;;  %v2464_v11 = vld [vmem:[%s2451_s6 + $0x10] sm:$0xff] }
  0x11   : > { %393 = vmatpush.bf16.msra.mxu0 %v2217_v1  ;;  %2321 = vmatpush.bf16.msra.mxu1 %v2217_v1  ;;  %v2467_v12 = vld [vmem:[%s2451_s6 + $0x20] sm:$0xff]  ;;  %v287_v13 = vunpack.c.l.b16 %v248_v8  ;;  %v2473_v15 = vld [vmem:[%s2451_s6 + $0x8] sm:$0xff]  ;;  %v298_v16 = vshll.u32 %v2461_v10, 16  ;;  %v2480_v18 = vld [vmem:[%s2451_s6 + $0x18] sm:$0xff]  ;;  %v311_v19 = vshll.u32 %v2464_v11, 16  ;;  %v296_v25 = vshrl.u32 %v2461_v10, 16  ;;  %s2890_s9 = scalar_lea.vmem %s2924_s3, %s2336_s5 }
  0x12   : > { %2322 = vmatpush.bf16.msra.mxu2 %v2217_v1  ;;  %764 = vmatpush.bf16.msra.mxu3 %v2237_v3  ;;  %v327_v21 = vshll.u32 %v2467_v12, 16  ;;  %v643_v22 = vld [vmem:[%s2451_s6 + $0x4] sm:$0xe]  ;;  %v2488_v23 = vld [vmem:[%s2451_s6 + $0x8] sm:$0xff]   ;;  %v303_v27 = vshll.u32 %v2473_v15, 16  ;;  %v315_v28 = vshrl.u32 %v2464_v11, 16 }
  0x13   : > { %v2483_v20 = vpack.c.b16 %v287_v13, %v287_v13  ;;  %v300_v26 = vrot.slane %v298_v16, 1  ;;  %v2212_v29 = vld [vmem:[%s2922_s1 + $0x48] sm:$0xff]  ;;  %v2499_v30 = vrot.slane %v311_v19, 1  ;;  %v319_v31 = vshll.u32 %v2480_v18, 16  ;;  %v2211_v39 = vld [vmem:[%s2922_s1 + $0x40] sm:$0xff]  ;;  %v2210_v45 = vld [vmem:[%s2922_s1 + $0x38] sm:$0xff] }
  0x14   : > { %v682_v32 = vunpack.c.l.b16 %v643_v22  ;;  %v683_v33 = vunpack.c.l.b16 %v2488_v23  ;;  %v2503_v34 = vrot.slane %v327_v21, 1  ;;  %v331_v35 = vshrl.u32 %v2467_v12, 16  ;;  %v2232_v37 = vld [vmem:[%s2922_s1 + $0xc8] sm:$0xff]  ;;  %v2226_v48 = vld [vmem:[%s2922_s1 + $0xb8] sm:$0xff]  ;;  %v2231_v52 = vld [vmem:[%s2922_s1 + $0xc0] sm:$0xff] }
  0x15   : > { %394 = vmatpush.bf16.msra.mxu0 %v2216_v4  ;;  %2323 = vmatpush.bf16.msra.mxu1 %v2216_v4  ;;  %v335_v36 = vshll.u32 %v2483_v20, 16  ;;  %v305_v38 = vrot.slane %v303_v27, 1  ;;  %v301_v40 = vor.u32 %v300_v26, %v296_v25  ;;  %v317_v41 = vor.u32 %v315_v28, %v2499_v30  ;;  %v2515_v43 = vld [vmem:[%s2451_s6 + $0xc] sm:$0xff]  ;;  %v2246_v49 = vld [vmem:[%s2922_s1 + $0x138] sm:$0xff]  ;;  %v2207_v3 = vld [vmem:[%s2922_s1 + $0x20] sm:$0xff] }
  0x16   : > { %2324 = vmatpush.bf16.msra.mxu2 %v2216_v4  ;;  %765 = vmatpush.bf16.msra.mxu3 %v2236_v5  ;;  %v321_v42 = vrot.slane %v319_v31, 1  ;;  %v2519_v44 = vpack.c.b16 %v683_v33, %v682_v32  ;;  %v333_v46 = vor.u32 %v331_v35, %v2503_v34  ;;  %v700_v54 = vrot.slane %v2515_v43, 1  ;;  %v2209_v56 = vld [vmem:[%s2922_s1 + $0x30] sm:$0xff]  ;;  %v2274_v57 = vld [vmem:[%s2922_s1 + $0x1f8] sm:$0xff]  ;;  %v2208_v61 = vld [vmem:[%s2922_s1 + $0x28] sm:$0xff] }
  0x17   : > { %v337_v47 = vrot.slane %v335_v36, 1  ;;  %v306_v50 = vsel %vm294_vm0, %v301_v40, %v305_v38  ;;  %v2225_v58 = vld [vmem:[%s2922_s1 + $0xb0] sm:$0xff]  ;;  %v2224_v63 = vld [vmem:[%s2922_s1 + $0xa8] sm:$0xff]  ;;  %v307_v1 = vshrl.u32 %v2473_v15, 16  ;;  %v323_v2 = vshrl.u32 %v2480_v18, 16  ;;  %v2223_v4 = vld [vmem:[%s2922_s1 + $0xa0] sm:$0xff] }
  0x18   : > { %v322_v51 = vsel %vm294_vm0, %v317_v41, %v321_v42  ;;  %v699_v53 = vrot.slane %v2519_v44, 1  ;;  %v2245_v59 = vld [vmem:[%s2922_s1 + $0x130] sm:$0xff]  ;;  %v2244_v0 = vld [vmem:[%s2922_s1 + $0x128] sm:$0xff]  ;;  %v2243_v5 = vld [vmem:[%s2922_s1 + $0x120] sm:$0xff]  ;;  %v830_v27 = vshrl.u32 %v2519_v44, 16  ;;  %v841_v31 = vshll.u32 %v2515_v43, 16 }
  0x19   : > { %395 = vmatpush.bf16.msra.mxu0 %v2215_v6  ;;  %2325 = vmatpush.bf16.msra.mxu1 %v2215_v6  ;;  %v338_v55 = vsel %vm294_vm0, %v333_v46, %v337_v47  ;;  %v2273_v62 = vld [vmem:[%s2922_s1 + $0x1f0] sm:$0xff]  ;;  %v2222_v13 = vld [vmem:[%s2922_s1 + $0x98] sm:$0xff]  ;;  %v2312_v25 = vld [vmem:[%s2451_s6] sm:$0xf0]  ;;  %v536_v46 = vrot.slane %v2473_v15, 1 }
  0x1a   : > { %2326 = vmatpush.bf16.msra.mxu2 %v2215_v6  ;;  %766 = vmatpush.bf16.msra.mxu3 %v2235_v7  ;;  %v701_v60 = vsel %vm534_vm1, %v699_v53, %v700_v54  ;;  %v309_v6 = vor.u32 %v307_v1, %v305_v38  ;;  %v325_v7 = vor.u32 %v323_v2, %v321_v42  ;;  %v2576_v8 = vld [vmem:[%s2451_s6 + $0x14] sm:$0xff]  ;;  %v2313_v26 = vld [vmem:[%s2451_s6] sm:$0xe]  ;;  %v2272_v28 = vld [vmem:[%s2922_s1 + $0x1e8] sm:$0xff]  ;;  %v832_v38 = vrot.slane %v830_v27, 1 }
  0x1b   : > { %v702_v19 = vrot.slane %v2576_v8, 1  ;;  %v2205_v21 = vld [vmem:[%s2922_s1 + $0x10] sm:$0xff]  ;;  %v2220_v35 = vld [vmem:[%s2922_s1 + $0x88] sm:$0xff]  ;;  %v843_v41 = vrot.slane %v841_v31, 2  ;;  %v2203_v42 = vld [vmem:[%s2922_s1] sm:$0xff] }
  0x1c   : > { %v314_v16 = vsel %vm294_vm0, %v309_v6, %v2499_v30  ;;  %v2221_v22 = vld [vmem:[%s2922_s1 + $0x90] sm:$0xff]  ;;  %v838_v30 = vshrl.u32 %v2515_v43, 16  ;;  %v2240_v36 = vld [vmem:[%s2922_s1 + $0x108] sm:$0xff]  ;;  %v2239_v47 = vld [vmem:[%s2922_s1 + $0x100] sm:$0xff] }
  0x1d   : > { %396 = vmatpush.bf16.msra.mxu0 %v2214_v9  ;;  %2327 = vmatpush.bf16.msra.mxu1 %v2214_v9  ;;  %v703_v32 = vsel %vm534_vm1, %v700_v54, %v702_v19  ;;  %v2642_v53 = vld [vmem:[%s2451_s6 + $0x1c] sm:$0xff]  ;;  %v2249_v27 = vld [vmem:[%s2922_s1 + $0x150] sm:$0xff] }
  0x1e   : > { %2328 = vmatpush.bf16.msra.mxu2 %v2214_v9  ;;  %767 = vmatpush.bf16.msra.mxu3 %v2234_v14  ;;  %v2206_v9 = vld [vmem:[%s2922_s1 + $0x18] sm:$0xff]  ;;  %v840_v40 = vrot.slane %v838_v30, 1  ;;  %v2251_v6 = vld [vmem:[%s2922_s1 + $0x160] sm:$0xff]  ;;  %v2277_v31 = vld [vmem:[%s2922_s1 + $0x210] sm:$0xff] }
  0x1f   : > { %v2242_v14 = vld [vmem:[%s2922_s1 + $0x118] sm:$0xff] }
  0x20   : > { %v2270_v2 = vld [vmem:[%s2922_s1 + $0x1d8] sm:$0xff] }
  0x21   : > { %397 = vmatpush.bf16.msra.mxu0 %v2213_v17  ;;  %2329 = vmatpush.bf16.msra.mxu1 %v2213_v17 }
  0x22   : > { %2330 = vmatpush.bf16.msra.mxu2 %v2213_v17  ;;  %768 = vmatpush.bf16.msra.mxu3 %v2233_v24  ;;  %v330_v17 = vsel %vm294_vm0, %v325_v7, %v2503_v34  ;;  %v2241_v24 = vld [vmem:[%s2922_s1 + $0x110] sm:$0xff]  ;;  %v2204_v34 = vld [vmem:[%s2922_s1 + $0x8] sm:$0xff]  ;;  %v2279_v7 = vld [vmem:[%s2922_s1 + $0x220] sm:$0xff] }
  0x25   : > { %398 = vmatpush.bf16.msra.mxu0 %v2212_v29  ;;  %2331 = vmatpush.bf16.msra.mxu1 %v2212_v29 }
  0x26   : > { %2332 = vmatpush.bf16.msra.mxu2 %v2212_v29  ;;  %769 = vmatpush.bf16.msra.mxu3 %v2232_v37  ;;  %v833_v29 = vshll.u32 %v2519_v44, 16  ;;  %v2314_v37 = vor.u32 %v2313_v26, %v2312_v25  ;;  %v2219_v44 = vld [vmem:[%s2922_s1 + $0x80] sm:$0xff]  ;;  %v2278_v25 = vld [vmem:[%s2922_s1 + $0x218] sm:$0xff]  ;;  %v2269_v26 = vld [vmem:[%s2922_s1 + $0x1d0] sm:$0xff] }
  0x29   : > { %399 = vmatpush.bf16.msra.mxu0 %v2211_v39  ;;  %2333 = vmatpush.bf16.msra.mxu1 %v2211_v39 }
  0x2a   : > { %2334 = vmatpush.bf16.msra.mxu2 %v2211_v39  ;;  %770 = vmatpush.bf16.msra.mxu3 %v2231_v52  ;;  %v835_v39 = vrot.slane %v833_v29, 2  ;;  %v2282_v52 = vld [vmem:[%s2922_s1 + $0x238] sm:$0xff]  ;;  %v859_v29 = vshll.u32 %v2642_v53, 16 }
  0x2c   : > { %400 = vmatmul.bf16.vlgmr.msra.gmra.mxu0 %v306_v50  ;;  %410 = vmatmul.bf16.vlgmr.msra.gmra.mxu1 %v322_v51  ;;  %v836_v50 = vor.u32 %v835_v39, %v832_v38  ;;  %v844_v51 = vor.u32 %v843_v41, %v840_v40  ;;  %v540_v38 = vrot.slane %v2480_v18, 1 }
  0x2d   : > { %479 = vmatpush.bf16.msrb.mxu1 %v2210_v45  ;;  %935 = vmatpush.bf16.msrb.mxu0 %v2246_v49  ;;  %v535_v45 = vrot.slane %v2314_v37, 1  ;;  %v2254_v49 = vld [vmem:[%s2922_s1 + $0x178] sm:$0xff] }
  0x2e   : > { %599 = vmatpush.bf16.msrb.mxu2 %v2226_v48  ;;  %1401 = vmatpush.bf16.msrb.mxu3 %v2274_v57  ;;  %v2266_v48 = vld [vmem:[%s2922_s1 + $0x1b8] sm:$0xff]  ;;  %v2253_v57 = vld [vmem:[%s2922_s1 + $0x170] sm:$0xff] }
  0x2f   : > { %420 = vmatmul.bf16.vlgmr.msra.gmra.mxu2 %v338_v55  ;;  %771 = vmatmul.bf16.vlgmr.msra.gmra.mxu3 %v701_v60  ;;  %v537_v54 = vsel %vm534_vm1, %v535_v45, %v536_v46  ;;  %v845_v55 = vsel %vm828_vm2, %v836_v50, %v844_v51  ;;  %v2271_v60 = vld [vmem:[%s2922_s1 + $0x1e0] sm:$0xff] }
  0x31   : > { %480 = vmatpush.bf16.msrb.mxu1 %v2209_v56  ;;  %936 = vmatpush.bf16.msrb.mxu0 %v2245_v59  ;;  %v2265_v56 = vld [vmem:[%s2922_s1 + $0x1b0] sm:$0xff] }
  0x32   : > { %600 = vmatpush.bf16.msrb.mxu2 %v2225_v58  ;;  %1402 = vmatpush.bf16.msrb.mxu3 %v2273_v62  ;;  %v704_v58 = vrot.slane %v2642_v53, 1  ;;  %v2281_v59 = vld [vmem:[%s2922_s1 + $0x230] sm:$0xff]  ;;  %v850_v62 = vshll.u32 %v2576_v8, 16 }
  0x34   : > { %v705_v1 = vsel %vm534_vm1, %v702_v19, %v704_v58 }
  0x35   : > { %481 = vmatpush.bf16.msrb.mxu1 %v2208_v61  ;;  %937 = vmatpush.bf16.msrb.mxu0 %v2244_v0  ;;  %v847_v61 = vshrl.u32 %v2576_v8, 16  ;;  %v2252_v0 = vld [vmem:[%s2922_s1 + $0x168] sm:$0xff] }
  0x36   : > { %601 = vmatpush.bf16.msrb.mxu2 %v2224_v63  ;;  %1403 = vmatpush.bf16.msrb.mxu3 %v2272_v28  ;;  %v2264_v63 = vld [vmem:[%s2922_s1 + $0x1a8] sm:$0xff]  ;;  %v856_v28 = vshrl.u32 %v2642_v53, 16 }
  0x39   : > { %482 = vmatpush.bf16.msrb.mxu1 %v2207_v3  ;;  %938 = vmatpush.bf16.msrb.mxu0 %v2243_v5  ;;  %v849_v3 = vrot.slane %v847_v61, 1  ;;  %v2263_v5 = vld [vmem:[%s2922_s1 + $0x1a0] sm:$0xff] }
  0x3a   : > { %602 = vmatpush.bf16.msrb.mxu2 %v2223_v4  ;;  %1404 = vmatpush.bf16.msrb.mxu3 %v2271_v60  ;;  %v852_v4 = vrot.slane %v850_v62, 2  ;;  %v807_v60 = vld [vmem:[%s2451_s6 + $0x2c] sm:$0x3] }
  0x3c   : > { %405 = vmatmul.bf16.gmra.mxu0 %v314_v16  ;;  %415 = vmatmul.bf16.gmra.mxu1 %v330_v17  ;;  %v2691_v16 = vld [vmem:[%s2451_s6 + $0x24] sm:$0xff]  ;;  %v2250_v17 = vld [vmem:[%s2922_s1 + $0x158] sm:$0xff] }
  0x3d   : > { %483 = vmatpush.bf16.msrb.mxu1 %v2206_v9  ;;  %939 = vmatpush.bf16.msrb.mxu0 %v2242_v14  ;;  %v538_v9 = vrot.slane %v2464_v11, 1  ;;  %v2262_v14 = vld [vmem:[%s2922_s1 + $0x198] sm:$0xff]  ;;  %v868_v50 = vshll.u32 %v2691_v16, 16 }
  0x3e   : > { %603 = vmatpush.bf16.msrb.mxu2 %v2222_v13  ;;  %1405 = vmatpush.bf16.msrb.mxu3 %v2270_v2  ;;  %v853_v13 = vor.u32 %v852_v4, %v849_v3  ;;  %v826_v2 = vunpack.c.l.b16 %v807_v60 }
  0x3f   : > { %776 = vmatmul.bf16.gmra.mxu3 %v703_v32  ;;  %v539_v19 = vsel %vm534_vm1, %v536_v46, %v538_v9  ;;  %v653_v32 = vld [vmem:[%s2451_s6 + $0x2c] sm:$0x1]  ;;  %v541_v41 = vsel %vm534_vm1, %v538_v9, %v540_v38  ;;  %v2275_v9 = vld [vmem:[%s2922_s1 + $0x200] sm:$0xff] }
  0x40   : > { %v692_v37 = vunpack.c.l.b16 %v653_v32 }
  0x41   : > { %484 = vmatpush.bf16.msrb.mxu1 %v2205_v21  ;;  %940 = vmatpush.bf16.msrb.mxu0 %v2241_v24  ;;  %v854_v21 = vsel %vm828_vm2, %v844_v51, %v853_v13  ;;  %v2261_v24 = vld [vmem:[%s2922_s1 + $0x190] sm:$0xff]  ;;  %v2259_v51 = vld [vmem:[%s2922_s1 + $0x180] sm:$0xff] }
  0x42   : > { %604 = vmatpush.bf16.msrb.mxu2 %v2221_v22  ;;  %v706_v22 = vrot.slane %v2691_v16, 1  ;;  %1406 = vmatpush.bf16.msrb.mxu3 %v2269_v26  ;;  %v698_v40 = vpack.c.b16 %v692_v37, %v692_v37  ;;  %v1445_v37 = vld [vmem:[%s2451_s6 + $0x8] sm:$0x8] }
  0x44   : > { %v707_v30 = vsel %vm534_vm1, %v704_v58, %v706_v22  ;;  %v708_v45 = vrot.slane %v698_v40, 1 }
  0x45   : > { %485 = vmatpush.bf16.msrb.mxu1 %v2204_v34  ;;  %941 = vmatpush.bf16.msrb.mxu0 %v2240_v36  ;;  %v2268_v34 = vld [vmem:[%s2922_s1 + $0x1c8] sm:$0xff]  ;;  %v861_v36 = vrot.slane %v859_v29, 2 }
  0x46   : > { %605 = vmatpush.bf16.msrb.mxu2 %v2220_v35  ;;  %v858_v35 = vrot.slane %v856_v28, 1  ;;  %1407 = vmatpush.bf16.msrb.mxu3 %v2268_v34 }
  0x48   : > { %v862_v39 = vor.u32 %v861_v36, %v858_v35  ;;  %v979_v35 = vld [vmem:[%s2451_s6 + $0x4] sm:$0xc] }
  0x49   : > { %486 = vmatpush.bf16.msrb.mxu1 %v2203_v42  ;;  %942 = vmatpush.bf16.msrb.mxu0 %v2239_v47  ;;  %v1109_v42 = vld [vmem:[%s2451_s6 + $0x8] sm:$0xc]  ;;  %v1149_v47 = vunpack.c.h.b16 %v2488_v23 }
  0x4a   : > { %606 = vmatpush.bf16.msrb.mxu2 %v2219_v44  ;;  %v863_v44 = vsel %vm828_vm2, %v853_v13, %v862_v39  ;;  %v1148_v46 = vunpack.c.l.b16 %v1109_v42 }
  0x4c   : > { %487 = vmatmul.bf16.vlgmr.msrb.gmra.mxu1 %v2461_v10  ;;  %943 = vmatmul.bf16.vlgmr.msrb.gmra.mxu0 %v845_v55  ;;  %v2280_v10 = vld [vmem:[%s2922_s1 + $0x228] sm:$0xff]  ;;  %v2247_v55 = vld [vmem:[%s2922_s1 + $0x140] sm:$0xff] }
  0x4d   : > { %1065 = vmatpush.bf16.msra.mxu1 %v2254_v49  ;;  %1531 = vmatpush.bf16.msra.mxu0 %v2282_v52  ;;  %v865_v49 = vshrl.u32 %v2691_v16, 16  ;;  %v2276_v52 = vld [vmem:[%s2922_s1 + $0x208] sm:$0xff] }
  0x4e   : > { %1229 = vmatpush.bf16.msra.mxu2 %v2266_v48  ;;  %v2248_v48 = vld [vmem:[%s2922_s1 + $0x148] sm:$0xff] }
  0x4f   : > { %607 = vmatmul.bf16.vlgmr.msrb.gmra.mxu2 %v537_v54  ;;  %781 = vmatmul.bf16.gmra.mxu3 %v705_v1  ;;  %v2267_v54 = vld [vmem:[%s2922_s1 + $0x1c0] sm:$0xff]  ;;  %v867_v58 = vrot.slane %v865_v49, 1  ;;  %v542_v1 = vrot.slane %v2467_v12, 1  ;;  %v1002_v49 = vrot.slane %v2515_v43, 2  ;;  %v2803_v43 = vld [vmem:[%s2451_s6 + $0x28] sm:$0xff] }
  0x50   : > { %1408 = vmatpush.bf16.msrb.mxu3 %v2267_v54 }
  0x51   : > { %1066 = vmatpush.bf16.msra.mxu1 %v2253_v57  ;;  %1532 = vmatpush.bf16.msra.mxu0 %v2281_v59  ;;  %v2754_v57 = vpack.c.b16 %v1149_v47, %v1148_v46  ;;  %v870_v59 = vrot.slane %v868_v50, 2 }
  0x52   : > { %1230 = vmatpush.bf16.msra.mxu2 %v2265_v56  ;;  %v2750_v56 = vld [vmem:[%s2451_s6 + $0x10] sm:$0xff] }
  0x53   : > { %v1296_v61 = vshrl.u32 %v2754_v57, 16  ;;  %v1299_v62 = vshll.u32 %v2754_v57, 16  ;;  %v1166_v46 = vrot.slane %v2750_v56, 2 }
  0x55   : > { %1067 = vmatpush.bf16.msra.mxu1 %v2252_v0  ;;  %1533 = vmatpush.bf16.msra.mxu0 %v2280_v10  ;;  %v1307_v0 = vshll.u32 %v2750_v56, 16  ;;  %v871_v10 = vor.u32 %v870_v59, %v867_v58  ;;  %v1298_v3 = vrot.slane %v1296_v61, 2  ;;  %v1301_v4 = vrot.slane %v1299_v62, 3 }
  0x56   : > { %1231 = vmatpush.bf16.msra.mxu2 %v2264_v63  ;;  %v1304_v63 = vshrl.u32 %v2750_v56, 16  ;;  %v1004_v59 = vrot.slane %v2576_v8, 2 }
  0x57   : > { %v872_v13 = vsel %vm828_vm2, %v862_v39, %v871_v10  ;;  %v1464_v39 = vunpack.c.l.b16 %v1445_v37 }
  0x59   : > { %1068 = vmatpush.bf16.msra.mxu1 %v2251_v6  ;;  %1534 = vmatpush.bf16.msra.mxu0 %v2279_v7  ;;  %v1309_v6 = vrot.slane %v1307_v0, 3  ;;  %v543_v7 = vsel %vm534_vm1, %v540_v38, %v542_v1  ;;  %v998_v38 = vunpack.c.l.b16 %v979_v35  ;;  %v1465_v42 = vpack.c.b16 %v1149_v47, %v1464_v39  ;;  %v1273_v0 = vld [vmem:[%s2451_s6 + $0x30] sm:$0x7] }
  0x5a   : > { %1232 = vmatpush.bf16.msra.mxu2 %v2263_v5  ;;  %v1306_v5 = vrot.slane %v1304_v63, 2  ;;  %v1008_v39 = vrot.slane %v2691_v16, 2 }
  0x5b   : > { %v1467_v50 = vrot.slane %v1465_v42, 3 }
  0x5c   : > { %492 = vmatmul.bf16.gmra.mxu1 %v2473_v15  ;;  %948 = vmatmul.bf16.gmra.mxu0 %v854_v21  ;;  %v2260_v15 = vld [vmem:[%s2922_s1 + $0x188] sm:$0xff] }
  0x5d   : > { %1069 = vmatpush.bf16.msra.mxu1 %v2250_v17  ;;  %1535 = vmatpush.bf16.msra.mxu0 %v2278_v25  ;;  %v1302_v17 = vor.u32 %v1301_v4, %v1298_v3  ;;  %v2774_v25 = vld [vmem:[%s2451_s6 + $0x18] sm:$0xff] }
  0x5e   : > { %1233 = vmatpush.bf16.msra.mxu2 %v2262_v14  ;;  %v2767_v14 = vpack.c.b16 %v826_v2, %v826_v2  ;;  %v1313_v28 = vshrl.u32 %v2774_v25, 16  ;;  %v1316_v29 = vshll.u32 %v2774_v25, 16  ;;  %v1168_v58 = vrot.slane %v2774_v25, 2 }
  0x5f   : > { %612 = vmatmul.bf16.gmra.mxu2 %v539_v19  ;;  %786 = vmatmul.bf16.gmra.mxu3 %v707_v30  ;;  %v1310_v19 = vor.u32 %v1309_v6, %v1306_v5  ;;  %v1470_v60 = vrot.slane %v2774_v25, 3  ;;  %v1005_v2 = vsel %vm1000_vm4, %v1002_v49, %v1004_v59  ;;  %v1292_v5 = vunpack.c.l.b16 %v1273_v0 }
  0x60   : > { %v874_v21 = vshrl.u32 %v2767_v14, 16  ;;  %v1169_v63 = vsel %vm1000_vm4, %v1166_v46, %v1168_v58 }
  0x61   : > { %1070 = vmatpush.bf16.msra.mxu1 %v2249_v27  ;;  %1536 = vmatpush.bf16.msra.mxu0 %v2277_v31  ;;  %v1318_v31 = vrot.slane %v1316_v29, 3  ;;  %v2817_v6 = vpack.c.b16 %v1292_v5, %v1292_v5 }
  0x62   : > { %1234 = vmatpush.bf16.msra.mxu2 %v2261_v24  ;;  %v1311_v24 = vsel %vm1294_vm3, %v1302_v17, %v1310_v19  ;;  %v876_v26 = vrot.slane %v874_v21, 1 }
  0x63   : > { %v1343_v17 = vshll.u32 %v2817_v6, 16 }
  0x65   : > { %1071 = vmatpush.bf16.msra.mxu1 %v2248_v48  ;;  %1537 = vmatpush.bf16.msra.mxu0 %v2276_v52 }
  0x66   : > { %1235 = vmatpush.bf16.msra.mxu2 %v2260_v15  ;;  %v1315_v15 = vrot.slane %v1313_v28, 2 }
  0x68   : > { %v1319_v36 = vor.u32 %v1318_v31, %v1315_v15 }
  0x69   : > { %1072 = vmatpush.bf16.msra.mxu1 %v2247_v55  ;;  %1538 = vmatpush.bf16.msra.mxu0 %v2275_v9 }
  0x6a   : > { %1236 = vmatpush.bf16.msra.mxu2 %v2259_v51  ;;  %v1320_v40 = vsel %vm1294_vm3, %v1310_v19, %v1319_v36 }
  0x6c   : > { %497 = vmatmul.bf16.gmra.mxu1 %v2464_v11  ;;  %953 = vmatmul.bf16.gmra.mxu0 %v863_v44  ;;  %v709_v11 = vsel %vm534_vm1, %v706_v22, %v708_v45  ;;  %v877_v22 = vshll.u32 %v2767_v14, 16 }
  0x6e   : > { %v879_v27 = vrot.slane %v877_v22, 2  ;;  %v1006_v22 = vrot.slane %v2642_v53, 2 }
  0x6f   : > { %617 = vmatmul.bf16.gmra.mxu2 %v541_v41  ;;  %791 = vmatmul.bf16.gmra.mxu3 %v709_v11  ;;  %v2786_v41 = vld [vmem:[%s2451_s6 + $0x20] sm:$0xff] }
  0x70   : > { %v880_v30 = vor.u32 %v879_v27, %v876_v26  ;;  %v1322_v44 = vshrl.u32 %v2786_v41, 16  ;;  %v1325_v45 = vshll.u32 %v2786_v41, 16  ;;  %v1170_v19 = vrot.slane %v2786_v41, 2 }
  0x71   : > { %v1345_v26 = vrot.slane %v1343_v17, 3 }
  0x72   : > { %v881_v34 = vsel %vm828_vm2, %v871_v10, %v880_v30  ;;  %v1324_v51 = vrot.slane %v1322_v44, 2  ;;  %v1327_v52 = vrot.slane %v1325_v45, 3  ;;  %v1171_v27 = vsel %vm1000_vm4, %v1168_v58, %v1170_v19 }
  0x73   : > { %v1009_v45 = vsel %vm1000_vm4, %v1006_v22, %v1008_v39 }
  0x74   : > { %v1328_v11 = vor.u32 %v1327_v52, %v1324_v51 }
  0x76   : > { %v1329_v55 = vsel %vm1294_vm3, %v1319_v36, %v1328_v11  ;;  %v1172_v36 = vrot.slane %v2803_v43, 2 }
  0x7c   : > { %502 = vmatmul.bf16.gmra.mxu1 %v2480_v18  ;;  %958 = vmatmul.bf16.gmra.mxu0 %v872_v13  ;;  %v544_v18 = vrot.slane %v2483_v20, 1  ;;  %v999_v20 = vpack.c.b16 %v683_v33, %v998_v38  ;;  %v1468_v33 = vrot.slane %v2750_v56, 3  ;;  %v1331_v56 = vshrl.u32 %v2803_v43, 16 }
  0x7d   : > { %v1340_v13 = vshrl.u32 %v2817_v6, 16 }
  0x7e   : > { %v545_v32 = vsel %vm534_vm1, %v542_v1, %v544_v18  ;;  %v1001_v48 = vrot.slane %v999_v20, 2  ;;  %v1469_v54 = vsel %vm1466_vm5, %v1467_v50, %v1468_v33  ;;  %v1333_v61 = vrot.slane %v1331_v56, 2  ;;  %v1119_v20 = vld [vmem:[%s2451_s6 + $0x30] sm:$0x3] }
  0x7f   : > { %622 = vmatmul.bf16.gmra.mxu2 %v543_v7  ;;  %1409 = vmatmul.bf16.vlgmr.msrb.gmra.mxu3 %v1311_v24  ;;  %v1471_v3 = vsel %vm1466_vm5, %v1468_v33, %v1470_v60  ;;  %v1472_v24 = vrot.slane %v2786_v41, 3  ;;  %v1342_v25 = vrot.slane %v1340_v13, 2  ;;  %v1007_v18 = vsel %vm1000_vm4, %v1004_v59, %v1006_v22 }
  0x80   : > { %v1003_v47 = vsel %vm1000_vm4, %v1001_v48, %v1002_v49  ;;  %v1173_v41 = vsel %vm1000_vm4, %v1170_v19, %v1172_v36  ;;  %v1158_v48 = vunpack.c.l.b16 %v1119_v20  ;;  %v1010_v56 = vrot.slane %v2767_v14, 2 }
  0x81   : > { %v1473_v30 = vsel %vm1466_vm5, %v1470_v60, %v1472_v24  ;;  %v1346_v15 = vor.u32 %v1345_v26, %v1342_v25 }
  0x82   : > { %v1164_v16 = vpack.c.b16 %v1158_v48, %v1158_v48 }
  0x8c   : > { %507 = vmatmul.bf16.gmra.mxu1 %v2467_v12  ;;  %963 = vmatmul.bf16.gmra.mxu0 %v881_v34  ;;  %v1165_v12 = vrot.slane %v2754_v57, 2  ;;  %v1334_v57 = vshll.u32 %v2803_v43, 16 }
  0x8e   : > { %v1167_v23 = vsel %vm1000_vm4, %v1165_v12, %v1166_v46  ;;  %v1336_v62 = vrot.slane %v1334_v57, 3  ;;  %v1476_v57 = vrot.slane %v2817_v6, 3 }
  0x8f   : > { %627 = vmatmul.bf16.gmra.mxu2 %v545_v32  ;;  %1414 = vmatmul.bf16.gmra.mxu3 %v1320_v40  ;;  %v1474_v40 = vrot.slane %v2803_v43, 3 }
  0x90   : > { %v1337_v4 = vor.u32 %v1336_v62, %v1333_v61 }
  0x91   : > { %v1475_v12 = vsel %vm1466_vm5, %v1472_v24, %v1474_v40  ;;  %v1477_v0 = vsel %vm1466_vm5, %v1474_v40, %v1476_v57 }
  0x92   : > { %v1338_v8 = vsel %vm1294_vm3, %v1328_v11, %v1337_v4  ;;  %v1347_v53 = vsel %vm1294_vm3, %v1337_v4, %v1346_v15  ;;  %v1174_v11 = vrot.slane %v1164_v16, 2 }
  0x94   : > { %v1175_v59 = vsel %vm1000_vm4, %v1172_v36, %v1174_v11 }
  0x9c   : > { %1073 = vmatmul.bf16.vlgmr.msra.gmra.mxu1 %v1003_v47  ;;  %1539 = vmatmul.bf16.vlgmr.msra.gmra.mxu0 %v1469_v54 }
  0x9f   : > { %1237 = vmatmul.bf16.vlgmr.msra.gmra.mxu2 %v1167_v23  ;;  %1419 = vmatmul.bf16.gmra.mxu3 %v1329_v55 }
  0xa9   : > { %v401_v1 = vpop.f32.mrf.mxu0  ;;  %v2812_v10 = vpop.f32.mrf.mxu1 }
  0xac   : > { %1078 = vmatmul.bf16.gmra.mxu1 %v1005_v2  ;;  %1544 = vmatmul.bf16.gmra.mxu0 %v1471_v3 }
  0xaf   : > { %1242 = vmatmul.bf16.gmra.mxu2 %v1169_v63  ;;  %1424 = vmatmul.bf16.gmra.mxu3 %v1338_v8  ;;  %v1011_v63 = vsel %vm1000_vm4, %v1008_v39, %v1010_v56 }
  0xb1   : > { %v403_v7 = vpop.f32.mrf.mxu0  ;;  %v2819_v9 = vpop.f32.mrf.mxu1 }
  0xb2   : > { %v772_v21 = vpop.f32.mrf.mxu3  ;;  %v2831_v31 = vpop.f32.mrf.mxu2 }
  0xb9   : > { %v406_v28 = vpop.f32.mrf.mxu0  ;;  %v2827_v29 = vpop.f32.mrf.mxu1 }
  0xba   : > { %v774_v32 = vpop.f32.mrf.mxu3  ;;  %v2837_v38 = vpop.f32.mrf.mxu2 }
  0xbc   : > { %1083 = vmatmul.bf16.gmra.mxu1 %v1007_v18  ;;  %1549 = vmatmul.bf16.gmra.mxu0 %v1473_v30 }
  0xbf   : > { %1247 = vmatmul.bf16.gmra.mxu2 %v1171_v27  ;;  %1429 = vmatmul.bf16.gmra.mxu3 %v1347_v53 }
  0xc1   : > { %v408_v34 = vpop.f32.mrf.mxu0  ;;  %v2834_v35 = vpop.f32.mrf.mxu1 }
  0xc2   : > { %v777_v37 = vpop.f32.mrf.mxu3 }
  0xc9   : > { %v488_v42 = vpop.f32.mrf.mxu1  ;;  %v944_v44 = vpop.f32.mrf.mxu0 }
  0xca   : > { %v489_v46 = vadd.f32 %v488_v42, %v401_v1  ;;  %v779_v49 = vpop.f32.mrf.mxu3 }
  0xcc   : > { %1088 = vmatmul.bf16.gmra.mxu1 %v1009_v45  ;;  %1554 = vmatmul.bf16.gmra.mxu0 %v1475_v12 }
  0xcf   : > { %1252 = vmatmul.bf16.gmra.mxu2 %v1173_v41 }
  0xd1   : > { %v490_v52 = vpop.f32.mrf.mxu1  ;;  %v946_v23 = vpop.f32.mrf.mxu0 }
  0xd2   : > { %v608_v50 = vpop.f32.mrf.mxu2  ;;  %v491_v47 = vadd.f32 %v490_v52, %v403_v7  ;;  %v782_v55 = vpop.f32.mrf.mxu3 }
  0xd3   : > { %v633_v33 = vadd.f32 %v608_v50, %v489_v46 }
  0xd5   : > { %v797_v51 = vadd.f32 %v772_v21, %v633_v33 }
  0xd7   : > { %v2845_v54 = vadd.f32 %v944_v44, %v797_v51 }
  0xd9   : > { %v493_v61 = vpop.f32.mrf.mxu1  ;;  %v949_v62 = vpop.f32.mrf.mxu0 }
  0xda   : > { %v610_v43 = vpop.f32.mrf.mxu2  ;;  %v494_v1 = vadd.f32 %v493_v61, %v406_v28  ;;  %v784_v3 = vpop.f32.mrf.mxu3 }
  0xdb   : > { %v634_v58 = vadd.f32 %v610_v43, %v491_v47 }
  0xdc   : > { %1093 = vmatmul.bf16.gmra.mxu1 %v1011_v63  ;;  %1559 = vmatmul.bf16.gmra.mxu0 %v1477_v0 }
  0xdd   : > { %v798_v60 = vadd.f32 %v774_v32, %v634_v58 }
  0xdf   : > { %1257 = vmatmul.bf16.gmra.mxu2 %v1175_v59  ;;  %v2852_v2 = vadd.f32 %v946_v23, %v798_v60 }
  0xe1   : > { %v495_v8 = vpop.f32.mrf.mxu1  ;;  %v951_v6 = vpop.f32.mrf.mxu0 }
  0xe2   : > { %v613_v14 = vpop.f32.mrf.mxu2  ;;  %v496_v7 = vadd.f32 %v495_v8, %v408_v34  ;;  %v787_v17 = vpop.f32.mrf.mxu3 }
  0xe3   : > { %v635_v4 = vadd.f32 %v613_v14, %v494_v1 }
  0xe5   : > { %v799_v5 = vadd.f32 %v777_v37, %v635_v4 }
  0xe7   : > { %v2854_v13 = vadd.f32 %v949_v62, %v799_v5 }
  0xe9   : > { %v498_v24 = vpop.f32.mrf.mxu1  ;;  %v954_v25 = vpop.f32.mrf.mxu0 }
  0xea   : > { %v615_v19 = vpop.f32.mrf.mxu2  ;;  %v499_v26 = vadd.f32 %v498_v24, %v2812_v10  ;;  %v789_v30 = vpop.f32.mrf.mxu3 }
  0xeb   : > { %v636_v21 = vadd.f32 %v615_v19, %v496_v7 }
  0xed   : > { %v800_v22 = vadd.f32 %v779_v49, %v636_v21 }
  0xef   : > { %v2857_v27 = vadd.f32 %v951_v6, %v800_v22  ;;  %v2881_v22 = vld [vmem:[%s2923_s2] ss:$0 sm:$0xff] }
  0xf1   : > { %v500_v32 = vpop.f32.mrf.mxu1  ;;  %v956_v53 = vpop.f32.mrf.mxu0 }
  0xf2   : > { %v618_v28 = vpop.f32.mrf.mxu2  ;;  %v501_v34 = vadd.f32 %v500_v32, %v2819_v9  ;;  %v792_v41 = vpop.f32.mrf.mxu3 }
  0xf3   : > { %v637_v18 = vadd.f32 %v618_v28, %v499_v26 }
  0xf5   : > { %v801_v15 = vadd.f32 %v782_v55, %v637_v18 }
  0xf7   : > { %v2860_v36 = vadd.f32 %v954_v25, %v801_v15 }
  0xf9   : > { %v503_v20 = vpop.f32.mrf.mxu1  ;;  %v959_v42 = vpop.f32.mrf.mxu0 }
  0xfa   : > { %v620_v37 = vpop.f32.mrf.mxu2  ;;  %v504_v10 = vadd.f32 %v503_v20, %v2827_v29  ;;  %v794_v9 = vpop.f32.mrf.mxu3 }
  0xfb   : > { %v638_v39 = vadd.f32 %v620_v37, %v501_v34 }
  0xfd   : > { %v802_v40 = vadd.f32 %v784_v3, %v638_v39 }
  0xff   : > { %v2863_v44 = vadd.f32 %v956_v53, %v802_v40 }
 0x101   : > { %v505_v48 = vpop.f32.mrf.mxu1  ;;  %v961_v49 = vpop.f32.mrf.mxu0 }
 0x102   : > { %v623_v45 = vpop.f32.mrf.mxu2  ;;  %v506_v50 = vadd.f32 %v505_v48, %v2834_v35  ;;  %v1410_v55 = vpop.f32.mrf.mxu3 }
 0x103   : > { %v639_v12 = vadd.f32 %v623_v45, %v504_v10 }
 0x105   : > { %v803_v46 = vadd.f32 %v787_v17, %v639_v12 }
 0x107   : > { %v2866_v33 = vadd.f32 %v959_v42, %v803_v46 }
 0x109   : > { %v508_v23 = vpop.f32.mrf.mxu1  ;;  %v964_v47 = vpop.f32.mrf.mxu0 }
 0x10a   : > { %v625_v16 = vpop.f32.mrf.mxu2  ;;  %v509_v11 = vadd.f32 %v508_v23, %v2831_v31  ;;  %v1412_v63 = vpop.f32.mrf.mxu3 }
 0x10b   : > { %v640_v51 = vadd.f32 %v625_v16, %v506_v50 }
 0x10d   : > { %v804_v52 = vadd.f32 %v789_v30, %v640_v51 }
 0x10f   : > { %v2869_v29 = vadd.f32 %v961_v49, %v804_v52 }
 0x111   : > { %v510_v58 = vpop.f32.mrf.mxu1  ;;  %v966_v59 = vpop.f32.mrf.mxu0 }
 0x112   : > { %v628_v43 = vpop.f32.mrf.mxu2  ;;  %v511_v35 = vadd.f32 %v510_v58, %v2837_v38  ;;  %v1415_v8 = vpop.f32.mrf.mxu3 }
 0x113   : > { %v641_v56 = vadd.f32 %v628_v43, %v509_v11 }
 0x115   : > { %v805_v57 = vadd.f32 %v792_v41, %v641_v56 }
 0x117   : > { %v2872_v60 = vadd.f32 %v964_v47, %v805_v57 }
 0x119   : > { %v1074_v1 = vpop.f32.mrf.mxu1  ;;  %v1540_v3 = vpop.f32.mrf.mxu0 }
 0x11a   : > { %v630_v61 = vpop.f32.mrf.mxu2  ;;  %v1099_v31 = vadd.f32 %v1074_v1, %v2845_v54  ;;  %v1417_v15 = vpop.f32.mrf.mxu3 }
 0x11b   : > { %v642_v62 = vadd.f32 %v630_v61, %v511_v35 }
 0x11d   : > { %v806_v0 = vadd.f32 %v794_v9, %v642_v62 }
 0x11f   : > { %v2875_v14 = vadd.f32 %v966_v59, %v806_v0 }
 0x121   : > { %v1076_v6 = vpop.f32.mrf.mxu1  ;;  %v1542_v7 = vpop.f32.mrf.mxu0 }
 0x122   : > { %v1238_v4 = vpop.f32.mrf.mxu2  ;;  %v1100_v38 = vadd.f32 %v1076_v6, %v2852_v2  ;;  %v1420_v10 = vpop.f32.mrf.mxu3 }
 0x123   : > { %v1263_v5 = vadd.f32 %v1238_v4, %v1099_v31 }
 0x125   : > { %v1435_v17 = vadd.f32 %v1410_v55, %v1263_v5 }
 0x127   : > { %v1565_v21 = vadd.f32 %v1540_v3, %v1435_v17 }
 0x129   : > { %v1079_v25 = vpop.f32.mrf.mxu1  ;;  %v1545_v26 = vpop.f32.mrf.mxu0  ;;  %v1579_v28 = vadd.f32 %v2881_v22, %v1565_v21 }
 0x12a   : > { %v1240_v19 = vpop.f32.mrf.mxu2  ;;  %v1101_v30 = vadd.f32 %v1079_v25, %v2854_v13 }
 0x12b   : > { %v1264_v24 = vadd.f32 %v1240_v19, %v1100_v38  ;;  %v1589_v53 = vmax.f32 %v1579_v28, 0.0 }
 0x12d   : > { %v1436_v54 = vadd.f32 %v1412_v63, %v1264_v24 }
 0x12f   : > { %v1566_v18 = vadd.f32 %v1542_v7, %v1436_v54 }
 0x131   : > { %v1580_v2 = vadd.f32 %v2881_v22, %v1566_v18  ;;  %v1081_v40 = vpop.f32.mrf.mxu1  ;;  %v1547_v41 = vpop.f32.mrf.mxu0 }
 0x132   : > { %v1243_v32 = vpop.f32.mrf.mxu2  ;;  %v1102_v13 = vadd.f32 %v1081_v40, %v2857_v27  ;;  %v1422_v27 = vpop.f32.mrf.mxu3 }
 0x133   : > { %v1590_v34 = vmax.f32 %v1580_v2, 0.0  ;;  %v1265_v37 = vadd.f32 %v1243_v32, %v1101_v30 }
 0x135   : > { %v2290_v39 = vpack.c.bf16 %v1590_v34, %v1589_v53  ;;  %v1437_v20 = vadd.f32 %v1415_v8, %v1265_v37 }
 0x137   : > { %2291 = vst [vmem:[%s2890_s9] sm:$0xff] %v2290_v39   ;;  %v1567_v45 = vadd.f32 %v1545_v26, %v1437_v20 }
 0x139   : > { %v1084_v48 = vpop.f32.mrf.mxu1  ;;  %v1550_v49 = vpop.f32.mrf.mxu0  ;;  %v1581_v50 = vadd.f32 %v2881_v22, %v1567_v45 }
 0x13a   : > { %v1245_v42 = vpop.f32.mrf.mxu2  ;;  %v1103_v16 = vadd.f32 %v1084_v48, %v2860_v36  ;;  %v1425_v36 = vpop.f32.mrf.mxu3 }
 0x13b   : > { %v1266_v12 = vadd.f32 %v1245_v42, %v1102_v13  ;;  %v1591_v23 = vmax.f32 %v1581_v50, 0.0 }
 0x13d   : > { %v1438_v46 = vadd.f32 %v1417_v15, %v1266_v12 }
 0x13f   : > { %v1568_v9 = vadd.f32 %v1547_v41, %v1438_v46 }
 0x141   : > { %v1582_v51 = vadd.f32 %v2881_v22, %v1568_v9  ;;  %v1086_v43 = vpop.f32.mrf.mxu1  ;;  %v1552_v56 = vpop.f32.mrf.mxu0 }
 0x142   : > { %v1248_v52 = vpop.f32.mrf.mxu2  ;;  %v1104_v58 = vadd.f32 %v1086_v43, %v2863_v44  ;;  %v1427_v21 = vpop.f32.mrf.mxu3 }
 0x143   : > { %v1592_v47 = vmax.f32 %v1582_v51, 0.0  ;;  %v1267_v11 = vadd.f32 %v1248_v52, %v1103_v16 }
 0x145   : > { %v2295_v55 = vpack.c.bf16 %v1592_v47, %v1591_v23  ;;  %v1439_v57 = vadd.f32 %v1420_v10, %v1267_v11 }
 0x147   : > { %2315 = vst [vmem:[%s2890_s9 + $0x8] sm:$0xff] %v2295_v55   ;;  %v1569_v35 = vadd.f32 %v1550_v49, %v1439_v57 }
 0x149   : > { %v1089_v63 = vpop.f32.mrf.mxu1  ;;  %v1583_v0 = vadd.f32 %v2881_v22, %v1569_v35  ;;  %v1555_v31 = vpop.f32.mrf.mxu0 }
 0x14a   : > { %v1250_v59 = vpop.f32.mrf.mxu2  ;;  %v1105_v3 = vadd.f32 %v1089_v63, %v2866_v33  ;;  %v1430_v32 = vpop.f32.mrf.mxu3 }
 0x14b   : > { %v1268_v61 = vadd.f32 %v1250_v59, %v1104_v58  ;;  %v1593_v8 = vmax.f32 %v1583_v0, 0.0 }
 0x14d   : > { %v1440_v62 = vadd.f32 %v1422_v27, %v1268_v61 }
 0x14f   : > { %v1570_v1 = vadd.f32 %v1552_v56, %v1440_v62 }
 0x151   : > { %v1584_v4 = vadd.f32 %v2881_v22, %v1570_v1  ;;  %v1091_v17 = vpop.f32.mrf.mxu1  ;;  %v1557_v24 = vpop.f32.mrf.mxu0 }
 0x152   : > { %v1253_v5 = vpop.f32.mrf.mxu2  ;;  %v1106_v19 = vadd.f32 %v1091_v17, %v2869_v29  ;;  %v1432_v12 = vpop.f32.mrf.mxu3 }
 0x153   : > { %v1594_v6 = vmax.f32 %v1584_v4, 0.0  ;;  %v1269_v7 = vadd.f32 %v1253_v5, %v1105_v3 }
 0x155   : > { %v2300_v44 = vpack.c.bf16 %v1594_v6, %v1593_v8  ;;  %v1441_v38 = vadd.f32 %v1425_v36, %v1269_v7 }
 0x157   : > { %2316 = vst [vmem:[%s2890_s9 + $0x10] sm:$0xff] %v2300_v44   ;;  %v1571_v25 = vadd.f32 %v1555_v31, %v1441_v38 }
 0x159   : > { %v1094_v28 = vpop.f32.mrf.mxu1  ;;  %v1585_v18 = vadd.f32 %v2881_v22, %v1571_v25  ;;  %v1560_v39 = vpop.f32.mrf.mxu0 }
 0x15a   : > { %v1255_v54 = vpop.f32.mrf.mxu2  ;;  %v1107_v15 = vadd.f32 %v1094_v28, %v2872_v60 }
 0x15b   : > { %v1270_v26 = vadd.f32 %v1255_v54, %v1106_v19  ;;  %v1595_v34 = vmax.f32 %v1585_v18, 0.0 }
 0x15d   : > { %v1442_v33 = vadd.f32 %v1427_v21, %v1270_v26 }
 0x15f   : > { %v1572_v30 = vadd.f32 %v1557_v24, %v1442_v33 }
 0x161   : > { %v1586_v2 = vadd.f32 %v2881_v22, %v1572_v30  ;;  %v1096_v20 = vpop.f32.mrf.mxu1  ;;  %v1562_v48 = vpop.f32.mrf.mxu0 }
 0x162   : > { %v1258_v53 = vpop.f32.mrf.mxu2  ;;  %v1108_v42 = vadd.f32 %v1096_v20, %v2875_v14 }
 0x163   : > { %v1596_v37 = vmax.f32 %v1586_v2, 0.0  ;;  %v1271_v29 = vadd.f32 %v1258_v53, %v1107_v15 }
 0x165   : > { %v2305_v40 = vpack.c.bf16 %v1596_v37, %v1595_v34  ;;  %v1443_v41 = vadd.f32 %v1430_v32, %v1271_v29 }
 0x167   : > { %2317 = vst [vmem:[%s2890_s9 + $0x18] sm:$0xff] %v2305_v40   ;;  %v1573_v13 = vadd.f32 %v1560_v39, %v1443_v41 }
 0x169   : > { %v1587_v10 = vadd.f32 %v2881_v22, %v1573_v13 }
 0x16a   : > { %v1260_v45 = vpop.f32.mrf.mxu2 }
 0x16b   : > { %v1272_v60 = vadd.f32 %v1260_v45, %v1108_v42  ;;  %v1597_v9 = vmax.f32 %v1587_v10, 0.0 }
 0x16d   : > { %v1444_v46 = vadd.f32 %v1432_v12, %v1272_v60 }
 0x16f   : > { %v1574_v49 = vadd.f32 %v1562_v48, %v1444_v46 }
 0x171   : > { %v1588_v50 = vadd.f32 %v2881_v22, %v1574_v49 }
 0x173   : > { %v1598_v16 = vmax.f32 %v1588_v50, 0.0 }
 0x175   : > { %v2310_v51 = vpack.c.bf16 %v1598_v16, %v1597_v9 }
 0x177   : > { %2318 = vst [vmem:[%s2890_s9 + $0x20] sm:$0xff] %v2310_v51  }
 0x178 PF: > { %s13_s14 = sadd.s32 1, %s2384_s14   ;;  %s2925_s12 = smov %s2380_s13 }
 0x179   : > { %p10_p5 = scmp.ge.s32.totalorder %s13_s14, 4   ;;  %s2926_s13 = smov %s2928_s15 }
 0x17b   :  { %12 = sbr.rel (!%p10_p5) target bundleno = 2 (0x2), region = 76 }

</bundles_post_ra>
